<compile_context>
chip_gen: v5e
topology: v5e:2x2
jax: 0.10.0
libtpu: 0.0.40
codegen_flags: <defaults>
</compile_context>

<pallas_src>
import functools

import jax
import jax.numpy as jnp
import numpy as np
from jax import lax
from jax.experimental import pallas as pl
from jax.experimental.pallas import tpu as pltpu


def _silu(x):
    return x * jax.nn.sigmoid(x)


def _row_block(ho, cap=8):
    """Largest divisor of ho that is <= cap (rows of dw output per chunk)."""
    for rb in range(min(cap, ho), 0, -1):
        if ho % rb == 0:
            return rb
    return 1


# ---------------------------------------------------------------------------
# Fused MBConv kernel (one image per grid step)
# ---------------------------------------------------------------------------
def _mbconv_kernel(*refs, h, w, k, stride, has_expand, use_se, use_res):
    idx = 0
    x_ref = refs[idx]; idx += 1                       # (1, cin, h*w) bf16
    if has_expand:
        wexp_ref, sexp_ref, bexp_ref = refs[idx:idx + 3]; idx += 3
    wdw_ref, sdw_ref, bdw_ref = refs[idx:idx + 3]; idx += 3
    if use_se:
        w1_ref, b1_ref, w2_ref, b2_ref = refs[idx:idx + 4]; idx += 4
    wpT_ref, spT_ref, bpT_ref = refs[idx:idx + 3]; idx += 3
    o_ref = refs[idx]; idx += 1                       # (1, cout, ho*wo) f32
    xp_scr = refs[idx]                                # (hp, wp, cexp) f32
    dw_scr = refs[idx + 1]                            # (ho*wo, cexp) bf16

    pad = (k - 1) // 2
    hp, wp, cexp = xp_scr.shape
    ho = (h + 2 * pad - k) // stride + 1
    wo = (w + 2 * pad - k) // stride + 1

    x = x_ref[0]                                      # (cin, h*w) bf16, lane-dense

    # ---- expand 1x1 conv (A^T @ B on the MXU, f32 acc) + folded BN + SiLU ----
    if has_expand:
        e = lax.dot_general(x, wexp_ref[...], (((0,), (0,)), ((), ())),
                            preferred_element_type=jnp.float32)    # (h*w, cexp)
        e = _silu(e * sexp_ref[...] + bexp_ref[...])
    else:
        e = x.astype(jnp.float32).T                                 # (h*w, cin)

    # ---- zero-pad halo in VMEM: zero only the border strips, write interior ----
    if pad > 0:
        xp_scr[0:pad, :, :] = jnp.zeros((pad, wp, cexp), jnp.float32)
        xp_scr[hp - pad:hp, :, :] = jnp.zeros((pad, wp, cexp), jnp.float32)
        xp_scr[:, 0:pad, :] = jnp.zeros((hp, pad, cexp), jnp.float32)
        xp_scr[:, wp - pad:wp, :] = jnp.zeros((hp, pad, cexp), jnp.float32)
    xp_scr[pad:pad + h, pad:pad + w, :] = e.reshape(h, w, cexp)

    # ---- depthwise kxk + BN + SiLU, row-chunked; SE pool summed on the fly ----
    w_dw = wdw_ref[...]                               # (k*k, cexp) f32
    s_dw = sdw_ref[...]
    b_dw = bdw_ref[...]

    if stride == 1:
        rb = _row_block(ho)

        def chunk_body(ci, pool):
            r0 = pl.multiple_of(ci * rb, rb)
            acc = jnp.zeros((rb, wo, cexp), jnp.float32)
            for dwi in range(k):                      # k W-shifted slabs, reused
                slab = xp_scr[pl.ds(r0, rb + k - 1), dwi:dwi + wo, :]
                for dh in range(k):
                    acc = acc + slab[dh:dh + rb] * w_dw[dh * k + dwi]
            act = _silu(acc * s_dw + b_dw)            # (rb, wo, cexp) f32
            m0 = pl.multiple_of(ci * (rb * wo), rb * wo)
            dw_scr[pl.ds(m0, rb * wo), :] = (
                act.reshape(rb * wo, cexp).astype(dw_scr.dtype))
            return pool + jnp.sum(act, axis=(0, 1)).reshape(1, cexp)

        pool_sum = lax.fori_loop(0, ho // rb, chunk_body,
                                 jnp.zeros((1, cexp), jnp.float32), unroll=True)
    else:
        # TODO(synk): stride=2 path still uses sublane-strided slices; restructure
        # as an even/odd column split to avoid the relayouts.
        xp = xp_scr[...]
        acc = jnp.zeros((ho, wo, cexp), jnp.float32)
        for dwi in range(k):
            slab = xp[:, dwi:dwi + (wo - 1) * stride + 1:stride, :]
            for dh in range(k):
                acc = acc + (slab[dh:dh + (ho - 1) * stride + 1:stride]
                             * w_dw[dh * k + dwi])
        act = _silu(acc * s_dw + b_dw)
        dw_scr[...] = act.reshape(ho * wo, cexp).astype(dw_scr.dtype)
        pool_sum = jnp.sum(act, axis=(0, 1)).reshape(1, cexp)

    # ---- SE gate folded into the (cout, cexp) projection weight ----
    wpT = wpT_ref[...]                                # (cout, cexp) f32
    if use_se:
        pooled = pool_sum * (1.0 / float(ho * wo))    # (1, cexp) f32
        t = _silu(jnp.dot(pooled, w1_ref[...],
                          preferred_element_type=jnp.float32) + b1_ref[...])
        gate = jax.nn.sigmoid(jnp.dot(t, w2_ref[...],
                                      preferred_element_type=jnp.float32)
                              + b2_ref[...])          # (1, cexp) f32
        wpT = wpT * gate
    w_sT = (wpT * spT_ref[...]).astype(jnp.bfloat16)  # BN scale folded too

    # ---- project 1x1 (A @ B^T on the MXU) + bias + residual, (cout, M) ----
    yT = lax.dot_general(w_sT, dw_scr[...], (((1,), (1,)), ((), ())),
                         preferred_element_type=jnp.float32)   # (cout, ho*wo)
    yT = yT + bpT_ref[...]
    if use_res:
        yT = yT + x.astype(jnp.float32)               # x already (cin==cout, h*w)
    o_ref[...] = yT[None].astype(o_ref.dtype)


# ---------------------------------------------------------------------------
# Wrapper: NCHW in / NCHW out, bf16 carry, single pallas_call
# ---------------------------------------------------------------------------
def inverted_residual_forward(x_nchw, kp, cfg):
    n, cin, h, w = x_nchw.shape
    k, stride = cfg["kernel"], cfg["stride"]
    pad = (k - 1) // 2
    cexp = kp["w_dw"].shape[-1]
    cout = kp["w_projT"].shape[0]
    ho = (h + 2 * pad - k) // stride + 1
    wo = (w + 2 * pad - k) // stride + 1
    hp, wp = h + 2 * pad, w + 2 * pad

    x_flat = x_nchw.reshape(n, cin, h * w).astype(jnp.bfloat16)   # free reshape

    in_specs = [pl.BlockSpec((1, cin, h * w), lambda i: (i, 0, 0))]
    args = [x_flat]

    def _full(a):
        in_specs.append(pl.BlockSpec(a.shape, lambda i: (0, 0)))
        args.append(a)

    if cfg["has_expand"]:
        _full(kp["w_exp"]); _full(kp["s_exp"]); _full(kp["b_exp"])
    _full(kp["w_dw"]); _full(kp["s_dw"]); _full(kp["b_dw"])
    if cfg["use_se"]:
        _full(kp["w_se1"]); _full(kp["b_se1"])
        _full(kp["w_se2"]); _full(kp["b_se2"])
    _full(kp["w_projT"]); _full(kp["s_projT"]); _full(kp["b_projT"])

    out_flat = pl.pallas_call(
        functools.partial(_mbconv_kernel, h=h, w=w, k=k, stride=stride,
                          has_expand=cfg["has_expand"], use_se=cfg["use_se"],
                          use_res=cfg["use_res"]),
        out_shape=jax.ShapeDtypeStruct((n, cout, ho * wo), jnp.float32),
        grid=(n,),
        in_specs=in_specs,
        out_specs=pl.BlockSpec((1, cout, ho * wo), lambda i: (i, 0, 0)),
        scratch_shapes=[pltpu.VMEM((hp, wp, cexp), jnp.float32),
                        pltpu.VMEM((ho * wo, cexp), jnp.bfloat16)],
        compiler_params=pltpu.CompilerParams(
            dimension_semantics=("parallel",),
            vmem_limit_bytes=32 * 1024 * 1024),
    )(*args)

    return out_flat.reshape(n, cout, ho, wo)          # already NCHW, free reshape


# ---------------------------------------------------------------------------
# Deterministic synthetic parameters (BatchNorm folded, eval mode, eps=1e-5)
# ---------------------------------------------------------------------------
def make_params(key, cin, cexp, cout, csq, k):
    ks = list(jax.random.split(key, 19))

    def bn_fold(kg, kb, km, kv, c):
        gamma = jax.random.uniform(kg, (c,), jnp.float32, 0.5, 1.5)
        beta = jax.random.normal(kb, (c,), jnp.float32) * 0.1
        mean = jax.random.normal(km, (c,), jnp.float32) * 0.1
        var = jax.random.uniform(kv, (c,), jnp.float32, 0.5, 1.5)
        scale = gamma / jnp.sqrt(var + 1e-5)
        return scale, beta - mean * scale

    p = {}
    p["w_exp"] = jax.random.normal(ks[0], (cin, cexp), jnp.float32) / np.sqrt(cin)
    p["s_exp"], p["b_exp"] = bn_fold(ks[1], ks[2], ks[3], ks[4], cexp)
    p["w_dw"] = jax.random.normal(ks[5], (k, k, cexp), jnp.float32) * 0.2
    p["s_dw"], p["b_dw"] = bn_fold(ks[6], ks[7], ks[8], ks[9], cexp)
    p["w_se1"] = jax.random.normal(ks[10], (cexp, csq), jnp.float32) / np.sqrt(cexp)
    p["b_se1"] = jax.random.normal(ks[11], (csq,), jnp.float32) * 0.1
    p["w_se2"] = jax.random.normal(ks[12], (csq, cexp), jnp.float32) / np.sqrt(csq)
    p["b_se2"] = jax.random.normal(ks[13], (cexp,), jnp.float32) * 0.1
    p["w_proj"] = jax.random.normal(ks[14], (cexp, cout), jnp.float32) / np.sqrt(cexp)
    p["s_proj"], p["b_proj"] = bn_fold(ks[15], ks[16], ks[17], ks[18], cout)
    return p


def prepare_params(p, k):
    """One-time kernel-layout prep (casts / transposes hoisted out of the jit)."""
    cexp = p["w_dw"].shape[-1]
    cout = p["w_proj"].shape[1]
    csq = p["w_se1"].shape[1]
    return {
        "w_exp": p["w_exp"].astype(jnp.bfloat16),
        "s_exp": p["s_exp"].reshape(1, cexp),
        "b_exp": p["b_exp"].reshape(1, cexp),
        "w_dw": p["w_dw"].reshape(k * k, cexp),
        "s_dw": p["s_dw"].reshape(1, cexp),
        "b_dw": p["b_dw"].reshape(1, cexp),
        "w_se1": p["w_se1"],
        "b_se1": p["b_se1"].reshape(1, csq),
        "w_se2": p["w_se2"],
        "b_se2": p["b_se2"].reshape(1, cexp),
        "w_projT": p["w_proj"].T,                    # (cout, cexp); gate/BN folded in-kernel
        "s_projT": p["s_proj"].reshape(cout, 1),
        "b_projT": p["b_proj"].reshape(cout, 1),
    }


# ---------------------------------------------------------------------------
# Pure-JAX f32 reference (same math) for a sanity check
# ---------------------------------------------------------------------------
def reference_forward(x_nchw, p, cfg):
    x = jnp.transpose(x_nchw, (0, 2, 3, 1))
    hcur = x
    if cfg["has_expand"]:
        hcur = _silu(jnp.einsum("nhwc,cd->nhwd", hcur, p["w_exp"])
                     * p["s_exp"] + p["b_exp"])
    k, s = cfg["kernel"], cfg["stride"]
    pad = (k - 1) // 2
    hp_ = jnp.pad(hcur, ((0, 0), (pad, pad), (pad, pad), (0, 0)))
    n, hh, ww, cexp = hcur.shape
    ho = (hh + 2 * pad - k) // s + 1
    wo = (ww + 2 * pad - k) // s + 1
    acc = jnp.zeros((n, ho, wo, cexp), jnp.float32)
    for dh in range(k):
        for dw in range(k):
            acc = acc + hp_[:, dh:dh + (ho - 1) * s + 1:s,
                            dw:dw + (wo - 1) * s + 1:s, :] * p["w_dw"][dh, dw]
    hcur = _silu(acc * p["s_dw"] + p["b_dw"])
    if cfg["use_se"]:
        pooled = hcur.mean(axis=(1, 2))
        t = _silu(pooled @ p["w_se1"] + p["b_se1"])
        se = jax.nn.sigmoid(t @ p["w_se2"] + p["b_se2"])
        hcur = hcur * se[:, None, None, :]
    y = jnp.einsum("nhwc,cd->nhwd", hcur, p["w_proj"]) * p["s_proj"] + p["b_proj"]
    if cfg["use_res"]:
        y = y + x
    return jnp.transpose(y, (0, 3, 1, 2))


if __name__ == "__main__":
    # InvertedResidualConfig(kernel=3, input_c=16, out_c=16, expanded_ratio=4,
    #                        stride=1, use_se=True, drop_rate=0.0, index='1a',
    #                        width_coefficient=1.0)
    cin, cout, ratio, kernel, stride = 16, 16, 4, 3, 1
    cexp = cin * ratio           # 64
    csq = cin // 4               # 4
    cfg = dict(kernel=kernel, stride=stride, use_se=True,
               has_expand=(cexp != cin),
               use_res=(stride == 1 and cin == cout))

    key = jax.random.PRNGKey(0)
    kx, kparam = jax.random.split(key)
    x = jax.random.normal(kx, (2, cin, 16, 16), jnp.float32)   # NCHW like PyTorch
    params = make_params(kparam, cin, cexp, cout, csq, kernel)

    # Pre-quantize the bf16-carried matmul inputs so the f32 reference and the
    # bf16 Pallas path see identical values (isolates in-kernel rounding only).
    def _q(a):
        return a.astype(jnp.bfloat16).astype(jnp.float32)
    x = _q(x)
    params["w_exp"] = _q(params["w_exp"])

    kparams = prepare_params(params, kernel)      # hoisted casts / transposes

    fwd = jax.jit(lambda xx, pp: inverted_residual_forward(xx, pp, cfg))
    out = jax.block_until_ready(fwd(x, kparams))

    ref = reference_forward(x, params, cfg)
    np.testing.assert_allclose(np.asarray(out), np.asarray(ref),
                               rtol=5e-2, atol=5e-2)

    print("KERNEL_OK")
</pallas_src>

<mosaic_0001>
module attributes {stable_mosaic.version = 11 : i64} {
  func.func @_mbconv_kernel(%arg0: i32, %arg1: memref<1x16x256xbf16, #tpu.memory_space<vmem>>, %arg2: memref<16x64xbf16, #tpu.memory_space<vmem>>, %arg3: memref<1x64xf32, #tpu.memory_space<vmem>>, %arg4: memref<1x64xf32, #tpu.memory_space<vmem>>, %arg5: memref<9x64xf32, #tpu.memory_space<vmem>>, %arg6: memref<1x64xf32, #tpu.memory_space<vmem>>, %arg7: memref<1x64xf32, #tpu.memory_space<vmem>>, %arg8: memref<64x4xf32, #tpu.memory_space<vmem>>, %arg9: memref<1x4xf32, #tpu.memory_space<vmem>>, %arg10: memref<4x64xf32, #tpu.memory_space<vmem>>, %arg11: memref<1x64xf32, #tpu.memory_space<vmem>>, %arg12: memref<16x64xf32, #tpu.memory_space<vmem>>, %arg13: memref<16x1xf32, #tpu.memory_space<vmem>>, %arg14: memref<16x1xf32, #tpu.memory_space<vmem>>, %arg15: memref<1x16x256xf32, #tpu.memory_space<vmem>>, %arg16: memref<18x18x64xf32, #tpu.memory_space<vmem>>, %arg17: memref<256x64xbf16, #tpu.memory_space<vmem>>) attributes {dimension_semantics = [#tpu.dimension_semantics<parallel>], iteration_bounds = array<i64: 2>, scalar_prefetch = 0 : i64, scratch_operands = 2 : i64, tpu.core_type = #tpu.core_type<tc>, window_params = [{transform_indices = @transform_0, window_bounds = array<i64: 1, 16, 256>}, {pipeline_mode = #tpu.pipeline_mode<synchronous>, transform_indices = @transform_1, window_bounds = array<i64: 16, 64>}, {pipeline_mode = #tpu.pipeline_mode<synchronous>, transform_indices = @transform_2, window_bounds = array<i64: 1, 64>}, {pipeline_mode = #tpu.pipeline_mode<synchronous>, transform_indices = @transform_3, window_bounds = array<i64: 1, 64>}, {pipeline_mode = #tpu.pipeline_mode<synchronous>, transform_indices = @transform_4, window_bounds = array<i64: 9, 64>}, {pipeline_mode = #tpu.pipeline_mode<synchronous>, transform_indices = @transform_5, window_bounds = array<i64: 1, 64>}, {pipeline_mode = #tpu.pipeline_mode<synchronous>, transform_indices = @transform_6, window_bounds = array<i64: 1, 64>}, {pipeline_mode = #tpu.pipeline_mode<synchronous>, transform_indices = @transform_7, window_bounds = array<i64: 64, 4>}, {pipeline_mode = #tpu.pipeline_mode<synchronous>, transform_indices = @transform_8, window_bounds = array<i64: 1, 4>}, {pipeline_mode = #tpu.pipeline_mode<synchronous>, transform_indices = @transform_9, window_bounds = array<i64: 4, 64>}, {pipeline_mode = #tpu.pipeline_mode<synchronous>, transform_indices = @transform_10, window_bounds = array<i64: 1, 64>}, {pipeline_mode = #tpu.pipeline_mode<synchronous>, transform_indices = @transform_11, window_bounds = array<i64: 16, 64>}, {pipeline_mode = #tpu.pipeline_mode<synchronous>, transform_indices = @transform_12, window_bounds = array<i64: 16, 1>}, {pipeline_mode = #tpu.pipeline_mode<synchronous>, transform_indices = @transform_13, window_bounds = array<i64: 16, 1>}, {transform_indices = @transform_14, window_bounds = array<i64: 1, 16, 256>}]} {
    %c0 = arith.constant 0 : index
    %c0_0 = arith.constant 0 : index
    %c0_1 = arith.constant 0 : index
    %0 = vector.load %arg1[%c0, %c0_0, %c0_1] : memref<1x16x256xbf16, #tpu.memory_space<vmem>>, vector<1x16x256xbf16>
    %1 = vector.shape_cast %0 : vector<1x16x256xbf16> to vector<16x256xbf16>
    %c0_2 = arith.constant 0 : index
    %c0_3 = arith.constant 0 : index
    %2 = vector.load %arg2[%c0_2, %c0_3] : memref<16x64xbf16, #tpu.memory_space<vmem>>, vector<16x64xbf16>
    %cst = arith.constant dense<0.000000e+00> : vector<256x64xf32>
    %3 = tpu.matmul %1, %2, %cst {dimension_numbers = #tpu.dot_dimension_numbers<[0], [0], [1], [1], [0, 1, 1, 1], [], []>} : vector<16x256xbf16>, vector<16x64xbf16>, vector<256x64xf32> -> vector<256x64xf32>
    %c0_4 = arith.constant 0 : index
    %c0_5 = arith.constant 0 : index
    %4 = vector.load %arg3[%c0_4, %c0_5] : memref<1x64xf32, #tpu.memory_space<vmem>>, vector<1x64xf32>
    %5 = vector.broadcast %4 : vector<1x64xf32> to vector<256x64xf32>
    %6 = arith.mulf %3, %5 : vector<256x64xf32>
    %c0_6 = arith.constant 0 : index
    %c0_7 = arith.constant 0 : index
    %7 = vector.load %arg4[%c0_6, %c0_7] : memref<1x64xf32, #tpu.memory_space<vmem>>, vector<1x64xf32>
    %8 = vector.broadcast %7 : vector<1x64xf32> to vector<256x64xf32>
    %9 = arith.addf %6, %8 : vector<256x64xf32>
    %10 = arith.negf %9 : vector<256x64xf32>
    %11 = math.exp %10 : vector<256x64xf32>
    %cst_8 = arith.constant 1.000000e+00 : f32
    %12 = vector.broadcast %cst_8 : f32 to vector<256x64xf32>
    %13 = arith.addf %12, %11 : vector<256x64xf32>
    %14 = arith.divf %12, %13 : vector<256x64xf32>
    %15 = arith.mulf %9, %14 : vector<256x64xf32>
    %cst_9 = arith.constant 0.000000e+00 : f32
    %16 = vector.broadcast %cst_9 : f32 to vector<1x18x64xf32>
    %c0_10 = arith.constant 0 : index
    %c0_11 = arith.constant 0 : index
    %c0_12 = arith.constant 0 : index
    %17 = vector.load %arg16[%c0_10, %c0_11, %c0_12] : memref<18x18x64xf32, #tpu.memory_space<vmem>>, vector<1x18x64xf32>
    tpu.vector_store %arg16[%c0_10, %c0_11, %c0_12], %16 {strides = array<i32>} : memref<18x18x64xf32, #tpu.memory_space<vmem>>, vector<1x18x64xf32>,
    %cst_13 = arith.constant 0.000000e+00 : f32
    %18 = vector.broadcast %cst_13 : f32 to vector<1x18x64xf32>
    %c17 = arith.constant 17 : index
    %c0_14 = arith.constant 0 : index
    %c0_15 = arith.constant 0 : index
    %19 = vector.load %arg16[%c17, %c0_14, %c0_15] : memref<18x18x64xf32, #tpu.memory_space<vmem>>, vector<1x18x64xf32>
    tpu.vector_store %arg16[%c17, %c0_14, %c0_15], %18 {strides = array<i32>} : memref<18x18x64xf32, #tpu.memory_space<vmem>>, vector<1x18x64xf32>,
    %cst_16 = arith.constant 0.000000e+00 : f32
    %20 = vector.broadcast %cst_16 : f32 to vector<18x1x64xf32>
    %c0_17 = arith.constant 0 : index
    %c0_18 = arith.constant 0 : index
    %c0_19 = arith.constant 0 : index
    %21 = vector.load %arg16[%c0_17, %c0_18, %c0_19] : memref<18x18x64xf32, #tpu.memory_space<vmem>>, vector<18x1x64xf32>
    tpu.vector_store %arg16[%c0_17, %c0_18, %c0_19], %20 {strides = array<i32>} : memref<18x18x64xf32, #tpu.memory_space<vmem>>, vector<18x1x64xf32>,
    %cst_20 = arith.constant 0.000000e+00 : f32
    %22 = vector.broadcast %cst_20 : f32 to vector<18x1x64xf32>
    %c0_21 = arith.constant 0 : index
    %c17_22 = arith.constant 17 : index
    %c0_23 = arith.constant 0 : index
    %23 = vector.load %arg16[%c0_21, %c17_22, %c0_23] : memref<18x18x64xf32, #tpu.memory_space<vmem>>, vector<18x1x64xf32>
    tpu.vector_store %arg16[%c0_21, %c17_22, %c0_23], %22 {strides = array<i32>} : memref<18x18x64xf32, #tpu.memory_space<vmem>>, vector<18x1x64xf32>,
    %24 = vector.shape_cast %15 : vector<256x64xf32> to vector<16x16x64xf32>
    %c1 = arith.constant 1 : index
    %c1_24 = arith.constant 1 : index
    %c0_25 = arith.constant 0 : index
    %25 = vector.load %arg16[%c1, %c1_24, %c0_25] : memref<18x18x64xf32, #tpu.memory_space<vmem>>, vector<16x16x64xf32>
    tpu.vector_store %arg16[%c1, %c1_24, %c0_25], %24 {strides = array<i32>} : memref<18x18x64xf32, #tpu.memory_space<vmem>>, vector<16x16x64xf32>,
    %c0_26 = arith.constant 0 : index
    %c0_27 = arith.constant 0 : index
    %26 = vector.load %arg5[%c0_26, %c0_27] : memref<9x64xf32, #tpu.memory_space<vmem>>, vector<9x64xf32>
    %c0_28 = arith.constant 0 : index
    %c0_29 = arith.constant 0 : index
    %27 = vector.load %arg6[%c0_28, %c0_29] : memref<1x64xf32, #tpu.memory_space<vmem>>, vector<1x64xf32>
    %c0_30 = arith.constant 0 : index
    %c0_31 = arith.constant 0 : index
    %28 = vector.load %arg7[%c0_30, %c0_31] : memref<1x64xf32, #tpu.memory_space<vmem>>, vector<1x64xf32>
    %cst_32 = arith.constant 0.000000e+00 : f32
    %29 = vector.broadcast %cst_32 : f32 to vector<1x64xf32>
    %c0_i32 = arith.constant 0 : i32
    %c8_i32 = arith.constant 8 : i32
    %30 = arith.muli %c0_i32, %c8_i32 : i32
    %31 = tpu.assume_multiple %30, 8 : i32
    %cst_33 = arith.constant 0.000000e+00 : f32
    %32 = vector.broadcast %cst_33 : f32 to vector<8x16x64xf32>
    %33 = arith.index_cast %31 : i32 to index
    %c0_34 = arith.constant 0 : index
    %c0_35 = arith.constant 0 : index
    %34 = vector.load %arg16[%33, %c0_34, %c0_35] : memref<18x18x64xf32, #tpu.memory_space<vmem>>, vector<10x16x64xf32>
    %35 = vector.extract_strided_slice %34 {offsets = [0, 0, 0], sizes = [8, 16, 64], strides = [1, 1, 1]} : vector<10x16x64xf32> to vector<8x16x64xf32>
    %36 = vector.extract_strided_slice %26 {offsets = [0, 0], sizes = [1, 64], strides = [1, 1]} : vector<9x64xf32> to vector<1x64xf32>
    %37 = vector.shape_cast %36 : vector<1x64xf32> to vector<64xf32>
    %38 = vector.shape_cast %37 : vector<64xf32> to vector<1x1x64xf32>
    %39 = vector.broadcast %38 : vector<1x1x64xf32> to vector<8x16x64xf32>
    %40 = arith.mulf %35, %39 : vector<8x16x64xf32>
    %41 = arith.addf %32, %40 : vector<8x16x64xf32>
    %42 = vector.extract_strided_slice %34 {offsets = [1, 0, 0], sizes = [8, 16, 64], strides = [1, 1, 1]} : vector<10x16x64xf32> to vector<8x16x64xf32>
    %43 = vector.extract_strided_slice %26 {offsets = [3, 0], sizes = [1, 64], strides = [1, 1]} : vector<9x64xf32> to vector<1x64xf32>
    %44 = vector.shape_cast %43 : vector<1x64xf32> to vector<64xf32>
    %45 = vector.shape_cast %44 : vector<64xf32> to vector<1x1x64xf32>
    %46 = vector.broadcast %45 : vector<1x1x64xf32> to vector<8x16x64xf32>
    %47 = arith.mulf %42, %46 : vector<8x16x64xf32>
    %48 = arith.addf %41, %47 : vector<8x16x64xf32>
    %49 = vector.extract_strided_slice %34 {offsets = [2, 0, 0], sizes = [8, 16, 64], strides = [1, 1, 1]} : vector<10x16x64xf32> to vector<8x16x64xf32>
    %50 = vector.extract_strided_slice %26 {offsets = [6, 0], sizes = [1, 64], strides = [1, 1]} : vector<9x64xf32> to vector<1x64xf32>
    %51 = vector.shape_cast %50 : vector<1x64xf32> to vector<64xf32>
    %52 = vector.shape_cast %51 : vector<64xf32> to vector<1x1x64xf32>
    %53 = vector.broadcast %52 : vector<1x1x64xf32> to vector<8x16x64xf32>
    %54 = arith.mulf %49, %53 : vector<8x16x64xf32>
    %55 = arith.addf %48, %54 : vector<8x16x64xf32>
    %56 = arith.index_cast %31 : i32 to index
    %c1_36 = arith.constant 1 : index
    %c0_37 = arith.constant 0 : index
    %57 = vector.load %arg16[%56, %c1_36, %c0_37] : memref<18x18x64xf32, #tpu.memory_space<vmem>>, vector<10x16x64xf32>
    %58 = vector.extract_strided_slice %57 {offsets = [0, 0, 0], sizes = [8, 16, 64], strides = [1, 1, 1]} : vector<10x16x64xf32> to vector<8x16x64xf32>
    %59 = vector.extract_strided_slice %26 {offsets = [1, 0], sizes = [1, 64], strides = [1, 1]} : vector<9x64xf32> to vector<1x64xf32>
    %60 = vector.shape_cast %59 : vector<1x64xf32> to vector<64xf32>
    %61 = vector.shape_cast %60 : vector<64xf32> to vector<1x1x64xf32>
    %62 = vector.broadcast %61 : vector<1x1x64xf32> to vector<8x16x64xf32>
    %63 = arith.mulf %58, %62 : vector<8x16x64xf32>
    %64 = arith.addf %55, %63 : vector<8x16x64xf32>
    %65 = vector.extract_strided_slice %57 {offsets = [1, 0, 0], sizes = [8, 16, 64], strides = [1, 1, 1]} : vector<10x16x64xf32> to vector<8x16x64xf32>
    %66 = vector.extract_strided_slice %26 {offsets = [4, 0], sizes = [1, 64], strides = [1, 1]} : vector<9x64xf32> to vector<1x64xf32>
    %67 = vector.shape_cast %66 : vector<1x64xf32> to vector<64xf32>
    %68 = vector.shape_cast %67 : vector<64xf32> to vector<1x1x64xf32>
    %69 = vector.broadcast %68 : vector<1x1x64xf32> to vector<8x16x64xf32>
    %70 = arith.mulf %65, %69 : vector<8x16x64xf32>
    %71 = arith.addf %64, %70 : vector<8x16x64xf32>
    %72 = vector.extract_strided_slice %57 {offsets = [2, 0, 0], sizes = [8, 16, 64], strides = [1, 1, 1]} : vector<10x16x64xf32> to vector<8x16x64xf32>
    %73 = vector.extract_strided_slice %26 {offsets = [7, 0], sizes = [1, 64], strides = [1, 1]} : vector<9x64xf32> to vector<1x64xf32>
    %74 = vector.shape_cast %73 : vector<1x64xf32> to vector<64xf32>
    %75 = vector.shape_cast %74 : vector<64xf32> to vector<1x1x64xf32>
    %76 = vector.broadcast %75 : vector<1x1x64xf32> to vector<8x16x64xf32>
    %77 = arith.mulf %72, %76 : vector<8x16x64xf32>
    %78 = arith.addf %71, %77 : vector<8x16x64xf32>
    %79 = arith.index_cast %31 : i32 to index
    %c2 = arith.constant 2 : index
    %c0_38 = arith.constant 0 : index
    %80 = vector.load %arg16[%79, %c2, %c0_38] : memref<18x18x64xf32, #tpu.memory_space<vmem>>, vector<10x16x64xf32>
    %81 = vector.extract_strided_slice %80 {offsets = [0, 0, 0], sizes = [8, 16, 64], strides = [1, 1, 1]} : vector<10x16x64xf32> to vector<8x16x64xf32>
    %82 = vector.extract_strided_slice %26 {offsets = [2, 0], sizes = [1, 64], strides = [1, 1]} : vector<9x64xf32> to vector<1x64xf32>
    %83 = vector.shape_cast %82 : vector<1x64xf32> to vector<64xf32>
    %84 = vector.shape_cast %83 : vector<64xf32> to vector<1x1x64xf32>
    %85 = vector.broadcast %84 : vector<1x1x64xf32> to vector<8x16x64xf32>
    %86 = arith.mulf %81, %85 : vector<8x16x64xf32>
    %87 = arith.addf %78, %86 : vector<8x16x64xf32>
    %88 = vector.extract_strided_slice %80 {offsets = [1, 0, 0], sizes = [8, 16, 64], strides = [1, 1, 1]} : vector<10x16x64xf32> to vector<8x16x64xf32>
    %89 = vector.extract_strided_slice %26 {offsets = [5, 0], sizes = [1, 64], strides = [1, 1]} : vector<9x64xf32> to vector<1x64xf32>
    %90 = vector.shape_cast %89 : vector<1x64xf32> to vector<64xf32>
    %91 = vector.shape_cast %90 : vector<64xf32> to vector<1x1x64xf32>
    %92 = vector.broadcast %91 : vector<1x1x64xf32> to vector<8x16x64xf32>
    %93 = arith.mulf %88, %92 : vector<8x16x64xf32>
    %94 = arith.addf %87, %93 : vector<8x16x64xf32>
    %95 = vector.extract_strided_slice %80 {offsets = [2, 0, 0], sizes = [8, 16, 64], strides = [1, 1, 1]} : vector<10x16x64xf32> to vector<8x16x64xf32>
    %96 = vector.extract_strided_slice %26 {offsets = [8, 0], sizes = [1, 64], strides = [1, 1]} : vector<9x64xf32> to vector<1x64xf32>
    %97 = vector.shape_cast %96 : vector<1x64xf32> to vector<64xf32>
    %98 = vector.shape_cast %97 : vector<64xf32> to vector<1x1x64xf32>
    %99 = vector.broadcast %98 : vector<1x1x64xf32> to vector<8x16x64xf32>
    %100 = arith.mulf %95, %99 : vector<8x16x64xf32>
    %101 = arith.addf %94, %100 : vector<8x16x64xf32>
    %102 = vector.shape_cast %27 : vector<1x64xf32> to vector<1x1x64xf32>
    %103 = vector.broadcast %102 : vector<1x1x64xf32> to vector<8x16x64xf32>
    %104 = arith.mulf %101, %103 : vector<8x16x64xf32>
    %105 = vector.shape_cast %28 : vector<1x64xf32> to vector<1x1x64xf32>
    %106 = vector.broadcast %105 : vector<1x1x64xf32> to vector<8x16x64xf32>
    %107 = arith.addf %104, %106 : vector<8x16x64xf32>
    %108 = arith.negf %107 : vector<8x16x64xf32>
    %109 = math.exp %108 : vector<8x16x64xf32>
    %cst_39 = arith.constant 1.000000e+00 : f32
    %110 = vector.broadcast %cst_39 : f32 to vector<8x16x64xf32>
    %111 = arith.addf %110, %109 : vector<8x16x64xf32>
    %112 = arith.divf %110, %111 : vector<8x16x64xf32>
    %113 = arith.mulf %107, %112 : vector<8x16x64xf32>
    %c128_i32 = arith.constant 128 : i32
    %114 = arith.muli %c0_i32, %c128_i32 : i32
    %115 = tpu.assume_multiple %114, 128 : i32
    %116 = vector.shape_cast %113 : vector<8x16x64xf32> to vector<128x64xf32>
    %117 = arith.truncf %116 : vector<128x64xf32> to vector<128x64xbf16>
    %118 = arith.index_cast %115 : i32 to index
    %c0_40 = arith.constant 0 : index
    %119 = vector.load %arg17[%118, %c0_40] : memref<256x64xbf16, #tpu.memory_space<vmem>>, vector<128x64xbf16>
    tpu.vector_store %arg17[%118, %c0_40], %117 {strides = array<i32>} : memref<256x64xbf16, #tpu.memory_space<vmem>>, vector<128x64xbf16>,
    %cst_41 = arith.constant dense<0.000000e+00> : vector<64xf32>
    %120 = vector.multi_reduction <add>, %113, %cst_41 [0, 1] : vector<8x16x64xf32> to vector<64xf32>
    %121 = vector.shape_cast %120 : vector<64xf32> to vector<1x64xf32>
    %122 = arith.addf %29, %121 : vector<1x64xf32>
    %c1_i32 = arith.constant 1 : i32
    %c8_i32_42 = arith.constant 8 : i32
    %123 = arith.muli %c1_i32, %c8_i32_42 : i32
    %124 = tpu.assume_multiple %123, 8 : i32
    %cst_43 = arith.constant 0.000000e+00 : f32
    %125 = vector.broadcast %cst_43 : f32 to vector<8x16x64xf32>
    %126 = arith.index_cast %124 : i32 to index
    %c0_44 = arith.constant 0 : index
    %c0_45 = arith.constant 0 : index
    %127 = vector.load %arg16[%126, %c0_44, %c0_45] : memref<18x18x64xf32, #tpu.memory_space<vmem>>, vector<10x16x64xf32>
    %128 = vector.extract_strided_slice %127 {offsets = [0, 0, 0], sizes = [8, 16, 64], strides = [1, 1, 1]} : vector<10x16x64xf32> to vector<8x16x64xf32>
    %129 = vector.extract_strided_slice %26 {offsets = [0, 0], sizes = [1, 64], strides = [1, 1]} : vector<9x64xf32> to vector<1x64xf32>
    %130 = vector.shape_cast %129 : vector<1x64xf32> to vector<64xf32>
    %131 = vector.shape_cast %130 : vector<64xf32> to vector<1x1x64xf32>
    %132 = vector.broadcast %131 : vector<1x1x64xf32> to vector<8x16x64xf32>
    %133 = arith.mulf %128, %132 : vector<8x16x64xf32>
    %134 = arith.addf %125, %133 : vector<8x16x64xf32>
    %135 = vector.extract_strided_slice %127 {offsets = [1, 0, 0], sizes = [8, 16, 64], strides = [1, 1, 1]} : vector<10x16x64xf32> to vector<8x16x64xf32>
    %136 = vector.extract_strided_slice %26 {offsets = [3, 0], sizes = [1, 64], strides = [1, 1]} : vector<9x64xf32> to vector<1x64xf32>
    %137 = vector.shape_cast %136 : vector<1x64xf32> to vector<64xf32>
    %138 = vector.shape_cast %137 : vector<64xf32> to vector<1x1x64xf32>
    %139 = vector.broadcast %138 : vector<1x1x64xf32> to vector<8x16x64xf32>
    %140 = arith.mulf %135, %139 : vector<8x16x64xf32>
    %141 = arith.addf %134, %140 : vector<8x16x64xf32>
    %142 = vector.extract_strided_slice %127 {offsets = [2, 0, 0], sizes = [8, 16, 64], strides = [1, 1, 1]} : vector<10x16x64xf32> to vector<8x16x64xf32>
    %143 = vector.extract_strided_slice %26 {offsets = [6, 0], sizes = [1, 64], strides = [1, 1]} : vector<9x64xf32> to vector<1x64xf32>
    %144 = vector.shape_cast %143 : vector<1x64xf32> to vector<64xf32>
    %145 = vector.shape_cast %144 : vector<64xf32> to vector<1x1x64xf32>
    %146 = vector.broadcast %145 : vector<1x1x64xf32> to vector<8x16x64xf32>
    %147 = arith.mulf %142, %146 : vector<8x16x64xf32>
    %148 = arith.addf %141, %147 : vector<8x16x64xf32>
    %149 = arith.index_cast %124 : i32 to index
    %c1_46 = arith.constant 1 : index
    %c0_47 = arith.constant 0 : index
    %150 = vector.load %arg16[%149, %c1_46, %c0_47] : memref<18x18x64xf32, #tpu.memory_space<vmem>>, vector<10x16x64xf32>
    %151 = vector.extract_strided_slice %150 {offsets = [0, 0, 0], sizes = [8, 16, 64], strides = [1, 1, 1]} : vector<10x16x64xf32> to vector<8x16x64xf32>
    %152 = vector.extract_strided_slice %26 {offsets = [1, 0], sizes = [1, 64], strides = [1, 1]} : vector<9x64xf32> to vector<1x64xf32>
    %153 = vector.shape_cast %152 : vector<1x64xf32> to vector<64xf32>
    %154 = vector.shape_cast %153 : vector<64xf32> to vector<1x1x64xf32>
    %155 = vector.broadcast %154 : vector<1x1x64xf32> to vector<8x16x64xf32>
    %156 = arith.mulf %151, %155 : vector<8x16x64xf32>
    %157 = arith.addf %148, %156 : vector<8x16x64xf32>
    %158 = vector.extract_strided_slice %150 {offsets = [1, 0, 0], sizes = [8, 16, 64], strides = [1, 1, 1]} : vector<10x16x64xf32> to vector<8x16x64xf32>
    %159 = vector.extract_strided_slice %26 {offsets = [4, 0], sizes = [1, 64], strides = [1, 1]} : vector<9x64xf32> to vector<1x64xf32>
    %160 = vector.shape_cast %159 : vector<1x64xf32> to vector<64xf32>
    %161 = vector.shape_cast %160 : vector<64xf32> to vector<1x1x64xf32>
    %162 = vector.broadcast %161 : vector<1x1x64xf32> to vector<8x16x64xf32>
    %163 = arith.mulf %158, %162 : vector<8x16x64xf32>
    %164 = arith.addf %157, %163 : vector<8x16x64xf32>
    %165 = vector.extract_strided_slice %150 {offsets = [2, 0, 0], sizes = [8, 16, 64], strides = [1, 1, 1]} : vector<10x16x64xf32> to vector<8x16x64xf32>
    %166 = vector.extract_strided_slice %26 {offsets = [7, 0], sizes = [1, 64], strides = [1, 1]} : vector<9x64xf32> to vector<1x64xf32>
    %167 = vector.shape_cast %166 : vector<1x64xf32> to vector<64xf32>
    %168 = vector.shape_cast %167 : vector<64xf32> to vector<1x1x64xf32>
    %169 = vector.broadcast %168 : vector<1x1x64xf32> to vector<8x16x64xf32>
    %170 = arith.mulf %165, %169 : vector<8x16x64xf32>
    %171 = arith.addf %164, %170 : vector<8x16x64xf32>
    %172 = arith.index_cast %124 : i32 to index
    %c2_48 = arith.constant 2 : index
    %c0_49 = arith.constant 0 : index
    %173 = vector.load %arg16[%172, %c2_48, %c0_49] : memref<18x18x64xf32, #tpu.memory_space<vmem>>, vector<10x16x64xf32>
    %174 = vector.extract_strided_slice %173 {offsets = [0, 0, 0], sizes = [8, 16, 64], strides = [1, 1, 1]} : vector<10x16x64xf32> to vector<8x16x64xf32>
    %175 = vector.extract_strided_slice %26 {offsets = [2, 0], sizes = [1, 64], strides = [1, 1]} : vector<9x64xf32> to vector<1x64xf32>
    %176 = vector.shape_cast %175 : vector<1x64xf32> to vector<64xf32>
    %177 = vector.shape_cast %176 : vector<64xf32> to vector<1x1x64xf32>
    %178 = vector.broadcast %177 : vector<1x1x64xf32> to vector<8x16x64xf32>
    %179 = arith.mulf %174, %178 : vector<8x16x64xf32>
    %180 = arith.addf %171, %179 : vector<8x16x64xf32>
    %181 = vector.extract_strided_slice %173 {offsets = [1, 0, 0], sizes = [8, 16, 64], strides = [1, 1, 1]} : vector<10x16x64xf32> to vector<8x16x64xf32>
    %182 = vector.extract_strided_slice %26 {offsets = [5, 0], sizes = [1, 64], strides = [1, 1]} : vector<9x64xf32> to vector<1x64xf32>
    %183 = vector.shape_cast %182 : vector<1x64xf32> to vector<64xf32>
    %184 = vector.shape_cast %183 : vector<64xf32> to vector<1x1x64xf32>
    %185 = vector.broadcast %184 : vector<1x1x64xf32> to vector<8x16x64xf32>
    %186 = arith.mulf %181, %185 : vector<8x16x64xf32>
    %187 = arith.addf %180, %186 : vector<8x16x64xf32>
    %188 = vector.extract_strided_slice %173 {offsets = [2, 0, 0], sizes = [8, 16, 64], strides = [1, 1, 1]} : vector<10x16x64xf32> to vector<8x16x64xf32>
    %189 = vector.extract_strided_slice %26 {offsets = [8, 0], sizes = [1, 64], strides = [1, 1]} : vector<9x64xf32> to vector<1x64xf32>
    %190 = vector.shape_cast %189 : vector<1x64xf32> to vector<64xf32>
    %191 = vector.shape_cast %190 : vector<64xf32> to vector<1x1x64xf32>
    %192 = vector.broadcast %191 : vector<1x1x64xf32> to vector<8x16x64xf32>
    %193 = arith.mulf %188, %192 : vector<8x16x64xf32>
    %194 = arith.addf %187, %193 : vector<8x16x64xf32>
    %195 = vector.shape_cast %27 : vector<1x64xf32> to vector<1x1x64xf32>
    %196 = vector.broadcast %195 : vector<1x1x64xf32> to vector<8x16x64xf32>
    %197 = arith.mulf %194, %196 : vector<8x16x64xf32>
    %198 = vector.shape_cast %28 : vector<1x64xf32> to vector<1x1x64xf32>
    %199 = vector.broadcast %198 : vector<1x1x64xf32> to vector<8x16x64xf32>
    %200 = arith.addf %197, %199 : vector<8x16x64xf32>
    %201 = arith.negf %200 : vector<8x16x64xf32>
    %202 = math.exp %201 : vector<8x16x64xf32>
    %cst_50 = arith.constant 1.000000e+00 : f32
    %203 = vector.broadcast %cst_50 : f32 to vector<8x16x64xf32>
    %204 = arith.addf %203, %202 : vector<8x16x64xf32>
    %205 = arith.divf %203, %204 : vector<8x16x64xf32>
    %206 = arith.mulf %200, %205 : vector<8x16x64xf32>
    %c128_i32_51 = arith.constant 128 : i32
    %207 = arith.muli %c1_i32, %c128_i32_51 : i32
    %208 = tpu.assume_multiple %207, 128 : i32
    %209 = vector.shape_cast %206 : vector<8x16x64xf32> to vector<128x64xf32>
    %210 = arith.truncf %209 : vector<128x64xf32> to vector<128x64xbf16>
    %211 = arith.index_cast %208 : i32 to index
    %c0_52 = arith.constant 0 : index
    %212 = vector.load %arg17[%211, %c0_52] : memref<256x64xbf16, #tpu.memory_space<vmem>>, vector<128x64xbf16>
    tpu.vector_store %arg17[%211, %c0_52], %210 {strides = array<i32>} : memref<256x64xbf16, #tpu.memory_space<vmem>>, vector<128x64xbf16>,
    %cst_53 = arith.constant dense<0.000000e+00> : vector<64xf32>
    %213 = vector.multi_reduction <add>, %206, %cst_53 [0, 1] : vector<8x16x64xf32> to vector<64xf32>
    %214 = vector.shape_cast %213 : vector<64xf32> to vector<1x64xf32>
    %215 = arith.addf %122, %214 : vector<1x64xf32>
    %c2_i32 = arith.constant 2 : i32
    %c0_54 = arith.constant 0 : index
    %c0_55 = arith.constant 0 : index
    %216 = vector.load %arg12[%c0_54, %c0_55] : memref<16x64xf32, #tpu.memory_space<vmem>>, vector<16x64xf32>
    %cst_56 = arith.constant 3.906250e-03 : f32
    %217 = vector.broadcast %cst_56 : f32 to vector<1x64xf32>
    %218 = arith.mulf %215, %217 : vector<1x64xf32>
    %c0_57 = arith.constant 0 : index
    %c0_58 = arith.constant 0 : index
    %219 = vector.load %arg8[%c0_57, %c0_58] : memref<64x4xf32, #tpu.memory_space<vmem>>, vector<64x4xf32>
    %cst_59 = arith.constant dense<0.000000e+00> : vector<1x4xf32>
    %220 = tpu.matmul %218, %219, %cst_59 {dimension_numbers = #tpu.dot_dimension_numbers<[1], [0], [0], [1], [0, 0, 1, 1], [], []>} : vector<1x64xf32>, vector<64x4xf32>, vector<1x4xf32> -> vector<1x4xf32>
    %c0_60 = arith.constant 0 : index
    %c0_61 = arith.constant 0 : index
    %221 = vector.load %arg9[%c0_60, %c0_61] : memref<1x4xf32, #tpu.memory_space<vmem>>, vector<1x4xf32>
    %222 = arith.addf %220, %221 : vector<1x4xf32>
    %223 = arith.negf %222 : vector<1x4xf32>
    %224 = math.exp %223 : vector<1x4xf32>
    %cst_62 = arith.constant 1.000000e+00 : f32
    %225 = vector.broadcast %cst_62 : f32 to vector<1x4xf32>
    %226 = arith.addf %225, %224 : vector<1x4xf32>
    %227 = arith.divf %225, %226 : vector<1x4xf32>
    %228 = arith.mulf %222, %227 : vector<1x4xf32>
    %c0_63 = arith.constant 0 : index
    %c0_64 = arith.constant 0 : index
    %229 = vector.load %arg10[%c0_63, %c0_64] : memref<4x64xf32, #tpu.memory_space<vmem>>, vector<4x64xf32>
    %cst_65 = arith.constant dense<0.000000e+00> : vector<1x64xf32>
    %230 = tpu.matmul %228, %229, %cst_65 {dimension_numbers = #tpu.dot_dimension_numbers<[1], [0], [0], [1], [0, 0, 1, 1], [], []>} : vector<1x4xf32>, vector<4x64xf32>, vector<1x64xf32> -> vector<1x64xf32>
    %c0_66 = arith.constant 0 : index
    %c0_67 = arith.constant 0 : index
    %231 = vector.load %arg11[%c0_66, %c0_67] : memref<1x64xf32, #tpu.memory_space<vmem>>, vector<1x64xf32>
    %232 = arith.addf %230, %231 : vector<1x64xf32>
    %233 = arith.negf %232 : vector<1x64xf32>
    %234 = math.exp %233 : vector<1x64xf32>
    %cst_68 = arith.constant 1.000000e+00 : f32
    %235 = vector.broadcast %cst_68 : f32 to vector<1x64xf32>
    %236 = arith.addf %235, %234 : vector<1x64xf32>
    %237 = arith.divf %235, %236 : vector<1x64xf32>
    %238 = vector.broadcast %237 : vector<1x64xf32> to vector<16x64xf32>
    %239 = arith.mulf %216, %238 : vector<16x64xf32>
    %c0_69 = arith.constant 0 : index
    %c0_70 = arith.constant 0 : index
    %240 = vector.load %arg13[%c0_69, %c0_70] : memref<16x1xf32, #tpu.memory_space<vmem>>, vector<16x1xf32>
    %241 = vector.broadcast %240 : vector<16x1xf32> to vector<16x64xf32>
    %242 = arith.mulf %239, %241 : vector<16x64xf32>
    %243 = arith.truncf %242 : vector<16x64xf32> to vector<16x64xbf16>
    %c0_71 = arith.constant 0 : index
    %c0_72 = arith.constant 0 : index
    %244 = vector.load %arg17[%c0_71, %c0_72] : memref<256x64xbf16, #tpu.memory_space<vmem>>, vector<256x64xbf16>
    %cst_73 = arith.constant dense<0.000000e+00> : vector<16x256xf32>
    %245 = tpu.matmul %243, %244, %cst_73 {dimension_numbers = #tpu.dot_dimension_numbers<[1], [1], [0], [0], [0, 0, 1, 0], [], []>} : vector<16x64xbf16>, vector<256x64xbf16>, vector<16x256xf32> -> vector<16x256xf32>
    %c0_74 = arith.constant 0 : index
    %c0_75 = arith.constant 0 : index
    %246 = vector.load %arg14[%c0_74, %c0_75] : memref<16x1xf32, #tpu.memory_space<vmem>>, vector<16x1xf32>
    %247 = vector.broadcast %246 : vector<16x1xf32> to vector<16x256xf32>
    %248 = arith.addf %245, %247 : vector<16x256xf32>
    %249 = arith.extf %1 : vector<16x256xbf16> to vector<16x256xf32>
    %250 = arith.addf %248, %249 : vector<16x256xf32>
    %251 = vector.shape_cast %250 : vector<16x256xf32> to vector<1x16x256xf32>
    %c0_76 = arith.constant 0 : index
    %c0_77 = arith.constant 0 : index
    %c0_78 = arith.constant 0 : index
    %252 = vector.load %arg15[%c0_76, %c0_77, %c0_78] : memref<1x16x256xf32, #tpu.memory_space<vmem>>, vector<1x16x256xf32>
    tpu.vector_store %arg15[%c0_76, %c0_77, %c0_78], %251 {strides = array<i32>} : memref<1x16x256xf32, #tpu.memory_space<vmem>>, vector<1x16x256xf32>,
    return
  }
  func.func @transform_0(%arg0: i32) -> (i32, i32, i32) {
    %c0_i32 = arith.constant 0 : i32
    %c0_i32_0 = arith.constant 0 : i32
    %c0_i32_1 = arith.constant 0 : i32
    return %arg0, %c0_i32, %c0_i32_0 : i32, i32, i32
  }
  func.func @transform_1(%arg0: i32) -> (i32, i32) {
    %c0_i32 = arith.constant 0 : i32
    %c0_i32_0 = arith.constant 0 : i32
    %c0_i32_1 = arith.constant 0 : i32
    return %c0_i32, %c0_i32_0 : i32, i32
  }
  func.func @transform_2(%arg0: i32) -> (i32, i32) {
    %c0_i32 = arith.constant 0 : i32
    %c0_i32_0 = arith.constant 0 : i32
    %c0_i32_1 = arith.constant 0 : i32
    return %c0_i32, %c0_i32_0 : i32, i32
  }
  func.func @transform_3(%arg0: i32) -> (i32, i32) {
    %c0_i32 = arith.constant 0 : i32
    %c0_i32_0 = arith.constant 0 : i32
    %c0_i32_1 = arith.constant 0 : i32
    return %c0_i32, %c0_i32_0 : i32, i32
  }
  func.func @transform_4(%arg0: i32) -> (i32, i32) {
    %c0_i32 = arith.constant 0 : i32
    %c0_i32_0 = arith.constant 0 : i32
    %c0_i32_1 = arith.constant 0 : i32
    return %c0_i32, %c0_i32_0 : i32, i32
  }
  func.func @transform_5(%arg0: i32) -> (i32, i32) {
    %c0_i32 = arith.constant 0 : i32
    %c0_i32_0 = arith.constant 0 : i32
    %c0_i32_1 = arith.constant 0 : i32
    return %c0_i32, %c0_i32_0 : i32, i32
  }
  func.func @transform_6(%arg0: i32) -> (i32, i32) {
    %c0_i32 = arith.constant 0 : i32
    %c0_i32_0 = arith.constant 0 : i32
    %c0_i32_1 = arith.constant 0 : i32
    return %c0_i32, %c0_i32_0 : i32, i32
  }
  func.func @transform_7(%arg0: i32) -> (i32, i32) {
    %c0_i32 = arith.constant 0 : i32
    %c0_i32_0 = arith.constant 0 : i32
    %c0_i32_1 = arith.constant 0 : i32
    return %c0_i32, %c0_i32_0 : i32, i32
  }
  func.func @transform_8(%arg0: i32) -> (i32, i32) {
    %c0_i32 = arith.constant 0 : i32
    %c0_i32_0 = arith.constant 0 : i32
    %c0_i32_1 = arith.constant 0 : i32
    return %c0_i32, %c0_i32_0 : i32, i32
  }
  func.func @transform_9(%arg0: i32) -> (i32, i32) {
    %c0_i32 = arith.constant 0 : i32
    %c0_i32_0 = arith.constant 0 : i32
    %c0_i32_1 = arith.constant 0 : i32
    return %c0_i32, %c0_i32_0 : i32, i32
  }
  func.func @transform_10(%arg0: i32) -> (i32, i32) {
    %c0_i32 = arith.constant 0 : i32
    %c0_i32_0 = arith.constant 0 : i32
    %c0_i32_1 = arith.constant 0 : i32
    return %c0_i32, %c0_i32_0 : i32, i32
  }
  func.func @transform_11(%arg0: i32) -> (i32, i32) {
    %c0_i32 = arith.constant 0 : i32
    %c0_i32_0 = arith.constant 0 : i32
    %c0_i32_1 = arith.constant 0 : i32
    return %c0_i32, %c0_i32_0 : i32, i32
  }
  func.func @transform_12(%arg0: i32) -> (i32, i32) {
    %c0_i32 = arith.constant 0 : i32
    %c0_i32_0 = arith.constant 0 : i32
    %c0_i32_1 = arith.constant 0 : i32
    return %c0_i32, %c0_i32_0 : i32, i32
  }
  func.func @transform_13(%arg0: i32) -> (i32, i32) {
    %c0_i32 = arith.constant 0 : i32
    %c0_i32_0 = arith.constant 0 : i32
    %c0_i32_1 = arith.constant 0 : i32
    return %c0_i32, %c0_i32_0 : i32, i32
  }
  func.func @transform_14(%arg0: i32) -> (i32, i32, i32) {
    %c0_i32 = arith.constant 0 : i32
    %c0_i32_0 = arith.constant 0 : i32
    %c0_i32_1 = arith.constant 0 : i32
    return %arg0, %c0_i32, %c0_i32_0 : i32, i32, i32
  }
}

</mosaic_0001>

<bundles_post_ra>
// kernel: _lambda_.1
= control target key start
LH: loop header
LB: loop body
LE: loop exit
PB: predicated region body
PF: predicated region fallthrough
CT: control target
= control target key end

     0   :  { %s3975_s29 = smov 0   ;;  %s6895_s0 = inlined_call_operand.vmem [shape: bf16[2,16,256], index: 0, kind: input, shape index: {}]   ;;  %s6896_s1 = inlined_call_operand.vmem [shape: bf16[16,64], index: 1, kind: input, shape index: {}]   ;;  %s6897_s2 = inlined_call_operand.vmem [shape: f32[1,64], index: 2, kind: input, shape index: {}]   ;;  %s6898_s3 = inlined_call_operand.vmem [shape: f32[1,64], index: 3, kind: input, shape index: {}]   ;;  %s6899_s4 = inlined_call_operand.vmem [shape: f32[9,64], index: 4, kind: input, shape index: {}]   ;;  %s6900_s5 = inlined_call_operand.vmem [shape: f32[1,64], index: 5, kind: input, shape index: {}]   ;;  %s6901_s6 = inlined_call_operand.vmem [shape: f32[1,64], index: 6, kind: input, shape index: {}]   ;;  %s6902_s7 = inlined_call_operand.vmem [shape: f32[64,4], index: 7, kind: input, shape index: {}]   ;;  %s6903_s8 = inlined_call_operand.vmem [shape: f32[1,4], index: 8, kind: input, shape index: {}]   ;;  %s6904_s9 = inlined_call_operand.vmem [shape: f32[4,64], index: 9, kind: input, shape index: {}]   ;;  %s6905_s10 = inlined_call_operand.vmem [shape: f32[1,64], index: 10, kind: input, shape index: {}]   ;;  %s6906_s11 = inlined_call_operand.vmem [shape: f32[16,64], index: 11, kind: input, shape index: {}]   ;;  %s6907_s12 = inlined_call_operand.vmem [shape: f32[16,1], index: 12, kind: input, shape index: {}]   ;;  %s6908_s13 = inlined_call_operand.vmem [shape: f32[16,1], index: 13, kind: input, shape index: {}]   ;;  %s6909_s14 = inlined_call_operand.vmem [shape: f32[2,16,256], index: 14, kind: output, shape index: {}]  }
   0x1 LB: > { %s3400_s30 = sadd.s32 4294967295, %s3896_s29   ;;  %p3404_p0 = scmp.ge.s32.totalorder %s3896_s29, 1  ;;  %s3896_s29 = sphi %s3975_s29, %s24_s29  }
   0x2   : > { %p412_p1 = scmp.lt.s32.totalorder %s3896_s29, 3 }
   0x4   : > { %p413_p2 = pnand %p3404_p0, %p412_p1 }
   0x6   : > { %416 = sbr.rel (%p413_p2) target bundleno = 1339 (0x53b), region = 76 }
   0xb   : > { %p458_p3 = scmp.lt.s32.totalorder %s3400_s30, 1  ;;  %v3578_v0 = vld [vmem:[%s6896_s1] sm:$0xff]  ;;  %vm513_vm0 = vcmask 130048   ;;  %vm1363_vm1 = vcmask 523264   ;;  %vm1372_vm2 = vcmask 516096   ;;  %v3898_v27 = vmov 0.0  }
   0xc   : > { %569 = vmatpush.bf16.msra.mxu0 %v3578_v0  ;;  %3596 = vmatpush.bf16.msra.mxu2 %v3578_v0  ;;  %v4018_v23 = vld [vmem:[%s6897_s2] ss:$0 sm:$0xff]  ;;  %1364 = vst.msk [vmem:[#allocation2] sm:$0xff] %vm1363_vm1, %v3898_v27  ;;  %vm1366_vm8 = vcmask 517120  }
   0xd   : > { %s7175_s30 = smov (!%p458_p3, %s3400_s30), 1  ;;  %3597 = vmatpush.bf16.msra.mxu3 %v3578_v0  ;;  %3595 = vmatpush.bf16.msra.mxu1 %v3578_v0  ;;  %v4023_v24 = vld [vmem:[%s6898_s3] ss:$0 sm:$0xff]  ;;  %1373 = vst.msk [vmem:[#allocation2] sm:$0x1] %vm1372_vm2, %v3898_v27 }
   0xe   : > { %s3574_s17 = sshll.u32 %s7175_s30, 4  ;;  %1374 = vst.msk [vmem:[#allocation2 + $0x18] sm:$0x1] %vm1372_vm2, %v3898_v27 }
   0xf   : > { %s3992_s20 = scalar_lea.vmem %s6895_s0, %s3574_s17  ;;  %1365 = vst.msk [vmem:[#allocation2 + $0x8] sm:$0xff] %vm1363_vm1, %v3898_v27  ;;  %s3575_s17 = sshll.u32 %s7175_s30, 5 }
  0x10   : > { %v3576_v1 = vld [vmem:[%s3992_s20 + $0x4] sm:$0xf]  ;;  %v3411_v2 = vld [vmem:[%s3992_s20] sm:$0xf]  ;;  %v3413_v3 = vld [vmem:[%s3992_s20 + $0x8] sm:$0xf0]  ;;  %s467_s21 = scalar_lea.vmem %s6909_s14, %s3575_s17 }
  0x11   : > { %v3577_v4 = vld [vmem:[%s3992_s20 + $0x4] sm:$0xf0]  ;;  %v3416_v5 = vor.u32 %v3576_v1, %v3413_v3  ;;  %1369 = vst.msk [vmem:[#allocation2 + $0x198] sm:$0xff] %vm1363_vm1, %v3898_v27 }
  0x12   : > { %v3412_v6 = vor.u32 %v3577_v4, %v3411_v2  ;;  %1370 = vst.msk [vmem:[#allocation2 + $0x1a0] sm:$0xff] %vm1363_vm1, %v3898_v27 }
  0x13   : > { %1375 = vst.msk [vmem:[#allocation2 + $0x30] sm:$0x1] %vm1372_vm2, %v3898_v27 }
  0x14   : > { %483 = vxpose.binary.xlu0.c.b16.start.end [1/2] (short) %v3416_v5, %v3412_v6, 128  ;;  %1376 = vst.msk [vmem:[#allocation2 + $0x48] sm:$0x1] %vm1372_vm2, %v3898_v27 }
  0x15   : > { %1377 = vst.msk [vmem:[#allocation2 + $0x60] sm:$0x1] %vm1372_vm2, %v3898_v27 }
  0x16   : > { %1378 = vst.msk [vmem:[#allocation2 + $0x78] sm:$0x1] %vm1372_vm2, %v3898_v27 }
  0x17   : > { %1379 = vst.msk [vmem:[#allocation2 + $0x90] sm:$0x1] %vm1372_vm2, %v3898_v27 }
  0x18   : > { %1380 = vst.msk [vmem:[#allocation2 + $0xa8] sm:$0x1] %vm1372_vm2, %v3898_v27 }
  0x19   : > { %1381 = vst.msk [vmem:[#allocation2 + $0xc0] sm:$0x1] %vm1372_vm2, %v3898_v27 }
  0x1a   : > { %1382 = vst.msk [vmem:[#allocation2 + $0xd8] sm:$0x1] %vm1372_vm2, %v3898_v27 }
  0x1b   : > { %1383 = vst.msk [vmem:[#allocation2 + $0xf0] sm:$0x1] %vm1372_vm2, %v3898_v27 }
  0x1c   : > { %1384 = vst.msk [vmem:[#allocation2 + $0x108] sm:$0x1] %vm1372_vm2, %v3898_v27 }
  0x1d   : > { %1385 = vst.msk [vmem:[#allocation2 + $0x120] sm:$0x1] %vm1372_vm2, %v3898_v27 }
  0x1e   : > { %1386 = vst.msk [vmem:[#allocation2 + $0x138] sm:$0x1] %vm1372_vm2, %v3898_v27 }
  0x1f   : > { %1387 = vst.msk [vmem:[#allocation2 + $0x150] sm:$0x1] %vm1372_vm2, %v3898_v27 }
  0x20   : > { %1388 = vst.msk [vmem:[#allocation2 + $0x168] sm:$0x1] %vm1372_vm2, %v3898_v27 }
  0x21   : > { %1389 = vst.msk [vmem:[#allocation2 + $0x180] sm:$0x1] %vm1372_vm2, %v3898_v27 }
  0x22   : > { %1392 = vst.msk [vmem:[#allocation2 + $0x29] sm:$0x1] %vm1372_vm2, %v3898_v27 }
  0x23   : > { %1393 = vst.msk [vmem:[#allocation2 + $0x41] sm:$0x1] %vm1372_vm2, %v3898_v27 }
  0x24   : > { %1394 = vst.msk [vmem:[#allocation2 + $0x59] sm:$0x1] %vm1372_vm2, %v3898_v27 }
  0x25   : > { %1395 = vst.msk [vmem:[#allocation2 + $0x71] sm:$0x1] %vm1372_vm2, %v3898_v27 }
  0x26   : > { %1396 = vst.msk [vmem:[#allocation2 + $0x89] sm:$0x1] %vm1372_vm2, %v3898_v27 }
  0x27   : > { %1397 = vst.msk [vmem:[#allocation2 + $0xa1] sm:$0x1] %vm1372_vm2, %v3898_v27 }
  0x28   : > { %1398 = vst.msk [vmem:[#allocation2 + $0xb9] sm:$0x1] %vm1372_vm2, %v3898_v27 }
  0x29   : > { %1399 = vst.msk [vmem:[#allocation2 + $0xd1] sm:$0x1] %vm1372_vm2, %v3898_v27 }
  0x2a   : > { %1400 = vst.msk [vmem:[#allocation2 + $0xe9] sm:$0x1] %vm1372_vm2, %v3898_v27 }
  0x2b   : > { %1401 = vst.msk [vmem:[#allocation2 + $0x101] sm:$0x1] %vm1372_vm2, %v3898_v27 }
  0x2c   : > { %1402 = vst.msk [vmem:[#allocation2 + $0x119] sm:$0x1] %vm1372_vm2, %v3898_v27 }
  0x2d   : > { %1403 = vst.msk [vmem:[#allocation2 + $0x131] sm:$0x1] %vm1372_vm2, %v3898_v27 }
  0x2e   : > { %1404 = vst.msk [vmem:[#allocation2 + $0x149] sm:$0x1] %vm1372_vm2, %v3898_v27 }
  0x2f   : > { %1405 = vst.msk [vmem:[#allocation2 + $0x161] sm:$0x1] %vm1372_vm2, %v3898_v27 }
  0x30   : > { %1406 = vst.msk [vmem:[#allocation2 + $0x179] sm:$0x1] %vm1372_vm2, %v3898_v27 }
  0x31   : > { %1407 = vst.msk [vmem:[#allocation2 + $0x191] sm:$0x1] %vm1372_vm2, %v3898_v27 }
  0x32   : > { %1390 = vst.msk [vmem:[#allocation2 + $0x198] sm:$0x1] %vm1372_vm2, %v3898_v27 }
  0x33   : > { %1367 = vst.msk [vmem:[#allocation2 + $0x10] sm:$0x3] %vm1366_vm8, %v3898_v27 }
  0x34   : > { %1391 = vst.msk [vmem:[#allocation2 + $0x11] sm:$0x1] %vm1372_vm2, %v3898_v27 }
  0x35   : > { %1371 = vst.msk [vmem:[#allocation2 + $0x1a8] sm:$0x3] %vm1366_vm8, %v3898_v27 }
  0x36   : > { %1408 = vst.msk [vmem:[#allocation2 + $0x1a9] sm:$0x1] %vm1372_vm2, %v3898_v27 }
  0xc0   : > { %v491_v7 = vpop.trf.xlu0 }
  0xc1   : > { %3421 = vmatmul.msk.bf16.vlgmr.msra.gmra.mxu0 %vm513_vm0, %v491_v7 }
  0xc8   : > { %v492_v8 = vpop.trf.xlu0 }
  0xd0   : > { %v493_v9 = vpop.trf.xlu0 }
  0xd1   : > { %3422 = vmatmul.msk.bf16.gmra.mxu0 %vm513_vm0, %v493_v9 }
  0xd8   : > { %v4000_v10 = vpop.trf.xlu0 }
  0xe0   : > { %v495_v11 = vpop.trf.xlu0 }
  0xe1   : > { %3423 = vmatmul.msk.bf16.gmra.mxu0 %vm513_vm0, %v495_v11 }
  0xe8   : > { %v4003_v12 = vpop.trf.xlu0 }
  0xf0   : > { %v497_v13 = vpop.trf.xlu0 }
  0xf1   : > { %3424 = vmatmul.msk.bf16.gmra.mxu0 %vm513_vm0, %v497_v13 }
  0xf8   : > { %v498_v14 = vpop.trf.xlu0 }
  0xf9   : > { %3432 = vmatmul.msk.bf16.vlgmr.msra.gmra.mxu2 %vm513_vm0, %v498_v14 }
 0x100   : > { %v499_v15 = vpop.trf.xlu0 }
 0x101   : > { %3425 = vmatmul.msk.bf16.gmra.mxu0 %vm513_vm0, %v499_v15 }
 0x108   : > { %v500_v16 = vpop.trf.xlu0 }
 0x109   : > { %3433 = vmatmul.msk.bf16.vlgmr.msra.gmra.mxu3 %vm513_vm0, %v500_v16 }
 0x110   : > { %v501_v17 = vpop.trf.xlu0 }
 0x111   : > { %3426 = vmatmul.msk.bf16.gmra.mxu0 %vm513_vm0, %v501_v17 }
 0x118   : > { %v502_v18 = vpop.trf.xlu0 }
 0x119   : > { %3434 = vmatmul.msk.bf16.gmra.mxu3 %vm513_vm0, %v502_v18 }
 0x120   : > { %v503_v19 = vpop.trf.xlu0 }
 0x121   : > { %3427 = vmatmul.msk.bf16.vlgmr.msra.gmra.mxu1 %vm513_vm0, %v503_v19 }
 0x128   : > { %v504_v20 = vpop.trf.xlu0 }
 0x129   : > { %3435 = vmatmul.msk.bf16.gmra.mxu3 %vm513_vm0, %v504_v20 }
 0x130   : > { %v505_v21 = vpop.trf.xlu0 }
 0x131   : > { %3428 = vmatmul.msk.bf16.gmra.mxu1 %vm513_vm0, %v505_v21 }
 0x138   : > { %v506_v22 = vpop.trf.xlu0 }
 0x139   : > { %3436 = vmatmul.msk.bf16.gmra.mxu3 %vm513_vm0, %v506_v22 }
 0x13e   : > { %v571_v25 = vpop.f32.mrf.mxu0 }
 0x13f   : > { %v655_v26 = vmul.f32 %v4018_v23, %v571_v25 }
 0x141   : > { %v4029_v28 = vadd.f32 %v4023_v24, %v655_v26  ;;  %3429 = vmatmul.msk.bf16.gmra.mxu1 %vm513_vm0, %v492_v8 }
 0x143   : > { %v3437_v29 = vmul.f32 -1.442695, %v4029_v28 }
 0x145   : > { %3616 = vpow2.f32 %v3437_v29 }
 0x146   : > { %v573_v30 = vpop.f32.mrf.mxu0 }
 0x147   : > { %v656_v31 = vmul.f32 %v4018_v23, %v573_v30 }
 0x149   : > { %v4055_v32 = vadd.f32 %v4023_v24, %v656_v31 }
 0x14b   : > { %v3617_v33 = vpop.eup %3616  ;;  %v3438_v35 = vmul.f32 -1.442695, %v4055_v32 }
 0x14c   : > { %v819_v34 = vadd.f32 1.0, %v3617_v33 }
 0x14e   : > { %3618 = vrcp.f32 %v819_v34  ;;  %v576_v36 = vpop.f32.mrf.mxu0  ;;  %v862_v47 = vand.u32 2147483648, %v819_v34  ;;  %v860_v49 = vand.u32 2147483647, %v819_v34  ;;  %vm856_vm4 = vweird.f32 %v819_v34 }
 0x14f   : > { %3620 = vpow2.f32 %v3438_v35  ;;  %v657_v37 = vmul.f32 %v4018_v23, %v576_v36 }
 0x150   : > { %v863_v54 = vor.u32 1.1754944e-38, %v862_v47  ;;  %vm861_vm6 = vcmp.eq.f32.partialorder %v860_v49, 8.507059e+37 }
 0x151   : > { %v4074_v38 = vadd.f32 %v4023_v24, %v657_v37  ;;  %3430 = vmatmul.msk.bf16.gmra.mxu1 %vm513_vm0, %v4000_v10 }
 0x153   : > { %v3439_v39 = vmul.f32 -1.442695, %v4074_v38 }
 0x154   : > { %v3619_v40 = vpop.eup %3618 }
 0x155   : > { %v3621_v41 = vpop.eup %3620  ;;  %v852_v42 = vmul.f32 %v3619_v40, %v819_v34  ;;  %3622 = vpow2.f32 %v3439_v39  ;;  %vm857_vm3 = vweird.f32 %v3619_v40 }
 0x156   : > { %v820_v43 = vadd.f32 1.0, %v3621_v41  ;;  %v578_v44 = vpop.f32.mrf.mxu0  ;;  %vm858_vm5 = vmor %vm856_vm4, %vm857_vm3 }
 0x157   : > { %v853_v45 = vsub.f32 1.0, %v852_v42  ;;  %v658_v46 = vmul.f32 %v4018_v23, %v578_v44 }
 0x158   : > { %3624 = vrcp.f32 %v820_v43  ;;  %v875_v0 = vand.u32 2147483647, %v820_v43  ;;  %v877_v1 = vand.u32 2147483648, %v820_v43  ;;  %vm871_vm9 = vweird.f32 %v820_v43 }
 0x159   : > { %v854_v48 = vmul.f32 %v3619_v40, %v853_v45  ;;  %v4097_v50 = vadd.f32 %v4023_v24, %v658_v46 }
 0x15a   : > { %vm876_vm11 = vcmp.eq.f32.partialorder %v875_v0, 8.507059e+37  ;;  %v878_v10 = vor.u32 1.1754944e-38, %v877_v1 }
 0x15b   : > { %v3623_v51 = vpop.eup %3622  ;;  %v855_v52 = vadd.f32 %v3619_v40, %v854_v48  ;;  %v3440_v53 = vmul.f32 -1.442695, %v4097_v50 }
 0x15c   : > { %v4106_v55 = vadd.f32 1.0, %v3623_v51 }
 0x15d   : > { %v859_v56 = vsel %vm858_vm5, %v3619_v40, %v855_v52  ;;  %3626 = vpow2.f32 %v3440_v53 }
 0x15e   : > { %v3625_v57 = vpop.eup %3624  ;;  %v864_v58 = vsel %vm861_vm6, %v863_v54, %v859_v56  ;;  %3628 = vrcp.f32 %v4106_v55  ;;  %v581_v59 = vpop.f32.mrf.mxu0  ;;  %v890_v16 = vand.u32 2147483647, %v4106_v55  ;;  %v892_v17 = vand.u32 2147483648, %v4106_v55 }
 0x15f   : > { %v1331_v60 = vmul.f32 %v864_v58, %v4029_v28  ;;  %v867_v61 = vmul.f32 %v3625_v57, %v820_v43  ;;  %v659_v62 = vmul.f32 %v4018_v23, %v581_v59  ;;  %vm872_vm7 = vweird.f32 %v3625_v57  ;;  %v1442_v58 = vld [vmem:[%s6899_s4] sm:$0xff] }
 0x160   : > { %vm873_vm10 = vmor %vm871_vm9, %vm872_vm7  ;;  %vm886_vm13 = vweird.f32 %v4106_v55  ;;  %v893_v28 = vor.u32 1.1754944e-38, %v892_v17  ;;  %vm891_vm15 = vcmp.eq.f32.partialorder %v890_v16, 8.507059e+37  ;;  %v4178_v1 = vperm.slane %v1442_v58, 0 }
 0x161   : > { %1410 = vst.msk [vmem:[#allocation2 + $0x19] sm:$0xff] %vm1363_vm1, %v1331_v60  ;;  %v868_v63 = vsub.f32 1.0, %v867_v61  ;;  %3431 = vmatmul.msk.bf16.gmra.mxu1 %vm513_vm0, %v4003_v12  ;;  %v4125_v2 = vadd.f32 %v4023_v24, %v659_v62  ;;  %v4191_v17 = vperm.slane %v1442_v58, 1 }
 0x163   : > { %v3627_v3 = vpop.eup %3626  ;;  %v869_v4 = vmul.f32 %v3625_v57, %v868_v63  ;;  %v3441_v7 = vmul.f32 -1.442695, %v4125_v2  ;;  %6923 = vst [vmem:[#allocation4_spill] sm:$0xff] %v4191_v17 }
 0x164   : > { %v3629_v5 = vpop.eup %3628  ;;  %v822_v6 = vadd.f32 1.0, %v3627_v3 }
 0x165   : > { %v870_v8 = vadd.f32 %v3625_v57, %v869_v4  ;;  %v882_v9 = vmul.f32 %v3629_v5, %v4106_v55  ;;  %vm887_vm12 = vweird.f32 %v3629_v5 }
 0x166   : > { %3630 = vrcp.f32 %v822_v6  ;;  %v583_v11 = vpop.f32.mrf.mxu0  ;;  %vm888_vm14 = vmor %vm886_vm13, %vm887_vm12  ;;  %v907_v37 = vand.u32 2147483648, %v822_v6  ;;  %v905_v39 = vand.u32 2147483647, %v822_v6  ;;  %vm901_vm2 = vweird.f32 %v822_v6 }
 0x167   : > { %v874_v12 = vsel %vm873_vm10, %v3625_v57, %v870_v8  ;;  %v883_v13 = vsub.f32 1.0, %v882_v9  ;;  %3632 = vpow2.f32 %v3441_v7  ;;  %v660_v14 = vmul.f32 %v4018_v23, %v583_v11 }
 0x168   : > { %v879_v15 = vsel %vm876_vm11, %v878_v10, %v874_v12  ;;  %v908_v43 = vor.u32 1.1754944e-38, %v907_v37  ;;  %vm906_vm4 = vcmp.eq.f32.partialorder %v905_v39, 8.507059e+37  ;;  %v4185_v9 = vperm.slane %v1442_v58, 3  ;;  %v1450_v11 = vld [vmem:[#allocation2 + $0x18] sm:$0xff] }
 0x169   : > { %v1332_v18 = vmul.f32 %v879_v15, %v4055_v32  ;;  %v884_v19 = vmul.f32 %v3629_v5, %v883_v13  ;;  %v4150_v20 = vadd.f32 %v4023_v24, %v660_v14  ;;  %v1567_v13 = vld [vmem:[#allocation2 + $0x1] sm:$0xff] }
 0x16b   : > { %1411 = vst.msk [vmem:[#allocation2 + $0x21] sm:$0xff] %vm1363_vm1, %v1332_v18  ;;  %v885_v22 = vadd.f32 %v3629_v5, %v884_v19  ;;  %v3442_v25 = vmul.f32 -1.442695, %v4150_v20  ;;  %v4193_v18 = vperm.slane %v1442_v58, 4 }
 0x16c   : > { %v3631_v21 = vpop.eup %3630 }
 0x16d   : > { %v3633_v26 = vpop.eup %3632  ;;  %v897_v29 = vmul.f32 %v3631_v21, %v822_v6  ;;  %v889_v30 = vsel %vm888_vm14, %v3629_v5, %v885_v22  ;;  %3634 = vpow2.f32 %v3442_v25  ;;  %vm902_vm0 = vweird.f32 %v3631_v21  ;;  %v1448_v5 = vld [vmem:[#allocation2] sm:$0xff]  ;;  %v1449_v6 = vld [vmem:[#allocation2 + $0x8] sm:$0xff] }
 0x16e   : > { %v823_v31 = vadd.f32 1.0, %v3633_v26  ;;  %v586_v27 = vpop.f32.mrf.mxu0  ;;  %v894_v32 = vsel %vm891_vm15, %v893_v28, %v889_v30  ;;  %vm903_vm3 = vmor %vm901_vm2, %vm902_vm0  ;;  %v1469_v16 = vmul.f32 %v4178_v1, %v1448_v5  ;;  %v1470_v19 = vmul.f32 %v4178_v1, %v1449_v6  ;;  %v1686_v26 = vld [vmem:[#allocation2 + $0x2] sm:$0xff] }
 0x16f   : > { %v898_v33 = vsub.f32 1.0, %v897_v29  ;;  %v661_v34 = vmul.f32 %v4018_v23, %v586_v27  ;;  %v1333_v35 = vmul.f32 %v894_v32, %v4074_v38  ;;  %v4197_v22 = vperm.slane %v1442_v58, 2 }
 0x170   : > { %3636 = vrcp.f32 %v823_v31  ;;  %v922_v55 = vand.u32 2147483648, %v823_v31  ;;  %v920_v57 = vand.u32 2147483647, %v823_v31  ;;  %vm916_vm6 = vweird.f32 %v823_v31 }
 0x171   : > { %v899_v36 = vmul.f32 %v3631_v21, %v898_v33  ;;  %1412 = vst.msk [vmem:[#allocation2 + $0x31] sm:$0xff] %vm1363_vm1, %v1333_v35  ;;  %v4159_v40 = vadd.f32 %v4023_v24, %v661_v34  ;;  %v4201_v25 = vperm.slane %v1442_v58, 6  ;;  %v1502_v29 = vmul.f32 %v4185_v9, %v1450_v11  ;;  %v1569_v34 = vld [vmem:[#allocation2 + $0x19] sm:$0xff] }
 0x172   : > { %v923_v63 = vor.u32 1.1754944e-38, %v922_v55  ;;  %vm921_vm8 = vcmp.eq.f32.partialorder %v920_v57, 8.507059e+37  ;;  %v1451_v12 = vld [vmem:[#allocation2 + $0x20] sm:$0xff]  ;;  %v1588_v27 = vmul.f32 %v4191_v17, %v1567_v13  ;;  %v4207_v32 = vperm.slane %v1442_v58, 7 }
 0x173   : > { %v900_v41 = vadd.f32 %v3631_v21, %v899_v36  ;;  %v3635_v42 = vpop.eup %3634  ;;  %v3443_v38 = vmul.f32 -1.442695, %v4159_v40  ;;  %v1503_v30 = vmul.f32 %v4185_v9, %v1451_v12  ;;  %v4216_v37 = vmul.f32 %v4197_v22, %v1686_v26  ;;  %v1570_v55 = vld [vmem:[#allocation2 + $0x21] sm:$0xff] }
 0x174   : > { %v4161_v46 = vadd.f32 1.0, %v3635_v42  ;;  %v1622_v6 = vmul.f32 %v4193_v18, %v1570_v55 }
 0x175   : > { %v904_v45 = vsel %vm903_vm3, %v3631_v21, %v900_v41 }
 0x176   : > { %v3637_v44 = vpop.eup %3636  ;;  %v588_v47 = vpop.f32.mrf.mxu0  ;;  %v909_v48 = vsel %vm906_vm4, %v908_v43, %v904_v45  ;;  %3638 = vrcp.f32 %v4161_v46  ;;  %v937_v36 = vand.u32 2147483648, %v4161_v46  ;;  %vm931_vm10 = vweird.f32 %v4161_v46  ;;  %v1687_v45 = vld [vmem:[#allocation2 + $0xa] sm:$0xff] }
 0x177   : > { %v912_v49 = vmul.f32 %v3637_v44, %v823_v31  ;;  %v662_v51 = vmul.f32 %v4018_v23, %v588_v47  ;;  %v1334_v52 = vmul.f32 %v909_v48, %v4097_v50  ;;  %3640 = vpow2.f32 %v3443_v38 }
 0x178   : > { %vm917_vm5 = vweird.f32 %v3637_v44  ;;  %v1452_v31 = vld [vmem:[#allocation2 + $0x30] sm:$0xff]  ;;  %v935_v39 = vand.u32 2147483647, %v4161_v46  ;;  %v4227_v48 = vmul.f32 %v4178_v1, %v1450_v11  ;;  %v938_v57 = vor.u32 1.1754944e-38, %v937_v36 }
 0x179   : > { %v913_v53 = vsub.f32 1.0, %v912_v49  ;;  %v4168_v54 = vadd.f32 %v4023_v24, %v662_v51  ;;  %1413 = vst.msk [vmem:[#allocation2 + $0x39] sm:$0xff] %vm1363_vm1, %v1334_v52  ;;  %vm918_vm7 = vmor %vm916_vm6, %vm917_vm5  ;;  %v1535_v42 = vmul.f32 %v4201_v25, %v1452_v31  ;;  %v4230_v49 = vmul.f32 %v4191_v17, %v1569_v34 }
 0x17a   : > { %v1518_v52 = vadd.f32 %v1502_v29, %v1469_v16  ;;  %vm936_vm12 = vcmp.eq.f32.partialorder %v935_v39, 8.507059e+37 }
 0x17b   : > { %v914_v56 = vmul.f32 %v3637_v44, %v913_v53  ;;  %v3444_v59 = vmul.f32 -1.442695, %v4168_v54  ;;  %v1519_v53 = vadd.f32 %v1503_v30, %v1470_v19  ;;  %v1504_v30 = vmul.f32 %v4185_v9, %v1452_v31 }
 0x17c   : > { %v626_v50 = vpop.f32.mrf.mxu2  ;;  %v4176_v62 = vpop.eup %3638 }
 0x17d   : > { %v915_v60 = vadd.f32 %v3637_v44, %v914_v56  ;;  %v677_v61 = vmul.f32 %v4018_v23, %v626_v50  ;;  %3642 = vpow2.f32 %v3444_v59  ;;  %v3641_v0 = vpop.eup %3640  ;;  %v927_v4 = vmul.f32 %v4176_v62, %v4161_v46  ;;  %v1689_v59 = vld [vmem:[#allocation2 + $0x22] sm:$0xff] }
 0x17e   : > { %v4188_v15 = vadd.f32 1.0, %v3641_v0  ;;  %vm932_vm9 = vweird.f32 %v4176_v62  ;;  %v591_v47 = vpop.f32.mrf.mxu0  ;;  %v1621_v46 = vmul.f32 %v4193_v18, %v1569_v34  ;;  %v4249_v0 = vmul.f32 %v4178_v1, %v1451_v12  ;;  %v1571_v34 = vld [vmem:[#allocation2 + $0x31] sm:$0xff] }
 0x17f   : > { %v919_v3 = vsel %vm918_vm7, %v3637_v44, %v915_v60  ;;  %v4183_v8 = vadd.f32 %v4023_v24, %v677_v61  ;;  %v928_v14 = vsub.f32 1.0, %v927_v4  ;;  %v1568_v44 = vld [vmem:[#allocation2 + $0x9] sm:$0xff]  ;;  %vm4235_vm11 = vmor %vm931_vm10, %vm932_vm9  ;;  %v4245_v60 = vmul.f32 %v4197_v22, %v1687_v45 }
 0x180   : > { %v924_v7 = vsel %vm921_vm8, %v923_v63, %v919_v3  ;;  %v4209_v33 = vld [vmem:[#allocation2 + $0x38] sm:$0xff]  ;;  %3644 = vrcp.f32 %v4188_v15  ;;  %v1589_v50 = vmul.f32 %v4191_v17, %v1568_v44  ;;  %v663_v61 = vmul.f32 %v4018_v23, %v591_v47 }
 0x181   : > { %v1335_v10 = vmul.f32 %v924_v7, %v4125_v2  ;;  %v4199_v2 = vperm.slane %v1442_v58, 5  ;;  %v3459_v28 = vmul.f32 -1.442695, %v4183_v8  ;;  %v929_v35 = vmul.f32 %v4176_v62, %v928_v14  ;;  %v1688_v58 = vld [vmem:[#allocation2 + $0x1a] sm:$0xff] }
 0x182   : > { %v1536_v43 = vmul.f32 %v4201_v25, %v4209_v33  ;;  %v1551_v3 = vadd.f32 %v1535_v42, %v1518_v52  ;;  %v4258_v13 = vmul.f32 %v4197_v22, %v1688_v58  ;;  %v4261_v14 = vmul.f32 %v4197_v22, %v1689_v59 }
 0x183   : > { %1414 = vst.msk [vmem:[#allocation2 + $0x49] sm:$0xff] %vm1363_vm1, %v1335_v10  ;;  %v3643_v21 = vpop.eup %3642  ;;  %v930_v38 = vadd.f32 %v4176_v62, %v929_v35  ;;  %3646 = vpow2.f32 %v3459_v28  ;;  %v4264_v12 = vmul.f32 %v4199_v2, %v1688_v58  ;;  %v4267_v16 = vmul.f32 %v4199_v2, %v1689_v59  ;;  %v1572_v58 = vld [vmem:[#allocation2 + $0x39] sm:$0xff] }
 0x184   : > { %v4220_v41 = vadd.f32 1.0, %v3643_v21  ;;  %v1552_v4 = vadd.f32 %v1536_v43, %v1519_v53  ;;  %v628_v19 = vpop.f32.mrf.mxu2  ;;  %v4278_v29 = vadd.f32 %v4023_v24, %v663_v61  ;;  %v1604_v35 = vadd.f32 %v1588_v27, %v1551_v3 }
 0x185   : > { %v934_v56 = vsel %vm4235_vm11, %v4176_v62, %v930_v38  ;;  %v4252_v62 = vmul.f32 %v4191_v17, %v1570_v55  ;;  %v952_v44 = vand.u32 2147483648, %v4188_v15  ;;  %v678_v45 = vmul.f32 %v4018_v23, %v628_v19 }
 0x186   : > { %3648 = vrcp.f32 %v4220_v41  ;;  %v3645_v63 = vpop.eup %3644  ;;  %v939_v5 = vsel %vm936_vm12, %v938_v57, %v934_v56  ;;  %v1605_v36 = vadd.f32 %v1589_v50, %v1552_v4  ;;  %v950_v38 = vand.u32 2147483647, %v4188_v15  ;;  %v593_v3 = vpop.f32.mrf.mxu0 }
 0x187   : > { %v1336_v7 = vmul.f32 %v939_v5, %v4150_v20  ;;  %v942_v10 = vmul.f32 %v3645_v63, %v4188_v15  ;;  %v4272_v20 = vmul.f32 %v4178_v1, %v1452_v31  ;;  %vm947_vm13 = vweird.f32 %v3645_v63 }
 0x188   : > { %v3445_v31 = vmul.f32 -1.442695, %v4278_v29  ;;  %v4291_v27 = vmul.f32 %v4191_v17, %v1571_v34  ;;  %v4294_v51 = vmul.f32 %v4193_v18, %v1571_v34  ;;  %vm946_vm14 = vweird.f32 %v4188_v15 }
 0x189   : > { %v3647_v11 = vpop.eup %3646  ;;  %1415 = vst.msk [vmem:[#allocation2 + $0x51] sm:$0xff] %vm1363_vm1, %v1336_v7  ;;  %v943_v26 = vsub.f32 1.0, %v942_v10  ;;  %v1637_v53 = vadd.f32 %v1621_v46, %v1604_v35  ;;  %vm948_vm15 = vmor %vm946_vm14, %vm947_vm13  ;;  %v1654_v57 = vmul.f32 %v4207_v32, %v1571_v34  ;;  %v953_v50 = vor.u32 1.1754944e-38, %v952_v44 }
 0x18a   : > { %v4275_v28 = vadd.f32 1.0, %v3647_v11  ;;  %v4283_v42 = vld [vmem:[#allocation2 + $0x48] sm:$0xff]  ;;  %v4302_v61 = vadd.f32 %v4023_v24, %v678_v45  ;;  %v1520_v4 = vadd.f32 %v1504_v30, %v4227_v48  ;;  %v1638_v15 = vadd.f32 %v1622_v6, %v1605_v36 }
 0x18b   : > { %v944_v43 = vmul.f32 %v3645_v63, %v943_v26  ;;  %v1537_v55 = vmul.f32 %v4201_v25, %v4283_v42  ;;  %vm951_vm0 = vcmp.eq.f32.partialorder %v950_v38, 8.507059e+37  ;;  %v967_v46 = vand.u32 2147483648, %v4220_v41 }
 0x18c   : > { %v4269_v21 = vpop.eup %3648  ;;  %3650 = vrcp.f32 %v4275_v28  ;;  %v965_v10 = vand.u32 2147483647, %v4220_v41  ;;  %v1655_v19 = vmul.f32 %v4207_v32, %v1572_v58  ;;  %v664_v34 = vmul.f32 %v4018_v23, %v593_v3  ;;  %v631_v48 = vpop.f32.mrf.mxu3  ;;  %v1691_v3 = vld [vmem:[#allocation2 + $0x3a] sm:$0xff] }
 0x18d   : > { %v957_v39 = vmul.f32 %v4269_v21, %v4220_v41  ;;  %v945_v52 = vadd.f32 %v3645_v63, %v944_v43  ;;  %3652 = vpow2.f32 %v3445_v31  ;;  %vm962_vm2 = vweird.f32 %v4269_v21 }
 0x18e   : > { %v1553_v26 = vadd.f32 %v1537_v55, %v1520_v4  ;;  %v4315_v6 = vmul.f32 %v4178_v1, %v4209_v33  ;;  %v1505_v30 = vmul.f32 %v4185_v9, %v4209_v33  ;;  %vm961_vm3 = vweird.f32 %v4220_v41  ;;  %v1690_v55 = vld [vmem:[#allocation2 + $0x32] sm:$0xff]  ;;  %v1573_v4 = vld [vmem:[#allocation2 + $0x49] sm:$0xff] }
 0x18f   : > { %v958_v47 = vsub.f32 1.0, %v957_v39  ;;  %v949_v59 = vsel %vm948_vm15, %v3645_v63, %v945_v52  ;;  %v1670_v63 = vadd.f32 %v1654_v57, %v1637_v53  ;;  %v3460_v35 = vmul.f32 -1.442695, %v4302_v61  ;;  %vm963_vm4 = vmor %vm961_vm3, %vm962_vm2 }
 0x190   : > { %v954_v5 = vsel %vm951_vm0, %v953_v50, %v949_v59  ;;  %v4322_v39 = vmul.f32 %v4191_v17, %v1572_v58  ;;  %v1671_v43 = vadd.f32 %v1655_v19, %v1638_v15  ;;  %v4324_v44 = vld [vmem:[#allocation2 + $0x50] sm:$0xff]  ;;  %v968_v38 = vor.u32 1.1754944e-38, %v967_v46 }
 0x191   : > { %v959_v56 = vmul.f32 %v4269_v21, %v958_v47  ;;  %v1337_v45 = vmul.f32 %v954_v5, %v4159_v40  ;;  %vm966_vm5 = vcmp.eq.f32.partialorder %v965_v10, 8.507059e+37  ;;  %v679_v41 = vmul.f32 %v4018_v23, %v631_v48 }
 0x192   : > { %v4309_v11 = vpop.eup %3650  ;;  %v1606_v31 = vadd.f32 %v4230_v49, %v1553_v26  ;;  %v4338_v40 = vadd.f32 %v4023_v24, %v664_v34  ;;  %3654 = vpow2.f32 %v3460_v35  ;;  %v1723_v59 = vadd.f32 %v4216_v37, %v1670_v63  ;;  %v596_v37 = vpop.f32.mrf.mxu0 }
 0x193   : > { %v960_v7 = vadd.f32 %v4269_v21, %v959_v56  ;;  %v3653_v36 = vpop.eup %3652  ;;  %v1182_v33 = vmul.f32 %v4309_v11, %v4275_v28  ;;  %1416 = vst.msk [vmem:[#allocation2 + $0x61] sm:$0xff] %vm1363_vm1, %v1337_v45  ;;  %v1521_v49 = vadd.f32 %v1505_v30, %v4249_v0  ;;  %v1624_v50 = vmul.f32 %v4193_v18, %v1572_v58  ;;  %v4360_v58 = vld [vmem:[%s6899_s4 + $0x8] ss:$0 sm:$0xff] }
 0x194   : > { %v4335_v53 = vadd.f32 1.0, %v3653_v36  ;;  %vm1187_vm6 = vweird.f32 %v4309_v11  ;;  %v4352_v46 = vadd.f32 %v4023_v24, %v679_v41  ;;  %v4355_v0 = vmul.f32 %v4197_v22, %v1690_v55 }
 0x195   : > { %v964_v47 = vsel %vm963_vm4, %v4269_v21, %v960_v7  ;;  %v1538_v21 = vmul.f32 %v4201_v25, %v4324_v44  ;;  %v1183_v57 = vsub.f32 1.0, %v1182_v33  ;;  %v1639_v5 = vadd.f32 %v4294_v51, %v1606_v31 }
 0x196   : > { %v969_v52 = vsel %vm966_vm5, %v968_v38, %v964_v47  ;;  %3656 = vrcp.f32 %v4335_v53  ;;  %v1190_v7 = vand.u32 2147483647, %v4275_v28  ;;  %v3446_v10 = vmul.f32 -1.442695, %v4338_v40 }
 0x197   : > { %v1338_v56 = vmul.f32 %v969_v52, %v4168_v54  ;;  %v1184_v15 = vmul.f32 %v4309_v11, %v1183_v57  ;;  %v1192_v54 = vand.u32 2147483648, %v4275_v28  ;;  %v1724_v63 = vadd.f32 %v4245_v60, %v1671_v43 }
 0x198   : > { %v1554_v19 = vadd.f32 %v1538_v21, %v1521_v49  ;;  %vm1186_vm7 = vweird.f32 %v4275_v28  ;;  %v4369_v34 = vmul.f32 %v4197_v22, %v1691_v3  ;;  %v1742_v48 = vmul.f32 %v4199_v2, %v1690_v55  ;;  %v3655_v35 = vpop.eup %3654 }
 0x199   : > { %1417 = vst.msk [vmem:[#allocation2 + $0x69] sm:$0xff] %vm1363_vm1, %v1338_v56  ;;  %v1185_v26 = vadd.f32 %v4309_v11, %v1184_v15  ;;  %v1656_v30 = vmul.f32 %v4207_v32, %v1573_v4  ;;  %vm4375_vm8 = vmor %vm1186_vm7, %vm1187_vm6  ;;  %v665_v60 = vmul.f32 %v4018_v23, %v596_v37  ;;  %v1756_v36 = vadd.f32 %v4264_v12, %v1723_v59  ;;  %v1574_v59 = vld [vmem:[#allocation2 + $0x51] sm:$0xff] }
 0x19a   : > { %v1193_v43 = vor.u32 1.1754944e-38, %v1192_v54  ;;  %v3461_v45 = vmul.f32 -1.442695, %v4352_v46  ;;  %v1773_v47 = vmul.f32 %v4360_v58, %v1690_v55  ;;  %vm1191_vm9 = vcmp.eq.f32.partialorder %v1190_v7, 8.507059e+37  ;;  %v1692_v54 = vld [vmem:[#allocation2 + $0x4a] sm:$0xff] }
 0x19b   : > { %v1189_v28 = vsel %vm4375_vm8, %v4309_v11, %v1185_v26  ;;  %v1672_v33 = vadd.f32 %v1656_v30, %v1639_v5  ;;  %3658 = vpow2.f32 %v3446_v10  ;;  %v1757_v41 = vadd.f32 %v4267_v16, %v1724_v63  ;;  %v1693_v10 = vld [vmem:[#allocation2 + $0x52] sm:$0xff] }
 0x19c   : > { %v4385_v38 = vpop.eup %3656  ;;  %v1506_v31 = vmul.f32 %v4185_v9, %v4283_v42  ;;  %v1607_v12 = vadd.f32 %v4252_v62, %v1554_v19  ;;  %v1194_v52 = vsel %vm1191_vm9, %v1193_v43, %v1189_v28  ;;  %v4393_v11 = vmul.f32 %v4199_v2, %v1691_v3  ;;  %v633_v43 = vpop.f32.mrf.mxu3 }
 0x19d   : > { %v1774_v21 = vmul.f32 %v4360_v58, %v1691_v3  ;;  %v1353_v56 = vmul.f32 %v1194_v52, %v4183_v8  ;;  %v4398_v55 = vadd.f32 %v4023_v24, %v665_v60  ;;  %v4400_v57 = vadd.f32 %v1773_v47, %v1756_v36 }
 0x19e   : > { %v972_v16 = vmul.f32 %v4385_v38, %v4335_v53  ;;  %v4404_v49 = vadd.f32 1.0, %v3655_v35  ;;  %3660 = vpow2.f32 %v3461_v45  ;;  %v4408_v62 = vmul.f32 %v4178_v1, %v4283_v42 }
 0x19f   : > { %6928 = vst [vmem:[#allocation5_spill] sm:$0xff] %v4400_v57  ;;  %v4411_v3 = vmul.f32 %v4191_v17, %v1573_v4  ;;  %v1725_v8 = vadd.f32 %v4258_v13, %v1672_v33  ;;  %v1507_v15 = vmul.f32 %v4185_v9, %v4324_v44  ;;  %v4417_v37 = vadd.f32 %v1774_v21, %v1757_v41 }
 0x1a0   : > { %1432 = vst.msk [vmem:[#allocation2 + $0x121] sm:$0xff] %vm1363_vm1, %v1353_v56  ;;  %v1522_v5 = vadd.f32 %v1506_v31, %v4272_v20  ;;  %v4421_v7 = vmul.f32 %v4193_v18, %v1573_v4  ;;  %v1640_v42 = vadd.f32 %v1624_v50, %v1607_v12  ;;  %v4425_v19 = vmul.f32 %v4178_v1, %v4324_v44  ;;  %v1456_v50 = vld [vmem:[#allocation2 + $0x60] sm:$0xff]  ;;  %v4444_v28 = vld [vmem:[#allocation2 + $0x68] sm:$0xff] }
 0x1a1   : > { %6929 = vst [vmem:[#allocation6_spill] sm:$0xff] %v4417_v37  ;;  %v3659_v63 = vpop.eup %3658  ;;  %v4428_v13 = vmul.f32 %v4191_v17, %v1574_v59  ;;  %v4431_v26 = vmul.f32 %v4193_v18, %v1574_v59  ;;  %v3447_v30 = vmul.f32 -1.442695, %v4398_v55  ;;  %v1657_v20 = vmul.f32 %v4207_v32, %v1574_v59 }
 0x1a2   : > { %v4436_v4 = vmul.f32 %v4197_v22, %v1692_v54  ;;  %v973_v51 = vsub.f32 1.0, %v972_v16  ;;  %3662 = vrcp.f32 %v4404_v49  ;;  %v1523_v44 = vadd.f32 %v1507_v15, %v4315_v6 }
 0x1a3   : > { %v4441_v60 = vmul.f32 %v4197_v22, %v1693_v10  ;;  %v1758_v35 = vadd.f32 %v1742_v48, %v1725_v8  ;;  %v1775_v36 = vmul.f32 %v4360_v58, %v1692_v54  ;;  %v1673_v47 = vadd.f32 %v1657_v20, %v1640_v42  ;;  %v598_v8 = vpop.f32.mrf.mxu0 }
 0x1a4   : > { %v3661_v45 = vpop.eup %3660  ;;  %v974_v33 = vmul.f32 %v4385_v38, %v973_v51  ;;  %v982_v41 = vand.u32 2147483648, %v4335_v53  ;;  %v4448_v31 = vadd.f32 1.0, %v3659_v63  ;;  %v1539_v12 = vmul.f32 %v4201_v25, %v1456_v50 }
 0x1a5   : > { %vm977_vm10 = vweird.f32 %v4385_v38  ;;  %v980_v6 = vand.u32 2147483647, %v4335_v53  ;;  %3664 = vpow2.f32 %v3447_v30  ;;  %v1540_v48 = vmul.f32 %v4201_v25, %v4444_v28 }
 0x1a6   : > { %v975_v52 = vadd.f32 %v4385_v38, %v974_v33  ;;  %3666 = vrcp.f32 %v4448_v31  ;;  %v680_v21 = vmul.f32 %v4018_v23, %v633_v43  ;;  %v4459_v56 = vmul.f32 %v4199_v2, %v1692_v54 }
 0x1a7   : > { %v4462_v59 = vmul.f32 %v4199_v2, %v1693_v10  ;;  %vm976_vm11 = vweird.f32 %v4335_v53  ;;  %v4465_v16 = vadd.f32 1.0, %v3661_v45  ;;  %v1726_v42 = vadd.f32 %v4261_v14, %v1673_v47 }
 0x1a8   : > { %v3663_v15 = vpop.eup %3662  ;;  %v4469_v63 = vmul.f32 %v4360_v58, %v1693_v10  ;;  %v4471_v30 = vadd.f32 %v1775_v36, %v1758_v35  ;;  %vm978_vm12 = vmor %vm976_vm11, %vm977_vm10  ;;  %v983_v54 = vor.u32 1.1754944e-38, %v982_v41  ;;  %v1555_v20 = vadd.f32 %v1539_v12, %v1522_v5 }
 0x1a9   : > { %v979_v51 = vsel %vm978_vm12, %v4385_v38, %v975_v52  ;;  %vm981_vm13 = vcmp.eq.f32.partialorder %v980_v6, 8.507059e+37  ;;  %v1197_v53 = vmul.f32 %v3663_v15, %v4404_v49  ;;  %v1556_v43 = vadd.f32 %v1540_v48, %v1523_v44 }
 0x1aa   : > { %6930 = vst [vmem:[#allocation7_spill] sm:$0xff] %v4471_v30  ;;  %v984_v45 = vsel %vm981_vm13, %v983_v54, %v979_v51  ;;  %v4478_v33 = vadd.f32 %v4023_v24, %v680_v21  ;;  %v666_v14 = vmul.f32 %v4018_v23, %v598_v8  ;;  %v1205_v47 = vand.u32 2147483647, %v4404_v49 }
 0x1ab   : > { %v3665_v10 = vpop.eup %3664  ;;  %v1339_v35 = vmul.f32 %v984_v45, %v4278_v29  ;;  %v1198_v36 = vsub.f32 1.0, %v1197_v53  ;;  %3668 = vrcp.f32 %v4465_v16  ;;  %v4485_v38 = vadd.f32 %v4393_v11, %v1726_v42  ;;  %v1576_v53 = vld [vmem:[#allocation2 + $0x69] sm:$0xff] }
 0x1ac   : > { %v3667_v5 = vpop.eup %3666  ;;  %v4488_v44 = vmul.f32 %v4178_v1, %v1456_v50  ;;  %v4491_v41 = vmul.f32 %v4185_v9, %v1456_v50  ;;  %v1207_v12 = vand.u32 2147483648, %v4404_v49  ;;  %v1608_v6 = vadd.f32 %v4291_v27, %v1555_v20  ;;  %v4504_v50 = vld [vmem:[#allocation2 + $0x61] sm:$0xff] }
 0x1ad   : > { %1418 = vst.msk [vmem:[#allocation2 + $0x79] sm:$0xff] %vm1363_vm1, %v1339_v35  ;;  %v1199_v29 = vmul.f32 %v3663_v15, %v1198_v36  ;;  %vm1202_vm14 = vweird.f32 %v3663_v15  ;;  %v987_v48 = vmul.f32 %v3667_v5, %v4448_v31  ;;  %v1609_v52 = vadd.f32 %v4322_v39, %v1556_v43 }
 0x1ae   : > { %v4498_v11 = vadd.f32 1.0, %v3665_v10  ;;  %v3462_v21 = vmul.f32 -1.442695, %v4478_v33  ;;  %v4502_v8 = vadd.f32 %v4023_v24, %v666_v14  ;;  %vm1201_vm15 = vweird.f32 %v4404_v49 }
 0x1af   : > { %v1200_v42 = vadd.f32 %v3663_v15, %v1199_v29  ;;  %vm1206_vm0 = vcmp.eq.f32.partialorder %v1205_v47, 8.507059e+37  ;;  %v988_v27 = vsub.f32 1.0, %v987_v48  ;;  %vm1203_vm2 = vmor %vm1201_vm15, %vm1202_vm14  ;;  %v1208_v54 = vor.u32 1.1754944e-38, %v1207_v12  ;;  %v636_v29 = vpop.f32.mrf.mxu3 }
 0x1b0   : > { %v995_v20 = vand.u32 2147483647, %v4448_v31  ;;  %v997_v39 = vand.u32 2147483648, %v4448_v31  ;;  %3670 = vrcp.f32 %v4498_v11  ;;  %v3448_v45 = vmul.f32 -1.442695, %v4502_v8 }
 0x1b1   : > { %v3669_v51 = vpop.eup %3668  ;;  %v1204_v43 = vsel %vm1203_vm2, %v3663_v15, %v1200_v42  ;;  %v989_v24 = vmul.f32 %v3667_v5, %v988_v27  ;;  %3672 = vpow2.f32 %v3462_v21  ;;  %v1658_v49 = vmul.f32 %v4207_v32, %v4504_v50 }
 0x1b2   : > { %v1209_v14 = vsel %vm1206_vm0, %v1208_v54, %v1204_v43  ;;  %vm992_vm3 = vweird.f32 %v3667_v5  ;;  %v1212_v10 = vmul.f32 %v3669_v51, %v4465_v16  ;;  %v1641_v35 = vadd.f32 %v4421_v7, %v1608_v6 }
 0x1b3   : > { %v1642_v36 = vadd.f32 %v4431_v26, %v1609_v52  ;;  %v1354_v47 = vmul.f32 %v1209_v14, %v4302_v61  ;;  %v990_v12 = vadd.f32 %v3667_v5, %v989_v24  ;;  %v1659_v15 = vmul.f32 %v4207_v32, %v1576_v53 }
 0x1b4   : > { %vm991_vm4 = vweird.f32 %v4448_v31  ;;  %v1213_v48 = vsub.f32 1.0, %v1212_v10  ;;  %3674 = vpow2.f32 %v3448_v45  ;;  %vm996_vm6 = vcmp.eq.f32.partialorder %v995_v20, 8.507059e+37 }
 0x1b5   : > { %1433 = vst.msk [vmem:[#allocation2 + $0x129] sm:$0xff] %vm1363_vm1, %v1354_v47  ;;  %vm993_vm5 = vmor %vm991_vm4, %vm992_vm3  ;;  %v998_v21 = vor.u32 1.1754944e-38, %v997_v39  ;;  %v1220_v42 = vand.u32 2147483647, %v4465_v16  ;;  %v1222_v7 = vand.u32 2147483648, %v4465_v16  ;;  %vm1217_vm7 = vweird.f32 %v3669_v51 }
 0x1b6   : > { %v4522_v26 = vpop.eup %3670  ;;  %v994_v61 = vsel %vm993_vm5, %v3667_v5, %v990_v12  ;;  %v1214_v6 = vmul.f32 %v3669_v51, %v1213_v48  ;;  %v681_v52 = vmul.f32 %v4018_v23, %v636_v29  ;;  %v1674_v31 = vadd.f32 %v1658_v49, %v1641_v35  ;;  %v1694_v29 = vld [vmem:[#allocation2 + $0x62] sm:$0xff] }
 0x1b7   : > { %v3673_v27 = vpop.eup %3672  ;;  %v1675_v54 = vadd.f32 %v1659_v15, %v1642_v36  ;;  %v999_v43 = vsel %vm996_vm6, %v998_v21, %v994_v61  ;;  %v1002_v24 = vmul.f32 %v4522_v26, %v4498_v11  ;;  %vm1216_vm8 = vweird.f32 %v4465_v16  ;;  %v4548_v16 = vld [vmem:[%s6898_s3] ss:$0 sm:$0xff]  ;;  %v1458_v15 = vld [vmem:[#allocation2 + $0x78] sm:$0xff] }
 0x1b8   : > { %v1340_v20 = vmul.f32 %v999_v43, %v4338_v40  ;;  %v1215_v39 = vadd.f32 %v3669_v51, %v1214_v6  ;;  %v4529_v45 = vadd.f32 1.0, %v3673_v27  ;;  %v4533_v5 = vmul.f32 %v4191_v17, %v4504_v50  ;;  %vm4537_vm9 = vmor %vm1216_vm8, %vm1217_vm7 }
 0x1b9   : > { %v1509_v23 = vmul.f32 %v4185_v9, %v4444_v28  ;;  %v1223_v14 = vor.u32 1.1754944e-38, %v1222_v7  ;;  %v1003_v10 = vsub.f32 1.0, %v1002_v24  ;;  %vm1221_vm10 = vcmp.eq.f32.partialorder %v1220_v42, 8.507059e+37  ;;  %v1695_v7 = vld [vmem:[#allocation2 + $0x6a] sm:$0xff] }
 0x1ba   : > { %v3675_v35 = vpop.eup %3674  ;;  %1419 = vst.msk [vmem:[#allocation2 + $0x81] sm:$0xff] %vm1363_vm1, %v1340_v20  ;;  %v1219_v40 = vsel %vm4537_vm9, %v3669_v51, %v1215_v39  ;;  %3676 = vrcp.f32 %v4529_v45  ;;  %v4551_v36 = vadd.f32 %v4548_v16, %v681_v52  ;;  %v4555_v47 = vadd.f32 %v4469_v63, %v4485_v38  ;;  %v601_v39 = vpop.f32.mrf.mxu1 }
 0x1bb   : > { %v1524_v12 = vadd.f32 %v4491_v41, %v4408_v62  ;;  %v4561_v51 = vmul.f32 %v4193_v18, %v4504_v50  ;;  %v1224_v48 = vsel %vm1221_vm10, %v1223_v14, %v1219_v40  ;;  %v1727_v21 = vadd.f32 %v4355_v0, %v1674_v31  ;;  %v2244_v50 = vld [vmem:[#allocation2 + $0x120] sm:$0xff] }
 0x1bc   : > { %6933 = vst [vmem:[#allocation8_spill] sm:$0xff] %v4555_v47  ;;  %v4566_v42 = vmul.f32 %v4178_v1, %v4444_v28  ;;  %v1728_v63 = vadd.f32 %v4369_v34, %v1675_v54  ;;  %v1355_v38 = vmul.f32 %v1224_v48, %v4352_v46  ;;  %v4571_v62 = vmul.f32 %v4191_v17, %v1576_v53  ;;  %v4622_v48 = vld [vmem:[%s6897_s2] ss:$0 sm:$0xff] }
 0x1bd   : > { %v4574_v41 = vmul.f32 %v4193_v18, %v1576_v53  ;;  %v1004_v61 = vmul.f32 %v4522_v26, %v1003_v10  ;;  %v4577_v6 = vadd.f32 1.0, %v3675_v35  ;;  %v1525_v0 = vadd.f32 %v1509_v23, %v4425_v19  ;;  %v2360_v23 = vld [vmem:[#allocation2 + $0x121] sm:$0xff] }
 0x1be   : > { %v4581_v28 = vmul.f32 %v4197_v22, %v1694_v29  ;;  %v1541_v34 = vmul.f32 %v4201_v25, %v1458_v15  ;;  %1434 = vst.msk [vmem:[#allocation2 + $0x139] sm:$0xff] %vm1363_vm1, %v1355_v38  ;;  %v3463_v46 = vmul.f32 -1.442695, %v4551_v36  ;;  %v4587_v52 = vmul.f32 %v4197_v22, %v1695_v7 }
 0x1bf   : > { %v4590_v53 = vmul.f32 %v4199_v2, %v1694_v29  ;;  %v4593_v27 = vmul.f32 %v4199_v2, %v1695_v7  ;;  %v1777_v19 = vmul.f32 %v4360_v58, %v1694_v29  ;;  %v1760_v54 = vadd.f32 %v4459_v56, %v1727_v21 }
 0x1c0   : > { %v4596_v31 = vpop.eup %3676  ;;  %v1761_v43 = vadd.f32 %v4462_v59, %v1728_v63  ;;  %v1778_v24 = vmul.f32 %v4360_v58, %v1695_v7  ;;  %v4602_v20 = vmul.f32 %v2244_v50, %v4178_v1  ;;  %v1005_v14 = vadd.f32 %v4522_v26, %v1004_v61 }
 0x1c1   : > { %v4604_v49 = vld [vmem:[#allocation2 + $0x80] sm:$0xff]  ;;  %vm1007_vm11 = vweird.f32 %v4522_v26  ;;  %v1227_v10 = vmul.f32 %v4596_v31, %v4529_v45  ;;  %3678 = vrcp.f32 %v4577_v6  ;;  %v1557_v56 = vadd.f32 %v1541_v34, %v1524_v12 }
 0x1c2   : > { %v1542_v59 = vmul.f32 %v4201_v25, %v4604_v49  ;;  %v1012_v35 = vand.u32 2147483648, %v4498_v11  ;;  %3680 = vpow2.f32 %v3463_v46  ;;  %v4615_v40 = vmul.f32 %v2244_v50, %v4185_v9 }
 0x1c3   : > { %vm1006_vm12 = vweird.f32 %v4498_v11  ;;  %v1010_v29 = vand.u32 2147483647, %v4498_v11  ;;  %v667_v12 = vmul.f32 %v4622_v48, %v601_v39  ;;  %v4626_v21 = vmul.f32 %v2244_v50, %v4201_v25  ;;  %v1577_v39 = vld [vmem:[#allocation2 + $0x79] sm:$0xff] }
 0x1c4   : > { %6934 = vst [vmem:[#allocation9_spill] sm:$0xff] %v4615_v40  ;;  %v4629_v7 = vmul.f32 %v2360_v23, %v4191_v17  ;;  %v4632_v63 = vmul.f32 %v2360_v23, %v4193_v18  ;;  %v4635_v38 = vmul.f32 %v2360_v23, %v4207_v32  ;;  %vm4639_vm13 = vmor %vm1006_vm12, %vm1007_vm11  ;;  %v4643_v61 = vadd.f32 %v1777_v19, %v1760_v54 }
 0x1c5   : > { %6935 = vst [vmem:[#allocation10_spill] sm:$0xff] %v4626_v21  ;;  %v4645_v34 = vadd.f32 %v1778_v24, %v1761_v43  ;;  %v1009_v50 = vsel %vm4639_vm13, %v4522_v26, %v1005_v14  ;;  %v1228_v46 = vsub.f32 1.0, %v1227_v10  ;;  %v1610_v37 = vadd.f32 %v4411_v3, %v1557_v56 }
 0x1c6   : > { %6936 = vst [vmem:[#allocation11_spill] sm:$0xff] %v4632_v63  ;;  %v1558_v23 = vadd.f32 %v1542_v59, %v1525_v0  ;;  %v1013_v57 = vor.u32 1.1754944e-38, %v1012_v35  ;;  %v1237_v47 = vand.u32 2147483648, %v4529_v45  ;;  %v1510_v19 = vmul.f32 %v4185_v9, %v1458_v15  ;;  %v638_v0 = vpop.f32.mrf.mxu3 }
 0x1c7   : > { %6937 = vst [vmem:[#allocation12_spill] sm:$0xff] %v4635_v38  ;;  %v3679_v30 = vpop.eup %3678  ;;  %v4653_v38 = vmul.f32 %v4178_v1, %v1458_v15  ;;  %vm1011_vm14 = vcmp.eq.f32.partialorder %v1010_v29, 8.507059e+37  ;;  %v4657_v54 = vadd.f32 %v4548_v16, %v667_v12  ;;  %v1229_v24 = vmul.f32 %v4596_v31, %v1228_v46 }
 0x1c8   : > { %6940 = vst [vmem:[#allocation13_spill] sm:$0xff] %v4643_v61  ;;  %v3681_v43 = vpop.eup %3680  ;;  %v1014_v26 = vsel %vm1011_vm14, %v1013_v57, %v1009_v50  ;;  %vm1232_vm15 = vweird.f32 %v4596_v31  ;;  %v1235_v3 = vand.u32 2147483647, %v4529_v45  ;;  %v1660_v14 = vmul.f32 %v4207_v32, %v1577_v39 }
 0x1c9   : > { %6941 = vst [vmem:[#allocation14_spill] sm:$0xff] %v4645_v34  ;;  %v1341_v10 = vmul.f32 %v1014_v26, %v4398_v55  ;;  %vm1231_vm0 = vweird.f32 %v4529_v45  ;;  %v1017_v15 = vmul.f32 %v3679_v30, %v4577_v6  ;;  %v1643_v56 = vadd.f32 %v4561_v51, %v1610_v37 }
 0x1ca   : > { %v1611_v59 = vadd.f32 %v4428_v13, %v1558_v23  ;;  %v1230_v57 = vadd.f32 %v4596_v31, %v1229_v24  ;;  %v1238_v35 = vor.u32 1.1754944e-38, %v1237_v47  ;;  %vm1233_vm2 = vmor %vm1231_vm0, %vm1232_vm15  ;;  %v4670_v12 = vadd.f32 1.0, %v3681_v43  ;;  %v2245_v13 = vld [vmem:[#allocation2 + $0x128] sm:$0xff]  ;;  %v603_v24 = vpop.f32.mrf.mxu1 }
 0x1cb   : > { %1420 = vst.msk [vmem:[#allocation2 + $0x91] sm:$0xff] %vm1363_vm1, %v1341_v10  ;;  %v1018_v29 = vsub.f32 1.0, %v1017_v15  ;;  %v3449_v11 = vmul.f32 -1.442695, %v4657_v54  ;;  %v682_v55 = vmul.f32 %v4622_v48, %v638_v0  ;;  %vm1236_vm3 = vcmp.eq.f32.partialorder %v1235_v3, 8.507059e+37  ;;  %v1578_v43 = vld [vmem:[#allocation2 + $0x81] sm:$0xff] }
 0x1cc   : > { %v1234_v45 = vsel %vm1233_vm2, %v4596_v31, %v1230_v57  ;;  %vm1022_vm4 = vweird.f32 %v3679_v30  ;;  %v1027_v37 = vand.u32 2147483648, %v4577_v6  ;;  %v1025_v47 = vand.u32 2147483647, %v4577_v6 }
 0x1cd   : > { %v1239_v51 = vsel %vm1236_vm3, %v1238_v35, %v1234_v45  ;;  %v1019_v50 = vmul.f32 %v3679_v30, %v1018_v29  ;;  %3682 = vrcp.f32 %v4670_v12  ;;  %v4679_v46 = vmul.f32 %v4191_v17, %v1577_v39  ;;  %v2477_v35 = vld [vmem:[#allocation2 + $0x12a] sm:$0xff] }
 0x1ce   : > { %v1676_v23 = vadd.f32 %v1660_v14, %v1643_v56  ;;  %v1644_v26 = vadd.f32 %v4574_v41, %v1611_v59  ;;  %v1356_v31 = vmul.f32 %v1239_v51, %v4478_v33  ;;  %vm1021_vm5 = vweird.f32 %v4577_v6  ;;  %v2361_v41 = vld [vmem:[#allocation2 + $0x129] sm:$0xff] }
 0x1cf   : > { %v1020_v3 = vadd.f32 %v3679_v30, %v1019_v50  ;;  %3684 = vpow2.f32 %v3449_v11  ;;  %v4685_v0 = vadd.f32 %v4548_v16, %v682_v55  ;;  %v4688_v10 = vadd.f32 %v1510_v19, %v4488_v44  ;;  %vm1023_vm6 = vmor %vm1021_vm5, %vm1022_vm4  ;;  %v2476_v6 = vld [vmem:[#allocation2 + $0x122] sm:$0xff] }
 0x1d0   : > { %v4691_v15 = vmul.f32 %v4193_v18, %v1577_v39  ;;  %v4694_v14 = vmul.f32 %v2245_v13, %v4178_v1  ;;  %1435 = vst.msk [vmem:[#allocation2 + $0x141] sm:$0xff] %vm1363_vm1, %v1356_v31  ;;  %v1028_v33 = vor.u32 1.1754944e-38, %v1027_v37  ;;  %v1661_v56 = vmul.f32 %v4207_v32, %v1578_v43 }
 0x1d1   : > { %v1024_v59 = vsel %vm1023_vm6, %v3679_v30, %v1020_v3  ;;  %vm1026_vm7 = vcmp.eq.f32.partialorder %v1025_v47, 8.507059e+37  ;;  %v668_v44 = vmul.f32 %v4622_v48, %v603_v24  ;;  %v1729_v19 = vadd.f32 %v4436_v4, %v1676_v23  ;;  %v1696_v24 = vld [vmem:[#allocation2 + $0x7a] sm:$0xff] }
 0x1d2   : > { %v4702_v39 = vmul.f32 %v2245_v13, %v4185_v9  ;;  %v4705_v57 = vmul.f32 %v2245_v13, %v4201_v25  ;;  %v1029_v29 = vsel %vm1026_vm7, %v1028_v33, %v1024_v59  ;;  %v4710_v55 = vmul.f32 %v2361_v41, %v4191_v17  ;;  %v1697_v59 = vld [vmem:[#allocation2 + $0x82] sm:$0xff] }
 0x1d3   : > { %v4707_v11 = vpop.eup %3682  ;;  %v4713_v30 = vmul.f32 %v2361_v41, %v4193_v18  ;;  %v1677_v45 = vadd.f32 %v1661_v56, %v1644_v26  ;;  %v3464_v37 = vmul.f32 -1.442695, %v4685_v0  ;;  %v4717_v4 = vmul.f32 %v2361_v41, %v4207_v32  ;;  %v641_v41 = vpop.f32.mrf.mxu3 }
 0x1d4   : > { %6942 = vst [vmem:[#allocation15_spill] sm:$0xff] %v4702_v39  ;;  %v4720_v51 = vmul.f32 %v2476_v6, %v4197_v22  ;;  %v1342_v13 = vmul.f32 %v1029_v29, %v4502_v8  ;;  %v1242_v50 = vmul.f32 %v4707_v11, %v4670_v12  ;;  %v4726_v23 = vmul.f32 %v2477_v35, %v4197_v22 }
 0x1d5   : > { %6943 = vst [vmem:[#allocation16_spill] sm:$0xff] %v4705_v57  ;;  %v3685_v47 = vpop.eup %3684  ;;  %v4729_v31 = vmul.f32 %v2476_v6, %v4199_v2  ;;  %v1511_v26 = vmul.f32 %v4185_v9, %v4604_v49  ;;  %v4734_v3 = vadd.f32 %v4548_v16, %v668_v44  ;;  %v4737_v8 = vmul.f32 %v2477_v35, %v4199_v2  ;;  %v1460_v57 = vld [vmem:[#allocation2 + $0x90] sm:$0xff] }
 0x1d6   : > { %6944 = vst [vmem:[#allocation17_spill] sm:$0xff] %v4713_v30  ;;  %v4740_v33 = vmul.f32 %v4360_v58, %v2476_v6  ;;  %v4743_v56 = vmul.f32 %v4360_v58, %v2477_v35  ;;  %v1762_v29 = vadd.f32 %v4590_v53, %v1729_v19  ;;  %v4749_v34 = vmul.f32 %v4178_v1, %v4604_v49  ;;  %v2246_v53 = vld [vmem:[#allocation2 + $0x138] sm:$0xff] }
 0x1d7   : > { %6945 = vst [vmem:[#allocation18_spill] sm:$0xff] %v4717_v4  ;;  %v1730_v44 = vadd.f32 %v4441_v60, %v1677_v45  ;;  %v1243_v61 = vsub.f32 1.0, %v1242_v50  ;;  %3686 = vpow2.f32 %v3464_v37  ;;  %v4756_v6 = vmul.f32 %v4193_v18, %v1578_v43 }
 0x1d8   : > { %6946 = vst [vmem:[#allocation19_spill] sm:$0xff] %v4726_v23  ;;  %v4759_v35 = vmul.f32 %v4197_v22, %v1696_v24  ;;  %v4761_v19 = vadd.f32 1.0, %v3685_v47  ;;  %v4765_v49 = vmul.f32 %v4197_v22, %v1697_v59  ;;  %v3450_v60 = vmul.f32 -1.442695, %v4734_v3 }
 0x1d9   : > { %6947 = vst [vmem:[#allocation20_spill] sm:$0xff] %v4729_v31  ;;  %v683_v45 = vmul.f32 %v4622_v48, %v641_v41  ;;  %v4770_v37 = vmul.f32 %v4199_v2, %v1696_v24  ;;  %v1779_v50 = vmul.f32 %v4360_v58, %v1696_v24  ;;  %v1780_v47 = vmul.f32 %v4360_v58, %v1697_v59  ;;  %v2362_v31 = vld [vmem:[#allocation2 + $0x139] sm:$0xff] }
 0x1da   : > { %6948 = vst [vmem:[#allocation21_spill] sm:$0xff] %v4737_v8  ;;  %v4753_v8 = vmul.f32 %v4191_v17, %v1578_v43  ;;  %v4773_v43 = vmul.f32 %v4199_v2, %v1697_v59  ;;  %v1244_v41 = vmul.f32 %v4707_v11, %v1243_v61  ;;  %v4784_v4 = vmul.f32 %v2246_v53, %v4201_v25 }
 0x1db   : > { %6949 = vst [vmem:[#allocation22_spill] sm:$0xff] %v4740_v33  ;;  %v2296_v33 = vmul.f32 %v2246_v53, %v4185_v9  ;;  %v1250_v30 = vand.u32 2147483647, %v4670_v12  ;;  %v1252_v24 = vand.u32 2147483648, %v4670_v12  ;;  %3688 = vrcp.f32 %v4761_v19 }
 0x1dc   : > { %6950 = vst [vmem:[#allocation23_spill] sm:$0xff] %v4743_v56  ;;  %v606_v56 = vpop.f32.mrf.mxu1  ;;  %vm1247_vm8 = vweird.f32 %v4707_v11  ;;  %3690 = vpow2.f32 %v3450_v60  ;;  %v4794_v61 = vadd.f32 %v1779_v50, %v1762_v29  ;;  %v4800_v39 = vmul.f32 %v2362_v31, %v4193_v18  ;;  %v643_v29 = vpop.f32.mrf.mxu3 }
 0x1dd   : > { %1421 = vst.msk [vmem:[#allocation2 + $0x99] sm:$0xff] %vm1363_vm1, %v1342_v13  ;;  %v1527_v13 = vadd.f32 %v1511_v26, %v4566_v42  ;;  %v1763_v42 = vadd.f32 %v4593_v27, %v1730_v44  ;;  %v4779_v26 = vmul.f32 %v2246_v53, %v4178_v1  ;;  %v3687_v59 = vpop.eup %3686  ;;  %v1245_v27 = vadd.f32 %v4707_v11, %v1244_v41 }
 0x1de   : > { %6951 = vst [vmem:[#allocation24_spill] sm:$0xff] %v4759_v35  ;;  %v4792_v44 = vadd.f32 %v4548_v16, %v683_v45  ;;  %v4797_v53 = vmul.f32 %v2362_v31, %v4191_v17  ;;  %v4808_v41 = vadd.f32 %v2296_v33, %v4602_v20  ;;  %v4811_v60 = vmul.f32 %v2362_v31, %v4207_v32 }
 0x1df   : > { %6952 = vst [vmem:[#allocation25_spill] sm:$0xff] %v4765_v49  ;;  %v4805_v21 = vadd.f32 %v1780_v47, %v1763_v42  ;;  %vm1246_vm9 = vweird.f32 %v4670_v12  ;;  %v1512_v45 = vmul.f32 %v4185_v9, %v1460_v57  ;;  %v1543_v50 = vmul.f32 %v4201_v25, %v1460_v57 }
 0x1e0   : > { %6953 = vst [vmem:[#allocation26_spill] sm:$0xff] %v4784_v4  ;;  %v669_v4 = vmul.f32 %v4622_v48, %v606_v56  ;;  %vm1248_vm10 = vmor %vm1246_vm9, %vm1247_vm8  ;;  %v1253_v56 = vor.u32 1.1754944e-38, %v1252_v24  ;;  %v4818_v47 = vadd.f32 1.0, %v3687_v59  ;;  %vm1251_vm11 = vcmp.eq.f32.partialorder %v1250_v30, 8.507059e+37 }
 0x1e1   : > { %6954 = vst [vmem:[#allocation27_spill] sm:$0xff] %v4794_v61  ;;  %v1579_v61 = vld [vmem:[#allocation2 + $0x91] sm:$0xff]  ;;  %v1249_v31 = vsel %vm1248_vm10, %v4707_v11, %v1245_v27  ;;  %v3465_v12 = vmul.f32 -1.442695, %v4792_v44  ;;  %v3689_v33 = vpop.eup %3688  ;;  %v4825_v42 = vmul.f32 %v4178_v1, %v1460_v57  ;;  %v684_v24 = vmul.f32 %v4622_v48, %v643_v29 }
 0x1e2   : > { %6955 = vst [vmem:[#allocation28_spill] sm:$0xff] %v4797_v53  ;;  %v3691_v59 = vpop.eup %3690  ;;  %v4832_v40 = vmul.f32 %v4191_v17, %v1579_v61  ;;  %v4835_v53 = vmul.f32 %v4193_v18, %v1579_v61  ;;  %v1032_v30 = vmul.f32 %v3689_v33, %v4761_v19  ;;  %v4840_v57 = vadd.f32 %v1512_v45, %v4653_v38 }
 0x1e3   : > { %6956 = vst [vmem:[#allocation29_spill] sm:$0xff] %v4805_v21  ;;  %v1254_v21 = vsel %vm1251_vm11, %v1253_v56, %v1249_v31  ;;  %v1559_v27 = vadd.f32 %v1543_v50, %v4688_v10  ;;  %3692 = vrcp.f32 %v4818_v47  ;;  %v2247_v56 = vld [vmem:[#allocation2 + $0x140] sm:$0xff]  ;;  %v4846_v49 = vadd.f32 1.0, %v3691_v59 }
 0x1e4   : > { %v4802_v63 = vld [vmem:[#allocation2 + $0x98] sm:$0xff]  ;;  %6957 = vst [vmem:[#allocation30_spill] sm:$0xff] %v4811_v60  ;;  %v4828_v60 = vadd.f32 %v4548_v16, %v669_v4  ;;  %v1357_v11 = vmul.f32 %v1254_v21, %v4551_v36  ;;  %v1662_v4 = vmul.f32 %v4207_v32, %v1579_v61  ;;  %v608_v29 = vpop.f32.mrf.mxu1  ;;  %3694 = vpow2.f32 %v3465_v12  ;;  %v2363_v61 = vld [vmem:[#allocation2 + $0x141] sm:$0xff] }
 0x1e5   : > { %v1544_v20 = vmul.f32 %v4201_v25, %v4802_v63  ;;  %6958 = vst [vmem:[#allocation31_spill] sm:$0xff] %v4832_v40  ;;  %v1033_v40 = vsub.f32 1.0, %v1032_v30  ;;  %v1040_v36 = vand.u32 2147483647, %v4761_v19  ;;  %v1042_v21 = vand.u32 2147483648, %v4761_v19 }
 0x1e6   : > { %1436 = vst.msk [vmem:[#allocation2 + $0x151] sm:$0xff] %vm1363_vm1, %v1357_v11  ;;  %v3451_v38 = vmul.f32 -1.442695, %v4828_v60  ;;  %v4852_v10 = vadd.f32 %v4548_v16, %v684_v24  ;;  %vm1037_vm12 = vweird.f32 %v3689_v33  ;;  %3696 = vrcp.f32 %v4846_v49 }
 0x1e7   : > { %v1560_v31 = vadd.f32 %v1544_v20, %v1527_v13  ;;  %v1034_v45 = vmul.f32 %v3689_v33, %v1033_v40  ;;  %v670_v13 = vmul.f32 %v4622_v48, %v608_v29  ;;  %v1612_v50 = vadd.f32 %v4533_v5, %v1559_v27  ;;  %v4870_v5 = vld [vmem:[#allocation2 + $0x13a] sm:$0xff] }
 0x1e8   : > { %v4858_v20 = vmul.f32 %v2247_v56, %v4178_v1  ;;  %v2297_v12 = vmul.f32 %v2247_v56, %v4185_v9  ;;  %3698 = vpow2.f32 %v3451_v38  ;;  %vm1036_vm13 = vweird.f32 %v4761_v19 }
 0x1e9   : > { %v1613_v59 = vadd.f32 %v4571_v62, %v1560_v31  ;;  %v1035_v11 = vadd.f32 %v3689_v33, %v1034_v45  ;;  %v3466_v40 = vmul.f32 -1.442695, %v4852_v10  ;;  %v3693_v24 = vpop.eup %3692  ;;  %v4865_v30 = vmul.f32 %v2247_v56, %v4201_v25  ;;  %vm1038_vm14 = vmor %vm1036_vm13, %vm1037_vm12 }
 0x1ea   : > { %6959 = vst [vmem:[#allocation32_spill] sm:$0xff] %v4858_v20  ;;  %v4868_v29 = vmul.f32 %v2363_v61, %v4191_v17  ;;  %vm1041_vm15 = vcmp.eq.f32.partialorder %v1040_v36, 8.507059e+37  ;;  %v1043_v27 = vor.u32 1.1754944e-38, %v1042_v21  ;;  %v3695_v38 = vpop.eup %3694  ;;  %v1257_v31 = vmul.f32 %v3693_v24, %v4818_v47 }
 0x1eb   : > { %6960 = vst [vmem:[#allocation33_spill] sm:$0xff] %v4865_v30  ;;  %v1039_v62 = vsel %vm1038_vm14, %v3689_v33, %v1035_v11  ;;  %3700 = vpow2.f32 %v3466_v40  ;;  %v4875_v19 = vadd.f32 %v4548_v16, %v670_v13  ;;  %v1645_v56 = vadd.f32 %v4691_v15, %v1612_v50  ;;  %v2479_v30 = vld [vmem:[#allocation2 + $0x142] sm:$0xff] }
 0x1ec   : > { %6961 = vst [vmem:[#allocation34_spill] sm:$0xff] %v4868_v29  ;;  %v4879_v45 = vmul.f32 %v2363_v61, %v4193_v18  ;;  %v4881_v29 = vld [vmem:[#allocation2 + $0x99] sm:$0xff]  ;;  %v1044_v23 = vsel %vm1041_vm15, %v1043_v27, %v1039_v62  ;;  %v4883_v20 = vadd.f32 1.0, %v3695_v38  ;;  %v4885_v36 = vpop.eup %3696  ;;  %v4888_v33 = vadd.f32 %v2297_v12, %v4694_v14 }
 0x1ed   : > { %v4891_v21 = vmul.f32 %v2363_v61, %v4207_v32  ;;  %v4895_v15 = vmul.f32 %v4870_v5, %v4197_v22  ;;  %v1646_v13 = vadd.f32 %v4756_v6, %v1613_v59  ;;  %v1343_v11 = vmul.f32 %v1044_v23, %v4657_v54  ;;  %v4909_v59 = vld [vmem:[#allocation2 + $0x150] sm:$0xff] }
 0x1ee   : > { %v3699_v50 = vpop.eup %3698  ;;  %v1258_v40 = vsub.f32 1.0, %v1257_v31  ;;  %v1265_v27 = vand.u32 2147483647, %v4818_v47  ;;  %v1267_v38 = vand.u32 2147483648, %v4818_v47  ;;  %v4902_v14 = vmul.f32 %v2479_v30, %v4197_v22 }
 0x1ef   : > { %6962 = vst [vmem:[#allocation35_spill] sm:$0xff] %v4891_v21  ;;  %v1663_v61 = vmul.f32 %v4207_v32, %v4881_v29  ;;  %v1047_v12 = vmul.f32 %v4885_v36, %v4846_v49  ;;  %v3452_v62 = vmul.f32 -1.442695, %v4875_v19  ;;  %v1678_v6 = vadd.f32 %v1662_v4, %v1645_v56 }
 0x1f0   : > { %6963 = vst [vmem:[#allocation36_spill] sm:$0xff] %v4895_v15  ;;  %v1259_v54 = vmul.f32 %v3693_v24, %v1258_v40  ;;  %vm1262_vm0 = vweird.f32 %v3693_v24  ;;  %3702 = vrcp.f32 %v4883_v20  ;;  %vm1261_vm2 = vweird.f32 %v4818_v47 }
 0x1f1   : > { %6964 = vst [vmem:[#allocation37_spill] sm:$0xff] %v4902_v14  ;;  %v3701_v23 = vpop.eup %3700  ;;  %v1679_v31 = vadd.f32 %v1663_v61, %v1646_v13  ;;  %v1048_v21 = vsub.f32 1.0, %v1047_v12  ;;  %v4914_v14 = vadd.f32 1.0, %v3699_v50  ;;  %vm1266_vm3 = vcmp.eq.f32.partialorder %v1265_v27, 8.507059e+37  ;;  %vm1263_vm4 = vmor %vm1261_vm2, %vm1262_vm0 }
 0x1f2   : > { %1422 = vst.msk [vmem:[#allocation2 + $0xa9] sm:$0xff] %vm1363_vm1, %v1343_v11  ;;  %v1260_v15 = vadd.f32 %v3693_v24, %v1259_v54  ;;  %v1268_v35 = vor.u32 1.1754944e-38, %v1267_v38  ;;  %v1057_v4 = vand.u32 2147483648, %v4846_v49  ;;  %v2328_v56 = vmul.f32 %v4909_v59, %v4201_v25  ;;  %v1698_v54 = vld [vmem:[#allocation2 + $0x92] sm:$0xff] }
 0x1f3   : > { %v1049_v11 = vmul.f32 %v4885_v36, %v1048_v21  ;;  %vm1052_vm5 = vweird.f32 %v4885_v36  ;;  %3704 = vpow2.f32 %v3452_v62  ;;  %v1055_v47 = vand.u32 2147483647, %v4846_v49 }
 0x1f4   : > { %v1264_v13 = vsel %vm1263_vm4, %v3693_v24, %v1260_v15  ;;  %3706 = vrcp.f32 %v4914_v14  ;;  %v4923_v50 = vadd.f32 1.0, %v3701_v23  ;;  %v1731_v40 = vadd.f32 %v4581_v28, %v1678_v6  ;;  %v1699_v23 = vld [vmem:[#allocation2 + $0x9a] sm:$0xff] }
 0x1f5   : > { %v1269_v27 = vsel %vm1266_vm3, %v1268_v35, %v1264_v13  ;;  %v1050_v38 = vadd.f32 %v4885_v36, %v1049_v11  ;;  %vm1051_vm6 = vweird.f32 %v4846_v49  ;;  %v4932_v21 = vmul.f32 %v4870_v5, %v4199_v2 }
 0x1f6   : > { %v4928_v61 = vpop.eup %3702  ;;  %v4935_v24 = vmul.f32 %v2479_v30, %v4199_v2  ;;  %v1732_v15 = vadd.f32 %v4587_v52, %v1679_v31  ;;  %v1358_v12 = vmul.f32 %v1269_v27, %v4685_v0  ;;  %vm4941_vm7 = vmor %vm1051_vm6, %vm1052_vm5  ;;  %v4947_v35 = vmul.f32 %v4360_v58, %v4870_v5 }
 0x1f7   : > { %v2344_v49 = vadd.f32 %v2328_v56, %v4808_v41  ;;  %v1054_v62 = vsel %vm4941_vm7, %v4885_v36, %v1050_v38  ;;  %v1058_v6 = vor.u32 1.1754944e-38, %v1057_v4  ;;  %v4954_v52 = vmul.f32 %v4360_v58, %v2479_v30  ;;  %v646_v38 = vpop.f32.mrf.mxu3 }
 0x1f8   : > { %6967 = vst [vmem:[#allocation38_spill] sm:$0xff] %v4947_v35  ;;  %v1513_v0 = vmul.f32 %v4185_v9, %v4802_v63  ;;  %vm1056_vm8 = vcmp.eq.f32.partialorder %v1055_v47, 8.507059e+37  ;;  %3708 = vrcp.f32 %v4923_v50  ;;  %v4962_v41 = vmul.f32 %v4178_v1, %v4802_v63 }
 0x1f9   : > { %6968 = vst [vmem:[#allocation39_spill] sm:$0xff] %v4954_v52  ;;  %v3705_v5 = vpop.eup %3704  ;;  %v1764_v36 = vadd.f32 %v4770_v37, %v1731_v40  ;;  %v1059_v31 = vsel %vm1056_vm8, %v1058_v6, %v1054_v62  ;;  %v1272_v30 = vmul.f32 %v4928_v61, %v4883_v20  ;;  %v4971_v56 = vmul.f32 %v4191_v17, %v4881_v29  ;;  %v1462_v62 = vld [vmem:[#allocation2 + $0xa8] sm:$0xff] }
 0x1fa   : > { %1437 = vst.msk [vmem:[#allocation2 + $0x159] sm:$0xff] %vm1363_vm1, %v1358_v12  ;;  %v4967_v4 = vpop.eup %3706  ;;  %v4975_v11 = vmul.f32 %v4193_v18, %v4881_v29  ;;  %v1765_v13 = vadd.f32 %v4773_v43, %v1732_v15  ;;  %v1344_v63 = vmul.f32 %v1059_v31, %v4734_v3  ;;  %v4980_v37 = vmul.f32 %v4197_v22, %v1698_v54  ;;  %v2364_v15 = vld [vmem:[#allocation2 + $0x151] sm:$0xff] }
 0x1fb   : > { %6969 = vst [vmem:[#allocation40_spill] sm:$0xff] %v4971_v56  ;;  %v4983_v47 = vmul.f32 %v4197_v22, %v1699_v23  ;;  %v1781_v40 = vmul.f32 %v4360_v58, %v1698_v54  ;;  %v2396_v27 = vadd.f32 %v4629_v7, %v2344_v49  ;;  %v1529_v12 = vadd.f32 %v1513_v0, %v4749_v34 }
 0x1fc   : > { %6970 = vst [vmem:[#allocation41_spill] sm:$0xff] %v4980_v37  ;;  %v4989_v29 = vmul.f32 %v4199_v2, %v1698_v54  ;;  %v4992_v43 = vmul.f32 %v4199_v2, %v1699_v23  ;;  %v1782_v3 = vmul.f32 %v4360_v58, %v1699_v23  ;;  %v1273_v6 = vsub.f32 1.0, %v1272_v30 }
 0x1fd   : > { %6971 = vst [vmem:[#allocation42_spill] sm:$0xff] %v4983_v47  ;;  %v4996_v28 = vadd.f32 %v1781_v40, %v1764_v36  ;;  %v1062_v7 = vmul.f32 %v4967_v4, %v4914_v14  ;;  %v5000_v49 = vadd.f32 1.0, %v3705_v5  ;;  %v5008_v54 = vmul.f32 %v4909_v59, %v4178_v1 }
 0x1fe   : > { %1423 = vst.msk [vmem:[#allocation2 + $0xb1] sm:$0xff] %vm1363_vm1, %v1344_v63  ;;  %v5002_v34 = vpop.eup %3708  ;;  %v5004_v0 = vadd.f32 %v1782_v3, %v1765_v13  ;;  %v2298_v58 = vmul.f32 %v4909_v59, %v4185_v9  ;;  %v5013_v23 = vmul.f32 %v4622_v48, %v646_v38  ;;  %v5016_v36 = vmul.f32 %v2364_v15, %v4191_v17 }
 0x1ff   : > { %6972 = vst [vmem:[#allocation43_spill] sm:$0xff] %v4996_v28  ;;  %v2428_v5 = vadd.f32 %v4800_v39, %v2396_v27  ;;  %v1280_v30 = vand.u32 2147483647, %v4883_v20  ;;  %v1282_v13 = vand.u32 2147483648, %v4883_v20  ;;  %v1545_v63 = vmul.f32 %v4201_v25, %v1462_v62  ;;  %v5040_v28 = vpop.f32.mrf.mxu1 }
 0x200   : > { %6973 = vst [vmem:[#allocation44_spill] sm:$0xff] %v5004_v0  ;;  %v1070_v40 = vand.u32 2147483647, %v4914_v14  ;;  %v1072_v59 = vand.u32 2147483648, %v4914_v14  ;;  %3710 = vrcp.f32 %v5000_v49  ;;  %v2444_v38 = vmul.f32 %v2364_v15, %v4207_v32 }
 0x201   : > { %6974 = vst [vmem:[#allocation45_spill] sm:$0xff] %v5016_v36  ;;  %v5019_v31 = vld [vmem:[#allocation2 + $0x158] sm:$0xff]  ;;  %v1274_v3 = vmul.f32 %v4928_v61, %v1273_v6  ;;  %v1063_v52 = vsub.f32 1.0, %v1062_v7  ;;  %v1287_v39 = vmul.f32 %v5002_v34, %v4923_v50  ;;  %v5032_v27 = vadd.f32 %v2298_v58, %v4779_v26 }
 0x202   : > { %v5035_v35 = vmul.f32 %v2364_v15, %v4193_v18  ;;  %v2329_v0 = vmul.f32 %v5019_v31, %v4201_v25  ;;  %vm1276_vm9 = vweird.f32 %v4883_v20  ;;  %v2460_v36 = vadd.f32 %v2444_v38, %v2428_v5  ;;  %v5056_v5 = vld [vmem:[#allocation2 + $0xa9] sm:$0xff] }
 0x203   : > { %vm5044_vm10 = vcmp.eq.f32.partialorder %v1280_v30, 8.507059e+37  ;;  %v1283_v7 = vor.u32 1.1754944e-38, %v1282_v13  ;;  %vm1066_vm11 = vweird.f32 %v4914_v14  ;;  %v1561_v26 = vadd.f32 %v1545_v63, %v4840_v57 }
 0x204   : > { %6975 = vst [vmem:[#allocation46_spill] sm:$0xff] %v5035_v35  ;;  %vm5052_vm12 = vcmp.eq.f32.partialorder %v1070_v40, 8.507059e+37  ;;  %v1073_v37 = vor.u32 1.1754944e-38, %v1072_v59  ;;  %v1275_v30 = vadd.f32 %v4928_v61, %v1274_v3  ;;  %vm1277_vm13 = vweird.f32 %v4928_v61 }
 0x205   : > { %v5042_v47 = vld [vmem:[#allocation2 + $0xb0] sm:$0xff]  ;;  %v1064_v13 = vmul.f32 %v4967_v4, %v1063_v52  ;;  %v1288_v38 = vsub.f32 1.0, %v1287_v39  ;;  %v2345_v57 = vadd.f32 %v2329_v0, %v4888_v33  ;;  %vm1291_vm14 = vweird.f32 %v4923_v50  ;;  %vm1278_vm0 = vmor %vm1276_vm9, %vm1277_vm13 }
 0x206   : > { %v1546_v15 = vmul.f32 %v4201_v25, %v5042_v47  ;;  %v5061_v56 = vpop.eup %3710  ;;  %v1295_v40 = vand.u32 2147483647, %v4923_v50  ;;  %v2512_v59 = vadd.f32 %v4720_v51, %v2460_v36  ;;  %v5068_v35 = vmul.f32 %v4178_v1, %v1462_v62  ;;  %v1582_v58 = vld [vmem:[#allocation2 + $0xb1] sm:$0xff] }
 0x207   : > { %v1514_v3 = vmul.f32 %v4185_v9, %v1462_v62  ;;  %vm1067_vm15 = vweird.f32 %v4967_v4  ;;  %v5074_v52 = vmul.f32 %v4191_v17, %v5056_v5  ;;  %v1614_v33 = vadd.f32 %v4679_v46, %v1561_v26 }
 0x208   : > { %v1562_v63 = vadd.f32 %v1546_v15, %v1529_v12  ;;  %vm1292_vm2 = vweird.f32 %v5002_v34  ;;  %v1297_v51 = vand.u32 2147483648, %v4923_v50  ;;  %v1279_v12 = vsel %vm1278_vm0, %v4928_v61, %v1275_v30  ;;  %vm1068_vm3 = vmor %vm1066_vm11, %vm1067_vm15 }
 0x209   : > { %v1065_v0 = vadd.f32 %v4967_v4, %v1064_v13  ;;  %v1289_v62 = vmul.f32 %v5002_v34, %v1288_v38  ;;  %v1077_v36 = vmul.f32 %v5061_v56, %v5000_v49  ;;  %v2397_v39 = vadd.f32 %v4710_v55, %v2345_v57  ;;  %vm1293_vm5 = vmor %vm1291_vm14, %vm1292_vm2 }
 0x20a   : > { %v1615_v46 = vadd.f32 %v4753_v8, %v1562_v63  ;;  %v1284_v20 = vsel %vm5044_vm10, %v1283_v7, %v1279_v12  ;;  %vm5092_vm4 = vcmp.eq.f32.partialorder %v1295_v40, 8.507059e+37  ;;  %v1647_v55 = vadd.f32 %v4835_v53, %v1614_v33  ;;  %v613_v7 = vpop.f32.mrf.mxu1 }
 0x20b   : > { %v1359_v61 = vmul.f32 %v1284_v20, %v4792_v44  ;;  %v1069_v15 = vsel %vm1068_vm3, %v4967_v4, %v1065_v0  ;;  %v1290_v30 = vadd.f32 %v5002_v34, %v1289_v62  ;;  %v1078_v13 = vsub.f32 1.0, %v1077_v36  ;;  %v2365_v44 = vld [vmem:[#allocation2 + $0x159] sm:$0xff] }
 0x20c   : > { %v1074_v8 = vsel %vm5052_vm12, %v1073_v37, %v1069_v15  ;;  %v1298_v14 = vor.u32 1.1754944e-38, %v1297_v51  ;;  %v1085_v6 = vand.u32 2147483647, %v5000_v49  ;;  %vm1082_vm6 = vweird.f32 %v5061_v56  ;;  %v2480_v36 = vld [vmem:[#allocation2 + $0x152] sm:$0xff] }
 0x20d   : > { %1438 = vst.msk [vmem:[#allocation2 + $0x169] sm:$0xff] %vm1363_vm1, %v1359_v61  ;;  %v1345_v4 = vmul.f32 %v1074_v8, %v4828_v60  ;;  %v1294_v38 = vsel %vm1293_vm5, %v5002_v34, %v1290_v30  ;;  %v1079_v53 = vmul.f32 %v5061_v56, %v1078_v13  ;;  %v1664_v37 = vmul.f32 %v4207_v32, %v5056_v5  ;;  %v6983_v13 = vld [vmem:[#allocation32_spill] sm:$0xff]  ;;  %v6986_v8 = vld [vmem:[#allocation19_spill] sm:$0xff] }
 0x20e   : > { %v2429_v50 = vadd.f32 %v4879_v45, %v2397_v39  ;;  %v1299_v57 = vsel %vm5092_vm4, %v1298_v14, %v1294_v38  ;;  %v1087_v63 = vand.u32 2147483648, %v5000_v49  ;;  %v1648_v40 = vadd.f32 %v4975_v11, %v1615_v46  ;;  %v2481_v39 = vld [vmem:[#allocation2 + $0x15a] sm:$0xff] }
 0x20f   : > { %1424 = vst.msk [vmem:[#allocation2 + $0xc1] sm:$0xff] %vm1363_vm1, %v1345_v4  ;;  %v1360_v60 = vmul.f32 %v1299_v57, %v4852_v10  ;;  %v1080_v34 = vadd.f32 %v5061_v56, %v1079_v53  ;;  %vm1081_vm7 = vweird.f32 %v5000_v49  ;;  %v1680_v33 = vadd.f32 %v1664_v37, %v1647_v55  ;;  %v5176_v53 = vld [vmem:[%s6899_s4 + $0x8] ss:$0 sm:$0xff] }
 0x210   : > { %v2445_v51 = vmul.f32 %v2365_v44, %v4207_v32  ;;  %vm1083_vm8 = vmor %vm1081_vm7, %vm1082_vm6  ;;  %v1088_v45 = vor.u32 1.1754944e-38, %v1087_v63  ;;  %v671_v12 = vmul.f32 %v4622_v48, %v5040_v28  ;;  %v2299_v0 = vmul.f32 %v5019_v31, %v4185_v9 }
 0x211   : > { %v1665_v11 = vmul.f32 %v4207_v32, %v1582_v58  ;;  %1439 = vst.msk [vmem:[#allocation2 + $0x171] sm:$0xff] %vm1363_vm1, %v1360_v60  ;;  %v1084_v10 = vsel %vm1083_vm8, %v5061_v56, %v1080_v34  ;;  %vm1086_vm9 = vcmp.eq.f32.partialorder %v1085_v6, 8.507059e+37  ;;  %v5133_v49 = vmul.f32 %v4193_v18, %v5056_v5 }
 0x212   : > { %v2461_v62 = vadd.f32 %v2445_v51, %v2429_v50  ;;  %v2544_v46 = vadd.f32 %v4932_v21, %v2512_v59  ;;  %v1089_v28 = vsel %vm1086_vm9, %v1088_v45, %v1084_v10  ;;  %v1530_v20 = vadd.f32 %v1514_v3, %v4825_v42  ;;  %v648_v59 = vpop.f32.mrf.mxu3  ;;  %v616_v38 = vpop.f32.mrf.mxu1  ;;  %v6987_v50 = vld [vmem:[#allocation25_spill] sm:$0xff] }
 0x213   : > { %v1681_v26 = vadd.f32 %v1665_v11, %v1648_v40  ;;  %v1346_v61 = vmul.f32 %v1089_v28, %v4875_v19  ;;  %v5140_v15 = vadd.f32 %v4548_v16, %v5013_v23  ;;  %v5144_v56 = vmul.f32 %v5019_v31, %v4178_v1  ;;  %v6982_v19 = vld [vmem:[#allocation24_spill] sm:$0xff] }
 0x214   : > { %v5147_v5 = vmul.f32 %v2365_v44, %v4191_v17  ;;  %v5150_v30 = vmul.f32 %v2365_v44, %v4193_v18  ;;  %v2250_v21 = vld [vmem:[#allocation2 + $0x168] sm:$0xff]  ;;  %v5153_v42 = vadd.f32 %v4548_v16, %v671_v12  ;;  %v1733_v3 = vadd.f32 %v6982_v19, %v1680_v33  ;;  %v1701_v28 = vld [vmem:[#allocation2 + $0xb2] sm:$0xff] }
 0x215   : > { %v5157_v23 = vadd.f32 %v2299_v0, %v6983_v13  ;;  %v5160_v55 = vmul.f32 %v2480_v36, %v4197_v22  ;;  %v5163_v31 = vmul.f32 %v2481_v39, %v4197_v22  ;;  %1425 = vst.msk [vmem:[#allocation2 + $0xc9] sm:$0xff] %vm1363_vm1, %v1346_v61  ;;  %v2513_v14 = vadd.f32 %v6986_v8, %v2461_v62  ;;  %v1700_v62 = vld [vmem:[#allocation2 + $0xaa] sm:$0xff] }
 0x216   : > { %v5168_v6 = vmul.f32 %v2480_v36, %v4199_v2  ;;  %v1515_v44 = vmul.f32 %v4185_v9, %v5042_v47  ;;  %v2330_v4 = vmul.f32 %v2250_v21, %v4201_v25  ;;  %v2560_v37 = vmul.f32 %v5176_v53, %v2480_v36  ;;  %v1464_v33 = vld [vmem:[#allocation2 + $0xc0] sm:$0xff]  ;;  %v2366_v8 = vld [vmem:[#allocation2 + $0x169] sm:$0xff] }
 0x217   : > { %6984 = vst [vmem:[#allocation24_spill] sm:$0xff] %v5160_v55  ;;  %v1734_v57 = vadd.f32 %v6987_v50, %v1681_v26  ;;  %v3467_v63 = vmul.f32 -1.442695, %v5140_v15  ;;  %v686_v40 = vmul.f32 %v4622_v48, %v648_v59  ;;  %v5183_v60 = vmul.f32 %v2481_v39, %v4199_v2 }
 0x218   : > { %6985 = vst [vmem:[#allocation32_spill] sm:$0xff] %v5163_v31  ;;  %v2561_v34 = vmul.f32 %v5176_v53, %v2481_v39  ;;  %v3453_v51 = vmul.f32 -1.442695, %v5153_v42  ;;  %v672_v45 = vmul.f32 %v4622_v48, %v613_v7  ;;  %v5188_v12 = vadd.f32 %v2560_v37, %v2544_v46  ;;  %v2251_v19 = vld [vmem:[#allocation2 + $0x170] sm:$0xff] }
 0x219   : > { %6988 = vst [vmem:[#allocation19_spill] sm:$0xff] %v5183_v60  ;;  %v5192_v0 = vmul.f32 %v4178_v1, %v5042_v47  ;;  %v5195_v11 = vmul.f32 %v4191_v17, %v1582_v58  ;;  %v5198_v10 = vmul.f32 %v4193_v18, %v1582_v58  ;;  %v2545_v36 = vadd.f32 %v4935_v24, %v2513_v14  ;;  %v6993_v14 = vld [vmem:[#allocation28_spill] sm:$0xff] }
 0x21a   : > { %6989 = vst [vmem:[#allocation25_spill] sm:$0xff] %v5188_v12  ;;  %v1531_v39 = vadd.f32 %v1515_v44, %v4962_v41  ;;  %v1766_v7 = vadd.f32 %v4989_v29, %v1733_v3  ;;  %v2346_v46 = vadd.f32 %v2330_v4, %v5032_v27  ;;  %v1767_v26 = vadd.f32 %v4992_v43, %v1734_v57 }
 0x21b   : > { %6990 = vst [vmem:[#allocation47_spill] sm:$0xff] %v5195_v11  ;;  %v1547_v47 = vmul.f32 %v4201_v25, %v1464_v33  ;;  %3712 = vpow2.f32 %v3467_v63  ;;  %v5207_v61 = vadd.f32 %v4548_v16, %v686_v40  ;;  %v5210_v58 = vmul.f32 %v4197_v22, %v1700_v62  ;;  %v1583_v63 = vld [vmem:[#allocation2 + $0xc1] sm:$0xff] }
 0x21c   : > { %v1783_v24 = vmul.f32 %v5176_v53, %v1700_v62  ;;  %3714 = vpow2.f32 %v3453_v51  ;;  %v5214_v41 = vadd.f32 %v4548_v16, %v672_v45  ;;  %v5217_v29 = vmul.f32 %v4197_v22, %v1701_v28  ;;  %v5230_v44 = vld [vmem:[#allocation2 + $0xc8] sm:$0xff] }
 0x21d   : > { %v5220_v43 = vmul.f32 %v4199_v2, %v1700_v62  ;;  %v5223_v27 = vmul.f32 %v4199_v2, %v1701_v28  ;;  %v1784_v59 = vmul.f32 %v5176_v53, %v1701_v28  ;;  %v2300_v13 = vmul.f32 %v2250_v21, %v4185_v9 }
 0x21e   : > { %6991 = vst [vmem:[#allocation48_spill] sm:$0xff] %v5217_v29  ;;  %v5226_v3 = vadd.f32 %v1783_v24, %v1766_v7  ;;  %v2398_v16 = vadd.f32 %v6993_v14, %v2346_v46  ;;  %v673_v4 = vmul.f32 %v4622_v48, %v616_v38  ;;  %v5233_v37 = vadd.f32 %v2561_v34, %v2545_v36  ;;  %v618_v7 = vpop.f32.mrf.mxu1 }
 0x21f   : > { %v5235_v50 = vadd.f32 %v1784_v59, %v1767_v26  ;;  %v1563_v57 = vadd.f32 %v1547_v47, %v1530_v20  ;;  %v3468_v40 = vmul.f32 -1.442695, %v5207_v61  ;;  %v5239_v51 = vmul.f32 %v2250_v21, %v4178_v1  ;;  %v6996_v26 = vld [vmem:[#allocation46_spill] sm:$0xff] }
 0x220   : > { %6992 = vst [vmem:[#allocation49_spill] sm:$0xff] %v5226_v3  ;;  %v1516_v45 = vmul.f32 %v4185_v9, %v1464_v33  ;;  %v2331_v62 = vmul.f32 %v2251_v19, %v4201_v25  ;;  %v3454_v28 = vmul.f32 -1.442695, %v5214_v41  ;;  %v5245_v48 = vmul.f32 %v2366_v8, %v4191_v17  ;;  %v5263_v59 = vld [vmem:[%s6898_s3] ss:$0 sm:$0xff] }
 0x221   : > { %6994 = vst [vmem:[#allocation28_spill] sm:$0xff] %v5233_v37  ;;  %v3713_v46 = vpop.eup %3712  ;;  %v5248_v38 = vmul.f32 %v2366_v8, %v4193_v18  ;;  %v2446_v20 = vmul.f32 %v2366_v8, %v4207_v32  ;;  %v1548_v21 = vmul.f32 %v4201_v25, %v5230_v44  ;;  %v5254_v36 = vadd.f32 %v2300_v13, %v5008_v54  ;;  %v6998_v8 = vld [vmem:[#allocation31_spill] sm:$0xff] }
 0x222   : > { %6995 = vst [vmem:[#allocation50_spill] sm:$0xff] %v5235_v50  ;;  %v3715_v34 = vpop.eup %3714  ;;  %v2430_v47 = vadd.f32 %v6996_v26, %v2398_v16  ;;  %v5258_v24 = vmul.f32 %v4193_v18, %v1583_v63  ;;  %v5266_v14 = vadd.f32 %v5263_v59, %v673_v4  ;;  %v1616_v37 = vadd.f32 %v6998_v8, %v1563_v57  ;;  %v2367_v16 = vld [vmem:[#allocation2 + $0x171] sm:$0xff] }
 0x223   : > { %v1666_v12 = vmul.f32 %v4207_v32, %v1583_v63  ;;  %v5271_v54 = vmul.f32 %v4178_v1, %v1464_v33  ;;  %v5274_v13 = vmul.f32 %v4191_v17, %v1583_v63  ;;  %v5277_v26 = vadd.f32 %v1516_v45, %v5068_v35  ;;  %v2482_v4 = vld [vmem:[#allocation2 + $0x16a] sm:$0xff]  ;;  %v2483_v8 = vld [vmem:[#allocation2 + $0x172] sm:$0xff] }
 0x224   : > { %6997 = vst [vmem:[#allocation46_spill] sm:$0xff] %v5266_v14  ;;  %v2301_v50 = vmul.f32 %v2251_v19, %v4185_v9  ;;  %v2347_v3 = vadd.f32 %v2331_v62, %v5157_v23  ;;  %v5281_v60 = vadd.f32 1.0, %v3713_v46  ;;  %v5284_v57 = vmul.f32 %v2251_v19, %v4178_v1 }
 0x225   : > { %6999 = vst [vmem:[#allocation31_spill] sm:$0xff] %v5274_v13  ;;  %v1564_v33 = vadd.f32 %v1548_v21, %v1531_v39  ;;  %v5286_v31 = vadd.f32 1.0, %v3715_v34  ;;  %3716 = vpow2.f32 %v3468_v40  ;;  %v2462_v63 = vadd.f32 %v2446_v20, %v2430_v47  ;;  %v7002_v40 = vld [vmem:[#allocation34_spill] sm:$0xff]  ;;  %v7006_v34 = vld [vmem:[#allocation40_spill] sm:$0xff] }
 0x226   : > { %v5289_v13 = vmul.f32 %v2367_v16, %v4191_v17  ;;  %v5292_v35 = vmul.f32 %v2367_v16, %v4193_v18  ;;  %3718 = vrcp.f32 %v5281_v60  ;;  %v1649_v23 = vadd.f32 %v5133_v49, %v1616_v37  ;;  %v5312_v49 = vld [vmem:[#allocation2 + $0xc9] sm:$0xff]  ;;  %v621_v29 = vpop.f32.mrf.mxu1 }
 0x227   : > { %v5297_v45 = vmul.f32 %v2367_v16, %v4207_v32  ;;  %v5300_v19 = vmul.f32 %v2482_v4, %v4197_v22  ;;  %3720 = vrcp.f32 %v5286_v31  ;;  %v5304_v39 = vadd.f32 %v2301_v50, %v5144_v56  ;;  %v7007_v56 = vld [vmem:[#allocation36_spill] sm:$0xff] }
 0x228   : > { %7000 = vst [vmem:[#allocation51_spill] sm:$0xff] %v5292_v35  ;;  %v2399_v62 = vadd.f32 %v7002_v40, %v2347_v3  ;;  %v5308_v46 = vmul.f32 %v2483_v8, %v4197_v22  ;;  %v1517_v20 = vmul.f32 %v4185_v9, %v5230_v44  ;;  %v5315_v37 = vmul.f32 %v2482_v4, %v4199_v2 }
 0x229   : > { %7001 = vst [vmem:[#allocation52_spill] sm:$0xff] %v5300_v19  ;;  %v5318_v21 = vmul.f32 %v2483_v8, %v4199_v2  ;;  %v1617_v47 = vadd.f32 %v7006_v34, %v1564_v33  ;;  %3722 = vpow2.f32 %v3454_v28  ;;  %v5322_v50 = vadd.f32 %v7007_v56, %v2462_v63 }
 0x22a   : > { %7003 = vst [vmem:[#allocation34_spill] sm:$0xff] %v5308_v46  ;;  %v5325_v3 = vmul.f32 %v5176_v53, %v2482_v4  ;;  %v5328_v16 = vmul.f32 %v5176_v53, %v2483_v8  ;;  %v3455_v40 = vmul.f32 -1.442695, %v5266_v14  ;;  %v1667_v28 = vmul.f32 %v4207_v32, %v5312_v49  ;;  %v5342_v4 = vld [vmem:[%s6897_s2] ss:$0 sm:$0xff] }
 0x22b   : > { %7004 = vst [vmem:[#allocation53_spill] sm:$0xff] %v5315_v37  ;;  %v3717_v55 = vpop.eup %3716  ;;  %v5331_v37 = vadd.f32 %v1666_v12, %v1649_v23  ;;  %v674_v8 = vmul.f32 %v5342_v4, %v618_v7  ;;  %v5346_v63 = vadd.f32 %v5150_v30, %v2399_v62  ;;  %v5349_v12 = vadd.f32 %v1517_v20, %v5192_v0 }
 0x22c   : > { %7005 = vst [vmem:[#allocation54_spill] sm:$0xff] %v5318_v21  ;;  %v5335_v21 = vmul.f32 %v4193_v18, %v5312_v49  ;;  %v3719_v33 = vpop.eup %3718  ;;  %v5351_v23 = vadd.f32 1.0, %v3717_v55  ;;  %3724 = vpow2.f32 %v3455_v40  ;;  %v1650_v56 = vadd.f32 %v5198_v10, %v1617_v47 }
 0x22d   : > { %7008 = vst [vmem:[#allocation40_spill] sm:$0xff] %v5328_v16  ;;  %v3721_v34 = vpop.eup %3720  ;;  %v1302_v16 = vmul.f32 %v3719_v33, %v5281_v60  ;;  %v5356_v14 = vadd.f32 %v5263_v59, %v674_v8  ;;  %v675_v7 = vmul.f32 %v5342_v4, %v621_v29  ;;  %vm1306_vm10 = vweird.f32 %v5281_v60 }
 0x22e   : > { %7009 = vst [vmem:[#allocation36_spill] sm:$0xff] %v5335_v21  ;;  %v1312_v30 = vand.u32 2147483648, %v5281_v60  ;;  %v1092_v0 = vmul.f32 %v3721_v34, %v5286_v31  ;;  %3726 = vrcp.f32 %v5351_v23  ;;  %vm1307_vm11 = vweird.f32 %v3719_v33 }
 0x22f   : > { %7010 = vst [vmem:[#allocation55_spill] sm:$0xff] %v5356_v14  ;;  %v3723_v55 = vpop.eup %3722  ;;  %v1303_v62 = vsub.f32 1.0, %v1302_v16  ;;  %v1310_v10 = vand.u32 2147483647, %v5281_v60  ;;  %v1100_v20 = vand.u32 2147483647, %v5286_v31  ;;  %v1683_v21 = vadd.f32 %v1667_v28, %v1650_v56  ;;  %vm5375_vm13 = vmor %vm1306_vm10, %vm1307_vm11 }
 0x230   : > { %v1093_v47 = vsub.f32 1.0, %v1092_v0  ;;  %v1102_v40 = vand.u32 2147483648, %v5286_v31  ;;  %v5366_v8 = vadd.f32 1.0, %v3723_v55  ;;  %v3456_v29 = vmul.f32 -1.442695, %v5356_v14  ;;  %v1702_v14 = vld [vmem:[#allocation2 + $0xc2] sm:$0xff] }
 0x231   : > { %v1304_v46 = vmul.f32 %v3719_v33, %v1303_v62  ;;  %vm1096_vm12 = vweird.f32 %v5286_v31  ;;  %v5371_v35 = vadd.f32 %v5263_v59, %v675_v7  ;;  %v1313_v0 = vor.u32 1.1754944e-38, %v1312_v30 }
 0x232   : > { %v3725_v16 = vpop.eup %3724  ;;  %v1094_v19 = vmul.f32 %v3721_v34, %v1093_v47  ;;  %vm1097_vm14 = vweird.f32 %v3721_v34  ;;  %3728 = vrcp.f32 %v5366_v8  ;;  %vm1311_vm15 = vcmp.eq.f32.partialorder %v1310_v10, 8.507059e+37  ;;  %v5394_v47 = vld [vmem:[#allocation2 + $0xca] sm:$0xff] }
 0x233   : > { %7011 = vst [vmem:[#allocation56_spill] sm:$0xff] %v5371_v35  ;;  %v1305_v55 = vadd.f32 %v3719_v33, %v1304_v46  ;;  %vm5380_vm0 = vcmp.eq.f32.partialorder %v1100_v20, 8.507059e+37  ;;  %v5384_v56 = vadd.f32 1.0, %v3725_v16  ;;  %v1103_v60 = vor.u32 1.1754944e-38, %v1102_v40  ;;  %vm1098_vm3 = vmor %vm1096_vm12, %vm1097_vm14 }
 0x234   : > { %v3727_v7 = vpop.eup %3726  ;;  %v1095_v62 = vadd.f32 %v3721_v34, %v1094_v19  ;;  %vm1321_vm2 = vweird.f32 %v5351_v23  ;;  %3730 = vpow2.f32 %v3456_v29  ;;  %v1325_v10 = vand.u32 2147483647, %v5351_v23 }
 0x235   : > { %v1309_v30 = vsel %vm5375_vm13, %v3719_v33, %v1305_v55  ;;  %v1317_v46 = vmul.f32 %v3727_v7, %v5351_v23  ;;  %v3457_v20 = vmul.f32 -1.442695, %v5371_v35  ;;  %vm1322_vm4 = vweird.f32 %v3727_v7  ;;  %v7016_v55 = vld [vmem:[#allocation41_spill] sm:$0xff] }
 0x236   : > { %v1314_v19 = vsel %vm1311_vm15, %v1313_v0, %v1309_v30  ;;  %v1099_v40 = vsel %vm1098_vm3, %v3721_v34, %v1095_v62  ;;  %v1327_v29 = vand.u32 2147483648, %v5351_v23  ;;  %3732 = vrcp.f32 %v5384_v56  ;;  %vm5431_vm5 = vmor %vm1321_vm2, %vm1322_vm4 }
 0x237   : > { %v1361_v16 = vmul.f32 %v1314_v19, %v5140_v15  ;;  %v1104_v11 = vsel %vm5380_vm0, %v1103_v60, %v1099_v40  ;;  %v1318_v31 = vsub.f32 1.0, %v1317_v46  ;;  %v1735_v35 = vadd.f32 %v7016_v55, %v5331_v37 }
 0x238   : > { %v5401_v33 = vpop.eup %3728  ;;  %v2546_v0 = vadd.f32 %v5168_v6, %v5322_v50  ;;  %v5408_v34 = vmul.f32 %v4199_v2, %v1702_v14  ;;  %v1347_v62 = vmul.f32 %v1104_v11, %v5153_v42  ;;  %v5413_v15 = vmul.f32 %v4199_v2, %v5394_v47 }
 0x239   : > { %1440 = vst.msk [vmem:[#allocation2 + $0x181] sm:$0xff] %vm1363_vm1, %v1361_v16  ;;  %v1319_v28 = vmul.f32 %v3727_v7, %v1318_v31  ;;  %v1107_v60 = vmul.f32 %v5401_v33, %v5366_v8  ;;  %3734 = vpow2.f32 %v3457_v20  ;;  %v2463_v6 = vadd.f32 %v5297_v45, %v5346_v63  ;;  %v7020_v20 = vld [vmem:[#allocation42_spill] sm:$0xff]  ;;  %v2254_v45 = vld [vmem:[#allocation2 + $0x198] sm:$0xff] }
 0x23a   : > { %7017 = vst [vmem:[#allocation41_spill] sm:$0xff] %v5413_v15  ;;  %v3731_v37 = vpop.eup %3730  ;;  %v5421_v50 = vmul.f32 %v5176_v53, %v1702_v14  ;;  %v5425_v42 = vmul.f32 %v5176_v53, %v5394_v47  ;;  %v1328_v46 = vor.u32 1.1754944e-38, %v1327_v29  ;;  %v1736_v19 = vadd.f32 %v7020_v20, %v1683_v21  ;;  %v2370_v63 = vld [vmem:[#allocation2 + $0x199] sm:$0xff] }
 0x23b   : > { %1426 = vst.msk [vmem:[#allocation2 + $0xd9] sm:$0xff] %vm1363_vm1, %v1347_v62  ;;  %v1320_v40 = vadd.f32 %v3727_v7, %v1319_v28  ;;  %vm1326_vm6 = vcmp.eq.f32.partialorder %v1325_v10, 8.507059e+37  ;;  %v1108_v16 = vsub.f32 1.0, %v1107_v60  ;;  %v5437_v11 = vadd.f32 %v5325_v3, %v2546_v0  ;;  %v2255_v10 = vld [vmem:[#allocation2 + $0x1a0] sm:$0xff]  ;;  %v7024_v0 = vld [vmem:[#allocation37_spill] sm:$0xff] }
 0x23c   : > { %v5440_v31 = vadd.f32 %v5220_v43, %v1735_v35  ;;  %v5444_v23 = vmul.f32 %v4178_v1, %v5230_v44  ;;  %v5448_v29 = vmul.f32 %v4191_v17, %v5312_v49  ;;  %v5450_v21 = vpop.eup %3732  ;;  %v5453_v55 = vmul.f32 %v4197_v22, %v1702_v14  ;;  %v2486_v60 = vld [vmem:[#allocation2 + $0x19a] sm:$0xff] }
 0x23d   : > { %7021 = vst [vmem:[#allocation42_spill] sm:$0xff] %v5437_v11  ;;  %v1324_v3 = vsel %vm5431_vm5, %v3727_v7, %v1320_v40  ;;  %v1109_v43 = vmul.f32 %v5401_v33, %v1108_v16  ;;  %v5458_v35 = vadd.f32 1.0, %v3731_v37  ;;  %v5461_v44 = vadd.f32 %v7024_v0, %v2463_v6 }
 0x23e   : > { %7022 = vst [vmem:[#allocation57_spill] sm:$0xff] %v5448_v29  ;;  %v2334_v62 = vmul.f32 %v2254_v45, %v4201_v25  ;;  %v5465_v49 = vmul.f32 %v2370_v63, %v4207_v32  ;;  %v1329_v28 = vsel %vm1326_vm6, %v1328_v46, %v1324_v3  ;;  %v5468_v20 = vadd.f32 %v5223_v27, %v1736_v19  ;;  %v623_v63 = vpop.f32.mrf.mxu1 }
 0x23f   : > { %7023 = vst [vmem:[#allocation58_spill] sm:$0xff] %v5453_v55  ;;  %v3735_v14 = vpop.eup %3734  ;;  %v1362_v7 = vmul.f32 %v1329_v28, %v5207_v61  ;;  %v1115_v30 = vand.u32 2147483647, %v5366_v8  ;;  %v1117_v37 = vand.u32 2147483648, %v5366_v8  ;;  %v5474_v6 = vmul.f32 %v2255_v10, %v4201_v25  ;;  %v2371_v55 = vld [vmem:[#allocation2 + $0x1a1] sm:$0xff] }
 0x240   : > { %v2252_v40 = vld [vmem:[#allocation2 + $0x180] sm:$0xff]  ;;  %v1110_v45 = vadd.f32 %v5401_v33, %v1109_v43  ;;  %vm1112_vm7 = vweird.f32 %v5401_v33  ;;  %v1122_v46 = vmul.f32 %v5450_v21, %v5384_v56  ;;  %v5486_v16 = vmul.f32 %v5176_v53, %v2486_v60 }
 0x241   : > { %v2302_v27 = vmul.f32 %v2252_v40, %v4185_v9  ;;  %v2332_v61 = vmul.f32 %v2252_v40, %v4201_v25  ;;  %1441 = vst.msk [vmem:[#allocation2 + $0x189] sm:$0xff] %vm1363_vm1, %v1362_v7  ;;  %3736 = vrcp.f32 %v5458_v35  ;;  %vm1111_vm8 = vweird.f32 %v5366_v8  ;;  %v2368_v7 = vld [vmem:[#allocation2 + $0x181] sm:$0xff] }
 0x242   : > { %v5482_v19 = vld [vmem:[#allocation2 + $0xd8] sm:$0xff]  ;;  %v5494_v43 = vadd.f32 1.0, %v3735_v14  ;;  %vm1113_vm9 = vmor %vm1111_vm8, %vm1112_vm7  ;;  %vm1116_vm10 = vcmp.eq.f32.partialorder %v1115_v30, 8.507059e+37  ;;  %v1118_v28 = vor.u32 1.1754944e-38, %v1117_v37  ;;  %v676_v60 = vmul.f32 %v5342_v4, %v623_v63  ;;  %v2487_v37 = vld [vmem:[#allocation2 + $0x1a2] sm:$0xff] }
 0x243   : > { %v1549_v3 = vmul.f32 %v4201_v25, %v5482_v19  ;;  %v2288_v10 = vmul.f32 %v4185_v9, %v5482_v19  ;;  %v2318_v0 = vadd.f32 %v2302_v27, %v5239_v51  ;;  %v1114_v29 = vsel %vm1113_vm9, %v5401_v33, %v1110_v45  ;;  %v5504_v17 = vld [vmem:[#allocation2 + $0xd9] sm:$0xff] }
 0x244   : > { %v1123_v15 = vsub.f32 1.0, %v1122_v46  ;;  %v2348_v8 = vadd.f32 %v2332_v61, %v5254_v36  ;;  %v1119_v51 = vsel %vm1116_vm10, %v1118_v28, %v1114_v29  ;;  %v1130_v30 = vand.u32 2147483647, %v5384_v56 }
 0x245   : > { %v1565_v40 = vadd.f32 %v1549_v3, %v5277_v26  ;;  %v5500_v11 = vadd.f32 %v2288_v10, %v5271_v54  ;;  %v2350_v14 = vadd.f32 %v2334_v62, %v2318_v0  ;;  %v1348_v26 = vmul.f32 %v1119_v51, %v5214_v41 }
 0x246   : > { %v1132_v54 = vand.u32 2147483648, %v5384_v56  ;;  %3738 = vrcp.f32 %v5494_v43  ;;  %v2418_v36 = vmul.f32 %v2368_v7, %v4193_v18  ;;  %v2451_v62 = vmul.f32 %v2371_v55, %v4207_v32 }
 0x247   : > { %v1618_v4 = vadd.f32 %v5074_v52, %v1565_v40  ;;  %v5511_v63 = vpop.eup %3736  ;;  %v2402_v33 = vadd.f32 %v5245_v48, %v2350_v14  ;;  %v5517_v29 = vadd.f32 %v5263_v59, %v676_v60  ;;  %v1668_v41 = vmul.f32 %v4207_v32, %v5504_v17  ;;  %1427 = vst.msk [vmem:[#allocation2 + $0xe1] sm:$0xff] %vm1363_vm1, %v1348_v26  ;;  %v7025_v48 = vld [vmem:[#allocation45_spill] sm:$0xff] }
 0x248   : > { %v2253_v45 = vld [vmem:[#allocation2 + $0x188] sm:$0xff]  ;;  %v1124_v46 = vmul.f32 %v5450_v21, %v1123_v15  ;;  %vm1126_vm11 = vweird.f32 %v5384_v56  ;;  %v2400_v27 = vadd.f32 %v7025_v48, %v2348_v8  ;;  %v5529_v59 = vmul.f32 %v5176_v53, %v2487_v37 }
 0x249   : > { %v1651_v52 = vadd.f32 %v5258_v24, %v1618_v4  ;;  %v2303_v61 = vmul.f32 %v2253_v45, %v4185_v9  ;;  %v2333_v55 = vmul.f32 %v2253_v45, %v4201_v25  ;;  %v2369_v3 = vld [vmem:[#allocation2 + $0x189] sm:$0xff]  ;;  %vm5531_vm12 = vcmp.eq.f32.partialorder %v1130_v30, 8.507059e+37 }
 0x24a   : > { %v1133_v0 = vor.u32 1.1754944e-38, %v1132_v54  ;;  %v1137_v15 = vmul.f32 %v5511_v63, %v5458_v35  ;;  %v1147_v28 = vand.u32 2147483648, %v5458_v35  ;;  %v2434_v60 = vadd.f32 %v2418_v36, %v2402_v33  ;;  %v5551_v36 = vld [vmem:[#allocation2 + $0x182] sm:$0xff] }
 0x24b   : > { %v1684_v24 = vadd.f32 %v1668_v41, %v1651_v52  ;;  %v2319_v40 = vadd.f32 %v2303_v61, %v5284_v57  ;;  %v1145_v8 = vand.u32 2147483647, %v5458_v35  ;;  %v3458_v14 = vmul.f32 -1.442695, %v5517_v29 }
 0x24c   : > { %v5541_v51 = vpop.eup %3738  ;;  %v2448_v30 = vmul.f32 %v2368_v7, %v4207_v32  ;;  %v1125_v37 = vadd.f32 %v5450_v21, %v1124_v46  ;;  %vm1127_vm13 = vweird.f32 %v5450_v21  ;;  %v2432_v26 = vadd.f32 %v5248_v38, %v2400_v27  ;;  %v7040_v27 = vld [vmem:[#allocation48_spill] sm:$0xff] }
 0x24d   : > { %v1737_v4 = vadd.f32 %v5210_v58, %v1684_v24  ;;  %v2349_v54 = vadd.f32 %v2333_v55, %v5304_v39  ;;  %v2351_v57 = vadd.f32 %v5474_v6, %v2319_v40  ;;  %v2419_v33 = vmul.f32 %v2369_v3, %v4193_v18  ;;  %vm5563_vm15 = vmor %vm1126_vm11, %vm1127_vm13 }
 0x24e   : > { %v1138_v52 = vsub.f32 1.0, %v1137_v15  ;;  %vm1141_vm14 = vweird.f32 %v5458_v35  ;;  %v1148_v7 = vor.u32 1.1754944e-38, %v1147_v28  ;;  %v1160_v58 = vand.u32 2147483647, %v5494_v43  ;;  %v5557_v46 = vld [vmem:[#allocation2 + $0xe0] sm:$0xff]  ;;  %v5583_v28 = vld [vmem:[#allocation2 + $0x18a] sm:$0xff] }
 0x24f   : > { %v2466_v41 = vadd.f32 %v5465_v49, %v2434_v60  ;;  %v2403_v45 = vadd.f32 %v5289_v13, %v2351_v57  ;;  %v5559_v38 = vld [vmem:[#allocation2 + $0xda] sm:$0xff]  ;;  %v1152_v6 = vmul.f32 %v5541_v51, %v5494_v43  ;;  %3740 = vpow2.f32 %v3458_v14 }
 0x250   : > { %v1550_v48 = vmul.f32 %v4201_v25, %v5557_v46  ;;  %v1770_v49 = vadd.f32 %v5408_v34, %v1737_v4  ;;  %v1129_v13 = vsel %vm5563_vm15, %v5450_v21, %v1125_v37  ;;  %vm5575_vm0 = vcmp.eq.f32.partialorder %v1145_v8, 8.507059e+37  ;;  %v5586_v60 = vld [vmem:[#allocation2 + $0xe1] sm:$0xff] }
 0x251   : > { %v1162_v56 = vand.u32 2147483648, %v5494_v43  ;;  %v2464_v61 = vadd.f32 %v2448_v30, %v2432_v26  ;;  %v2401_v55 = vadd.f32 %v5147_v5, %v2349_v54  ;;  %v2435_v24 = vadd.f32 %v2419_v33, %v2403_v45  ;;  %v7032_v5 = vld [vmem:[#allocation52_spill] sm:$0xff]  ;;  %v7033_v26 = vld [vmem:[#allocation47_spill] sm:$0xff] }
 0x252   : > { %v2534_v15 = vmul.f32 %v5551_v36, %v4199_v2  ;;  %v1566_v34 = vadd.f32 %v1550_v48, %v5349_v12  ;;  %v1787_v21 = vmul.f32 %v5176_v53, %v5559_v38  ;;  %v2289_v40 = vmul.f32 %v4185_v9, %v5557_v46  ;;  %v7034_v45 = vld [vmem:[#allocation51_spill] sm:$0xff] }
 0x253   : > { %v1139_v8 = vmul.f32 %v5511_v63, %v1138_v52  ;;  %v2467_v14 = vadd.f32 %v2451_v62, %v2435_v24  ;;  %v2518_v30 = vadd.f32 %v7032_v5, %v2466_v41  ;;  %v1134_v4 = vsel %vm5531_vm12, %v1133_v0, %v1129_v13  ;;  %v5610_v0 = vld [vmem:[%s6900_s5] ss:$0 sm:$0xff] }
 0x254   : > { %v1153_v37 = vsub.f32 1.0, %v1152_v6  ;;  %v1619_v54 = vadd.f32 %v7033_v26, %v1566_v34  ;;  %v1803_v12 = vadd.f32 %v1787_v21, %v1770_v49  ;;  %v5598_v57 = vadd.f32 %v2289_v40, %v5444_v23  ;;  %v7035_v23 = vld [vmem:[#allocation34_spill] sm:$0xff]  ;;  %v7036_v6 = vld [vmem:[#allocation36_spill] sm:$0xff] }
 0x255   : > { %vm1142_vm2 = vweird.f32 %v5511_v63  ;;  %v3741_v33 = vpop.eup %3740  ;;  %v2433_v39 = vadd.f32 %v7034_v45, %v2401_v55  ;;  %v2449_v52 = vmul.f32 %v2369_v3, %v4207_v32  ;;  %v2535_v62 = vmul.f32 %v5583_v28, %v4199_v2  ;;  %v7037_v49 = vld [vmem:[#allocation46_spill] sm:$0xff]  ;;  %v7038_v3 = vld [vmem:[#allocation24_spill] sm:$0xff] }
 0x256   : > { %v1669_v10 = vmul.f32 %v4207_v32, %v5586_v60  ;;  %v2519_v41 = vadd.f32 %v7035_v23, %v2467_v14  ;;  %v1652_v48 = vadd.f32 %v7036_v6, %v1619_v54  ;;  %v1349_v13 = vmul.f32 %v1134_v4, %v7037_v49  ;;  %vm1143_vm3 = vmor %vm1141_vm14, %vm1142_vm2  ;;  %v5670_v6 = vld [vmem:[#allocation2 + $0xe2] sm:$0xff] }
 0x257   : > { %v1140_v55 = vadd.f32 %v5511_v63, %v1139_v8  ;;  %v2516_v24 = vadd.f32 %v7038_v3, %v2464_v61  ;;  %v2550_v34 = vadd.f32 %v2534_v15, %v2518_v30  ;;  %v1154_v21 = vmul.f32 %v5541_v51, %v1153_v37  ;;  %v7039_v30 = vld [vmem:[#allocation55_spill] sm:$0xff] }
 0x258   : > { %vm1157_vm4 = vweird.f32 %v5541_v51  ;;  %v1685_v40 = vadd.f32 %v1669_v10, %v1652_v48  ;;  %1428 = vst.msk [vmem:[#allocation2 + $0xf1] sm:$0xff] %vm1363_vm1, %v1349_v13  ;;  %v5623_v5 = vadd.f32 1.0, %v3741_v33  ;;  %v1822_v4 = vmul.f32 %v5610_v0, %v1803_v12  ;;  %v7041_v33 = vld [vmem:[#allocation53_spill] sm:$0xff] }
 0x259   : > { %v1144_v14 = vsel %vm1143_vm3, %v5511_v63, %v1140_v55  ;;  %v2465_v8 = vadd.f32 %v2449_v52, %v2433_v39  ;;  %v1155_v35 = vadd.f32 %v5541_v51, %v1154_v21  ;;  %vm1156_vm5 = vweird.f32 %v5494_v43  ;;  %v5635_v63 = vld [vmem:[%s6901_s6] ss:$0 sm:$0xff]  ;;  %v7042_v43 = vld [vmem:[#allocation32_spill] sm:$0xff]  ;;  %v7046_v13 = vld [vmem:[#allocation41_spill] sm:$0xff] }
 0x25a   : > { %v1149_v61 = vsel %vm5575_vm0, %v1148_v7, %v1144_v14  ;;  %v2551_v15 = vadd.f32 %v2535_v62, %v2519_v41  ;;  %vm1158_vm6 = vmor %vm1156_vm5, %vm1157_vm4  ;;  %v1163_v26 = vor.u32 1.1754944e-38, %v1162_v56  ;;  %3742 = vrcp.f32 %v5623_v5  ;;  %v7043_v62 = vld [vmem:[#allocation56_spill] sm:$0xff] }
 0x25b   : > { %v1350_v37 = vmul.f32 %v1149_v61, %v7039_v30  ;;  %v2582_v54 = vadd.f32 %v5486_v16, %v2550_v34  ;;  %v1738_v7 = vadd.f32 %v7040_v27, %v1685_v40  ;;  %v1159_v12 = vsel %vm1158_vm6, %v5541_v51, %v1155_v35  ;;  %v7047_v34 = vld [vmem:[#allocation54_spill] sm:$0xff]  ;;  %v7048_v27 = vld [vmem:[#allocation31_spill] sm:$0xff] }
 0x25c   : > { %vm1161_vm7 = vcmp.eq.f32.partialorder %v1160_v58, 8.507059e+37  ;;  %v2548_v45 = vadd.f32 %v7041_v33, %v2516_v24  ;;  %v2564_v56 = vmul.f32 %v5176_v53, %v5551_v36  ;;  %v5647_v52 = vadd.f32 %v5635_v63, %v1822_v4  ;;  %v7044_v36 = vld [vmem:[#allocation19_spill] sm:$0xff] }
 0x25d   : > { %1429 = vst.msk [vmem:[#allocation2 + $0xf9] sm:$0xff] %vm1363_vm1, %v1350_v37  ;;  %v1164_v39 = vsel %vm1161_vm7, %v1163_v26, %v1159_v12  ;;  %v5651_v16 = vadd.f32 %v5421_v50, %v5440_v31  ;;  %v5655_v51 = vmul.f32 %v4197_v22, %v5394_v47  ;;  %v2517_v58 = vadd.f32 %v7042_v43, %v2465_v8  ;;  %v7045_v47 = vld [vmem:[#allocation4_spill] sm:$0xff] }
 0x25e   : > { %v1351_v10 = vmul.f32 %v1164_v39, %v7043_v62  ;;  %v5661_v23 = vadd.f32 %v7044_v36, %v5461_v44  ;;  %v5665_v41 = vadd.f32 %v5425_v42, %v5468_v20  ;;  %v2258_v50 = vmul.f32 %v4178_v1, %v5482_v19 }
 0x25f   : > { %v2583_v31 = vadd.f32 %v5529_v59, %v2551_v15  ;;  %v5674_v48 = vmul.f32 %v7045_v47, %v5504_v17  ;;  %v2404_v49 = vmul.f32 %v4193_v18, %v5504_v17  ;;  %v2598_v44 = vmul.f32 %v5610_v0, %v2582_v54  ;;  %v2240_v42 = vld [vmem:[#allocation2 + $0xf0] sm:$0xff] }
 0x260   : > { %v1771_v55 = vadd.f32 %v7046_v13, %v1738_v7  ;;  %1430 = vst.msk [vmem:[#allocation2 + $0x109] sm:$0xff] %vm1363_vm1, %v1351_v10  ;;  %v5681_v20 = vpop.eup %3742  ;;  %v2565_v19 = vmul.f32 %v5176_v53, %v5583_v28  ;;  %v5685_v59 = vadd.f32 %v2564_v56, %v2548_v45  ;;  %v2320_v3 = vmul.f32 %v2240_v42, %v4201_v25  ;;  %v2356_v15 = vld [vmem:[#allocation2 + $0xf1] sm:$0xff] }
 0x261   : > { %v3483_v24 = vmul.f32 -1.442695, %v5647_v52  ;;  %v2549_v17 = vadd.f32 %v7047_v34, %v2517_v58  ;;  %v1788_v21 = vmul.f32 %v5176_v53, %v5670_v6  ;;  %v2405_v40 = vmul.f32 %v4193_v18, %v5586_v60 }
 0x262   : > { %v1177_v14 = vand.u32 2147483648, %v5623_v5  ;;  %v2599_v4 = vmul.f32 %v5610_v0, %v2583_v31  ;;  %v5698_v28 = vmul.f32 %v4197_v22, %v5559_v38  ;;  %v2520_v8 = vmul.f32 %v4199_v2, %v5559_v38 }
 0x263   : > { %v2336_v61 = vadd.f32 %v2320_v3, %v5500_v11  ;;  %v1804_v35 = vadd.f32 %v1788_v21, %v1771_v55  ;;  %v1167_v53 = vmul.f32 %v5681_v20, %v5623_v5  ;;  %v1175_v37 = vand.u32 2147483647, %v5623_v5  ;;  %v7051_v55 = vld [vmem:[#allocation57_spill] sm:$0xff]  ;;  %v7052_v21 = vld [vmem:[#allocation58_spill] sm:$0xff] }
 0x264   : > { %v5703_v30 = vld [vmem:[#allocation2 + $0xf8] sm:$0xff]  ;;  %v5709_v26 = vadd.f32 %v5635_v63, %v2598_v44  ;;  %v2521_v54 = vmul.f32 %v4199_v2, %v5670_v6  ;;  %3744 = vpow2.f32 %v3483_v24  ;;  %v5716_v38 = vadd.f32 %v2565_v19, %v2549_v17 }
 0x265   : > { %v2388_v7 = vadd.f32 %v7048_v27, %v2336_v61  ;;  %v2321_v11 = vmul.f32 %v5703_v30, %v4201_v25  ;;  %v2290_v12 = vmul.f32 %v2240_v42, %v4185_v9  ;;  %vm1171_vm8 = vweird.f32 %v5623_v5  ;;  %v5722_v43 = vld [vmem:[#allocation2 + $0xf9] sm:$0xff] }
 0x266   : > { %v1178_v33 = vor.u32 1.1754944e-38, %v1177_v14  ;;  %v2436_v56 = vmul.f32 %v2356_v15, %v4207_v32  ;;  %v5725_v62 = vadd.f32 %v5635_v63, %v2599_v4  ;;  %v2260_v10 = vmul.f32 %v2240_v42, %v4178_v1 }
 0x267   : > { %v2420_v45 = vadd.f32 %v2404_v49, %v2388_v7  ;;  %v2337_v39 = vadd.f32 %v2321_v11, %v5598_v57  ;;  %v2242_v58 = vld [vmem:[#allocation2 + $0x108] sm:$0xff]  ;;  %v1168_v36 = vsub.f32 1.0, %v1167_v53  ;;  %vm5728_vm9 = vcmp.eq.f32.partialorder %v1175_v37, 8.507059e+37  ;;  %v3016_v11 = vld [vmem:[%s6902_s7 + $0x30] sm:$0xff] }
 0x268   : > { %v1823_v44 = vmul.f32 %v5610_v0, %v1804_v35  ;;  %v3499_v49 = vmul.f32 -1.442695, %v5709_v26  ;;  %v2262_v19 = vmul.f32 %v2242_v58, %v4178_v1  ;;  %v2292_v3 = vmul.f32 %v2242_v58, %v4185_v9  ;;  %v7053_v35 = vld [vmem:[#allocation9_spill] sm:$0xff]  ;;  %v2358_v37 = vld [vmem:[#allocation2 + $0x109] sm:$0xff] }
 0x269   : > { %v2452_v13 = vadd.f32 %v2436_v56, %v2420_v45  ;;  %v2389_v57 = vadd.f32 %v7051_v55, %v2337_v39  ;;  %v2306_v24 = vadd.f32 %v2290_v12, %v2258_v50  ;;  %v2437_v42 = vmul.f32 %v5722_v43, %v4207_v32  ;;  %v3017_v50 = vld [vmem:[%s6902_s7 + $0x38] sm:$0xff]  ;;  %v3062_v12 = vld [vmem:[%s6904_s9] sm:$0xf] }
 0x26a   : > { %v2322_v34 = vmul.f32 %v2242_v58, %v4201_v25  ;;  %vm1172_vm10 = vweird.f32 %v5681_v20  ;;  %v3745_v17 = vpop.eup %3744  ;;  %v2308_v61 = vadd.f32 %v2292_v3, %v2260_v10  ;;  %v2310_v53 = vadd.f32 %v7053_v35, %v2262_v19  ;;  %v7054_v58 = vld [vmem:[#allocation10_spill] sm:$0xff]  ;;  %3030 = vmatpush.msrb.mxu1 %v3017_v50 }
 0x26b   : > { %v2504_v14 = vadd.f32 %v7052_v21, %v2452_v13  ;;  %v2421_v4 = vadd.f32 %v2405_v40, %v2389_v57  ;;  %v1169_v7 = vmul.f32 %v5681_v20, %v1168_v36  ;;  %vm3068_vm11 = vcmask 1043456   ;;  %vm1173_vm12 = vmor %vm1171_vm8, %vm1172_vm10 }
 0x26c   : > { %v2338_v27 = vadd.f32 %v2322_v34, %v2306_v24  ;;  %v5754_v40 = vadd.f32 %v5635_v63, %v1823_v44  ;;  %v2406_v45 = vmul.f32 %v2356_v15, %v4193_v18  ;;  %v2340_v10 = vadd.f32 %v7054_v58, %v2308_v61  ;;  %3503 = vmatpush.msk.msrb.mxu2 %vm3068_vm11, %v3062_v12 }
 0x26d   : > { %v2453_v56 = vadd.f32 %v2437_v42, %v2421_v4  ;;  %v5757_v39 = vadd.f32 %v2520_v8, %v2504_v14  ;;  %v1170_v13 = vadd.f32 %v5681_v20, %v1169_v7  ;;  %v5763_v57 = vadd.f32 1.0, %v3745_v17  ;;  %3031 = vmatpush.msrb.mxu1 %v3016_v11  ;;  %v7056_v14 = vld [vmem:[#allocation40_spill] sm:$0xff]  ;;  %v7058_v7 = vld [vmem:[#allocation50_spill] sm:$0xff] }
 0x26e   : > { %v2390_v36 = vadd.f32 %v5674_v48, %v2338_v27  ;;  %v3484_v55 = vmul.f32 -1.442695, %v5754_v40  ;;  %v2376_v44 = vmul.f32 %v2356_v15, %v7045_v47  ;;  %v2438_v3 = vmul.f32 %v2358_v37, %v4207_v32  ;;  %v7055_v48 = vld [vmem:[#allocation26_spill] sm:$0xff]  ;;  %v2472_v11 = vld [vmem:[#allocation2 + $0xf2] sm:$0xff] }
 0x26f   : > { %v2505_v19 = vadd.f32 %v5655_v51, %v2453_v56  ;;  %3746 = vpow2.f32 %v3499_v49  ;;  %v2342_v8 = vadd.f32 %v7055_v48, %v2310_v53  ;;  %v1174_v42 = vsel %vm1173_vm12, %v5681_v20, %v1170_v13 }
 0x270   : > { %v2422_v24 = vadd.f32 %v2406_v45, %v2390_v36  ;;  %3748 = vpow2.f32 %v3484_v55  ;;  %v2392_v15 = vadd.f32 %v2376_v44, %v2340_v10  ;;  %v1179_v51 = vsel %vm5728_vm9, %v1178_v33, %v1174_v42  ;;  %v2473_v10 = vld [vmem:[#allocation2 + $0xfa] sm:$0xff]  ;;  %v7059_v36 = vld [vmem:[#allocation11_spill] sm:$0xff]  ;;  %v7060_v44 = vld [vmem:[#allocation12_spill] sm:$0xff] }
 0x271   : > { %v5774_v34 = vadd.f32 %v2521_v54, %v2505_v19  ;;  %v1820_v17 = vmul.f32 %v5610_v0, %v5651_v16  ;;  %v2378_v5 = vmul.f32 %v2358_v37, %v7045_v47  ;;  %v1352_v49 = vmul.f32 %v1179_v51, %v5517_v29 }
 0x272   : > { %v2454_v21 = vadd.f32 %v2438_v3, %v2422_v24  ;;  %3750 = vrcp.f32 %v5763_v57  ;;  %v5785_v20 = vadd.f32 %v7056_v14, %v5661_v23  ;;  %v2259_v54 = vmul.f32 %v4178_v1, %v5557_v46 }
 0x273   : > { %v2408_v31 = vmul.f32 %v2358_v37, %v4193_v18  ;;  %v1821_v33 = vmul.f32 %v5610_v0, %v5665_v41  ;;  %v2596_v16 = vmul.f32 %v5610_v0, %v5685_v59  ;;  %v2375_v29 = vmul.f32 %v7045_v47, %v5586_v60  ;;  %1431 = vst.msk [vmem:[#allocation2 + $0x111] sm:$0xff] %vm1363_vm1, %v1352_v49  ;;  %v7061_v49 = vld [vmem:[#allocation30_spill] sm:$0xff] }
 0x274   : > { %v2394_v4 = vadd.f32 %v2378_v5, %v2342_v8  ;;  %v2506_v61 = vadd.f32 %v5698_v28, %v2454_v21  ;;  %v2597_v46 = vmul.f32 %v5610_v0, %v5716_v38  ;;  %v5802_v35 = vmul.f32 %v4197_v22, %v5670_v6  ;;  %v7057_v28 = vld [vmem:[#allocation49_spill] sm:$0xff] }
 0x275   : > { %v3747_v23 = vpop.eup %3746  ;;  %v2424_v41 = vadd.f32 %v2408_v31, %v2392_v15  ;;  %v3500_v53 = vmul.f32 -1.442695, %v5725_v62  ;;  %v2291_v60 = vmul.f32 %v5703_v30, %v4185_v9  ;;  %v5808_v37 = vadd.f32 %v5635_v63, %v1820_v17 }
 0x276   : > { %v3749_v59 = vpop.eup %3748  ;;  %v1818_v27 = vmul.f32 %v5610_v0, %v7057_v28  ;;  %v5814_v38 = vmul.f32 %v5610_v0, %v7058_v7  ;;  %v2261_v6 = vmul.f32 %v5703_v30, %v4178_v1  ;;  %v5820_v50 = vmul.f32 %v5722_v43, %v7045_v47 }
 0x277   : > { %v5822_v12 = vadd.f32 1.0, %v3749_v59  ;;  %v5825_v45 = vadd.f32 %v5635_v63, %v1821_v33  ;;  %v2407_v58 = vmul.f32 %v5722_v43, %v4193_v18  ;;  %v2426_v13 = vadd.f32 %v7059_v36, %v2394_v4 }
 0x278   : > { %v5827_v56 = vpop.eup %3750  ;;  %v2126_v30 = vand.u32 2147483647, %v5763_v57  ;;  %v5833_v55 = vadd.f32 1.0, %v3747_v23  ;;  %v2456_v19 = vadd.f32 %v7060_v44, %v2424_v41  ;;  %v2128_v48 = vand.u32 2147483648, %v5763_v57  ;;  %v7064_v44 = vld [vmem:[#allocation15_spill] sm:$0xff] }
 0x279   : > { %v2118_v3 = vmul.f32 %v5827_v56, %v5763_v57  ;;  %3752 = vrcp.f32 %v5822_v12  ;;  %v2307_v8 = vadd.f32 %v2291_v60, %v2259_v54  ;;  %v2492_v24 = vmul.f32 %v2472_v11, %v4197_v22 }
 0x27a   : > { %3754 = vpow2.f32 %v3500_v53  ;;  %v3481_v43 = vmul.f32 -1.442695, %v5808_v37  ;;  %v5843_v42 = vmul.f32 %v2473_v10, %v4197_v22  ;;  %v2522_v15 = vmul.f32 %v2472_v11, %v4199_v2  ;;  %v2243_v17 = vld [vmem:[#allocation2 + $0x110] sm:$0xff] }
 0x27b   : > { %v5847_v51 = vmul.f32 %v2473_v10, %v4199_v2  ;;  %v3482_v5 = vmul.f32 -1.442695, %v5825_v45  ;;  %v2323_v21 = vmul.f32 %v2243_v17, %v4201_v25  ;;  %v5852_v14 = vadd.f32 %v7061_v49, %v2426_v13  ;;  %v2359_v60 = vld [vmem:[#allocation2 + $0x111] sm:$0xff] }
 0x27c   : > { %vm2122_vm13 = vweird.f32 %v5763_v57  ;;  %3756 = vrcp.f32 %v5833_v55  ;;  %v5856_v54 = vadd.f32 %v2492_v24, %v2456_v19  ;;  %v5858_v31 = vadd.f32 %v2522_v15, %v2506_v61 }
 0x27d   : > { %v2119_v33 = vsub.f32 1.0, %v2118_v3  ;;  %vm5860_vm14 = vcmp.eq.f32.partialorder %v2126_v30, 8.507059e+37  ;;  %v2129_v23 = vor.u32 1.1754944e-38, %v2128_v48  ;;  %v2263_v41 = vmul.f32 %v2243_v17, %v4178_v1 }
 0x27e   : > { %v2293_v25 = vmul.f32 %v2243_v17, %v4185_v9  ;;  %v2339_v53 = vadd.f32 %v2323_v21, %v2307_v8  ;;  %3758 = vpow2.f32 %v3481_v43  ;;  %v2899_v28 = vand.u32 2147483647, %v5833_v55 }
 0x27f   : > { %v5866_v59 = vpop.eup %3752  ;;  %v2901_v61 = vand.u32 2147483648, %v5833_v55  ;;  %3760 = vpow2.f32 %v3482_v5  ;;  %v5871_v7 = vadd.f32 %v5635_v63, %v2596_v16  ;;  %vm2123_vm15 = vweird.f32 %v5827_v56 }
 0x280   : > { %v3755_v11 = vpop.eup %3754  ;;  %v2391_v10 = vadd.f32 %v2375_v29, %v2339_v53  ;;  %v5875_v1 = vadd.f32 %v5635_v63, %v2597_v46  ;;  %v5878_v9 = vadd.f32 %v5635_v63, %v1818_v27  ;;  %v2120_v36 = vmul.f32 %v5827_v56, %v2119_v33  ;;  %vm2124_vm4 = vmor %vm2122_vm13, %vm2123_vm15  ;;  %v7067_v33 = vld [vmem:[#allocation16_spill] sm:$0xff] }
 0x281   : > { %v2133_v13 = vmul.f32 %v5866_v59, %v5822_v12  ;;  %vm2137_vm0 = vweird.f32 %v5822_v12  ;;  %v2141_v16 = vand.u32 2147483647, %v5822_v12  ;;  %v2309_v29 = vadd.f32 %v2293_v25, %v2261_v6  ;;  %v7068_v25 = vld [vmem:[#allocation33_spill] sm:$0xff] }
 0x282   : > { %v5885_v30 = vpop.eup %3756  ;;  %v2311_v19 = vadd.f32 %v7064_v44, %v2263_v41  ;;  %v2423_v3 = vadd.f32 %v2407_v58, %v2391_v10  ;;  %v2439_v46 = vmul.f32 %v2359_v60, %v4207_v32  ;;  %vm6917_vm2 = vcmask 519168  }
 0x283   : > { %v2121_v27 = vadd.f32 %v5827_v56, %v2120_v36  ;;  %v2134_v48 = vsub.f32 1.0, %v2133_v13  ;;  %v2143_v8 = vand.u32 2147483648, %v5822_v12  ;;  %v5891_v24 = vadd.f32 1.0, %v3755_v11  ;;  %v5922_v11 = vld [vmem:[#allocation2 + $0x10a] sm:$0xff] }
 0x284   : > { %vm2895_vm3 = vweird.f32 %v5833_v55  ;;  %v3759_v43 = vpop.eup %3758  ;;  %v2455_v15 = vadd.f32 %v2439_v46, %v2423_v3  ;;  %v2902_v6 = vor.u32 1.1754944e-38, %v2901_v61  ;;  %v3497_v32 = vmul.f32 -1.442695, %v5871_v7  ;;  %v3015_v61 = vld [vmem:[%s6902_s7 + $0x28] sm:$0xff] }
 0x285   : > { %v5901_v58 = vadd.f32 %v5635_v63, %v5814_v38  ;;  %v3761_v17 = vpop.eup %3760  ;;  %v2125_v5 = vsel %vm2124_vm4, %v5827_v56, %v2121_v27  ;;  %v2135_v21 = vmul.f32 %v5866_v59, %v2134_v48  ;;  %vm2138_vm5 = vweird.f32 %v5866_v59  ;;  %3032 = vmatpush.msrb.mxu1 %v3015_v61 }
 0x286   : > { %v2891_v49 = vmul.f32 %v5885_v30, %v5833_v55  ;;  %vm5908_vm6 = vcmp.eq.f32.partialorder %v2899_v28, 8.507059e+37  ;;  %v2341_v41 = vadd.f32 %v7067_v33, %v2309_v29  ;;  %v2343_v53 = vadd.f32 %v7068_v25, %v2311_v19  ;;  %v5924_v28 = vld [vmem:[#allocation2 + $0x112] sm:$0xff]  ;;  %vm2139_vm7 = vmor %vm2137_vm0, %vm2138_vm5 }
 0x287   : > { %v5915_v38 = vadd.f32 %v5802_v35, %v2455_v15  ;;  %v2130_v56 = vsel %vm5860_vm14, %v2129_v23, %v2125_v5  ;;  %v2136_v10 = vadd.f32 %v5866_v59, %v2135_v21  ;;  %3762 = vrcp.f32 %v5891_v24  ;;  %v7069_v23 = vld [vmem:[#allocation43_spill] sm:$0xff] }
 0x288   : > { %v5928_v36 = vmul.f32 %v2130_v56, %v5647_v52  ;;  %v2892_v13 = vsub.f32 1.0, %v2891_v49  ;;  %v2379_v35 = vmul.f32 %v2359_v60, %v7045_v47  ;;  %vm2142_vm8 = vcmp.eq.f32.partialorder %v2141_v16, 8.507059e+37 }
 0x289   : > { %v2144_v4 = vor.u32 1.1754944e-38, %v2143_v8  ;;  %v5938_v29 = vmul.f32 %v5610_v0, %v7069_v23  ;;  %v2140_v52 = vsel %vm2139_vm7, %v5866_v59, %v2136_v10  ;;  %vm2896_vm9 = vweird.f32 %v5885_v30 }
 0x28a   : > { %v2177_v44 = vpack.c.bf16 %v5928_v36, %v5928_v36  ;;  %v2893_v19 = vmul.f32 %v5885_v30, %v2892_v13  ;;  %v2409_v47 = vmul.f32 %v2359_v60, %v4193_v18  ;;  %v2494_v12 = vmul.f32 %v5922_v11, %v4197_v22  ;;  %vm2897_vm10 = vmor %vm2895_vm3, %vm2896_vm9 }
 0x28b   : > { %v5950_v16 = vmul.f32 %v5924_v28, %v4197_v22  ;;  %v2145_v3 = vsel %vm2142_vm8, %v2144_v4, %v2140_v52  ;;  %v2393_v46 = vadd.f32 %v5820_v50, %v2341_v41  ;;  %v2395_v59 = vadd.f32 %v2379_v35, %v2343_v53 }
 0x28c   : > { %v5954_v27 = vmul.f32 %v2145_v3, %v5754_v40  ;;  %2194 = vst.msk [vmem:[#allocation3 + $0x38] sm:$0xf] %vm6917_vm2, %v2177_v44  ;;  %v2894_v48 = vadd.f32 %v5885_v30, %v2893_v19  ;;  %v5960_v18 = vmul.f32 %v5922_v11, %v4199_v2  ;;  %v5964_v22 = vadd.f32 1.0, %v3759_v43 }
 0x28d   : > { %v5966_v60 = vadd.f32 1.0, %v3761_v17  ;;  %3764 = vpow2.f32 %v3497_v32  ;;  %v3763_v50 = vpop.eup %3762  ;;  %v5969_v40 = vadd.f32 %v2494_v12, %v5852_v14  ;;  %v5973_v8 = vmul.f32 %v5924_v28, %v4199_v2  ;;  %v7070_v17 = vld [vmem:[#allocation17_spill] sm:$0xff] }
 0x28e   : > { %v2178_v15 = vpack.c.bf16 %v5954_v27, %v5954_v27  ;;  %v2898_v5 = vsel %vm2897_vm10, %v5885_v30, %v2894_v48  ;;  %v2906_v43 = vmul.f32 %v3763_v50, %v5891_v24  ;;  %3766 = vrcp.f32 %v5964_v22 }
 0x28f   : > { %v2903_v55 = vsel %vm5908_vm6, %v2902_v6, %v2898_v5  ;;  %v3498_v32 = vmul.f32 -1.442695, %v5875_v1  ;;  %v5983_v14 = vadd.f32 %v2409_v47, %v2393_v46  ;;  %v5986_v21 = vadd.f32 %v7070_v17, %v2395_v59 }
 0x290   : > { %2195 = vst.msk [vmem:[#allocation3 + $0x3c] sm:$0xf] %vm6917_vm2, %v2178_v15  ;;  %v2914_v2 = vand.u32 2147483647, %v5891_v24  ;;  %v5991_v30 = vmul.f32 %v2903_v55, %v5709_v26  ;;  %v2907_v49 = vsub.f32 1.0, %v2906_v43  ;;  %vm2911_vm11 = vweird.f32 %v3763_v50  ;;  %v7078_v55 = vld [vmem:[#allocation42_spill] sm:$0xff] }
 0x291   : > { %v2916_v6 = vand.u32 2147483648, %v5891_v24  ;;  %3768 = vrcp.f32 %v5966_v60  ;;  %v2096_v33 = vand.u32 2147483647, %v5964_v22  ;;  %v2098_v41 = vand.u32 2147483648, %v5964_v22 }
 0x292   : > { %7071 = vst [vmem:[#allocation37_spill] sm:$0xff] %v5991_v30  ;;  %v2950_v57 = vpack.c.bf16 %v5991_v30, %v5991_v30  ;;  %v2111_v25 = vand.u32 2147483647, %v5966_v60  ;;  %v2908_v56 = vmul.f32 %v3763_v50, %v2907_v49  ;;  %v2113_v26 = vand.u32 2147483648, %v5966_v60 }
 0x293   : > { %v3765_v53 = vpop.eup %3764  ;;  %3770 = vpow2.f32 %v3498_v32  ;;  %v3479_v61 = vmul.f32 -1.442695, %v5878_v9  ;;  %vm2910_vm12 = vweird.f32 %v5891_v24  ;;  %vm6003_vm13 = vcmp.eq.f32.partialorder %v2914_v2, 8.507059e+37 }
 0x294   : > { %2967 = vst.msk [vmem:[#allocation3 + $0x78] sm:$0xf] %vm6917_vm2, %v2950_v57  ;;  %v6008_v13 = vadd.f32 1.0, %v3765_v53  ;;  %v3480_v35 = vmul.f32 -1.442695, %v5901_v58  ;;  %v3767_v4 = vpop.eup %3766  ;;  %v2909_v23 = vadd.f32 %v3763_v50, %v2908_v56  ;;  %v2917_v52 = vor.u32 1.1754944e-38, %v2916_v6  ;;  %vm2912_vm15 = vmor %vm2910_vm12, %vm2911_vm11 }
 0x295   : > { %vm2092_vm14 = vweird.f32 %v5964_v22  ;;  %3772 = vpow2.f32 %v3479_v61  ;;  %v2088_v24 = vmul.f32 %v3767_v4, %v5964_v22  ;;  %vm6014_vm0 = vcmp.eq.f32.partialorder %v2096_v33, 8.507059e+37  ;;  %v7080_v56 = vld [vmem:[#allocation44_spill] sm:$0xff] }
 0x296   : > { %vm2107_vm3 = vweird.f32 %v5966_v60  ;;  %3774 = vrcp.f32 %v6008_v13  ;;  %v2913_v12 = vsel %vm2912_vm15, %v3763_v50, %v2909_v23  ;;  %v2099_v3 = vor.u32 1.1754944e-38, %v2098_v41 }
 0x297   : > { %v3769_v19 = vpop.eup %3768  ;;  %v3586_v47 = vld [vmem:[#allocation3 + $0x38] sm:$0xff]  ;;  %v2114_v46 = vor.u32 1.1754944e-38, %v2113_v26  ;;  %3776 = vpow2.f32 %v3480_v35  ;;  %v2918_v59 = vsel %vm6003_vm13, %v2917_v52, %v2913_v12  ;;  %v2089_v48 = vsub.f32 1.0, %v2088_v24 }
 0x298   : > { %v2103_v15 = vmul.f32 %v3769_v19, %v5966_v60  ;;  %vm6023_vm4 = vcmp.eq.f32.partialorder %v2111_v25, 8.507059e+37  ;;  %v2594_v43 = vmul.f32 %v5610_v0, %v7078_v55  ;;  %v3278_v17 = vsel %vm1363_vm1, %v3586_v47, 0 }
 0x299   : > { %v3771_v32 = vpop.eup %3770  ;;  %v6031_v50 = vmul.f32 %v2918_v59, %v5725_v62  ;;  %v2869_v2 = vand.u32 2147483647, %v6008_v13  ;;  %v2871_v49 = vand.u32 2147483648, %v6008_v13  ;;  %3304 = vmatpush.bf16.xpose.msrb.mxu3 %v3278_v17  ;;  %v2090_v6 = vmul.f32 %v3767_v4, %v2089_v48  ;;  %v3014_v62 = vld [vmem:[%s6902_s7 + $0x20] sm:$0xff] }
 0x29a   : > { %vm2093_vm5 = vweird.f32 %v3767_v4  ;;  %v2104_v57 = vsub.f32 1.0, %v2103_v15  ;;  %v6035_v33 = vadd.f32 1.0, %v3771_v32  ;;  %vm2865_vm6 = vweird.f32 %v6008_v13  ;;  %3033 = vmatpush.msrb.mxu1 %v3014_v62 }
 0x29b   : > { %7079 = vst [vmem:[#allocation45_spill] sm:$0xff] %v6031_v50  ;;  %v3773_v41 = vpop.eup %3772  ;;  %v2951_v25 = vpack.c.bf16 %v6031_v50, %v6031_v50  ;;  %v2595_v53 = vmul.f32 %v5610_v0, %v5785_v20  ;;  %v1817_v26 = vmul.f32 %v5610_v0, %v7080_v56  ;;  %v2091_v10 = vadd.f32 %v3767_v4, %v2090_v6  ;;  %vm2094_vm8 = vmor %vm2092_vm14, %vm2093_vm5  ;;  %v6341_v50 = vld [vmem:[%s6901_s6] ss:$0 sm:$0xff] }
 0x29c   : > { %v3775_v61 = vpop.eup %3774  ;;  %v2105_v35 = vmul.f32 %v3769_v19, %v2104_v57  ;;  %vm2108_vm7 = vweird.f32 %v3769_v19  ;;  %3778 = vrcp.f32 %v6035_v33  ;;  %vm6053_vm9 = vcmp.eq.f32.partialorder %v2869_v2, 8.507059e+37 }
 0x29d   : > { %v3777_v23 = vpop.eup %3776  ;;  %2968 = vst.msk [vmem:[#allocation3 + $0x7c] sm:$0xf] %vm6917_vm2, %v2951_v25  ;;  %v2861_v52 = vmul.f32 %v3775_v61, %v6008_v13  ;;  %v2872_v24 = vor.u32 1.1754944e-38, %v2871_v49  ;;  %v6058_v47 = vadd.f32 %v5635_v63, %v2594_v43  ;;  %v2095_v12 = vsel %vm2094_vm8, %v3767_v4, %v2091_v10  ;;  %vm2109_vm10 = vmor %vm2107_vm3, %vm2108_vm7 }
 0x29e   : > { %v2106_v59 = vadd.f32 %v3769_v19, %v2105_v35  ;;  %v6060_v48 = vadd.f32 1.0, %v3773_v41  ;;  %v6062_v15 = vadd.f32 1.0, %v3777_v23  ;;  %v2100_v22 = vsel %vm6014_vm0, %v2099_v3, %v2095_v12 }
 0x29f   : > { %v2862_v55 = vsub.f32 1.0, %v2861_v52  ;;  %v2884_v32 = vand.u32 2147483647, %v6035_v33  ;;  %v6071_v17 = vadd.f32 %v5635_v63, %v2595_v53  ;;  %v6074_v4 = vmul.f32 %v2100_v22, %v5808_v37  ;;  %v7085_v52 = vld [vmem:[#allocation25_spill] sm:$0xff] }
 0x2a0   : > { %v2110_v43 = vsel %vm2109_vm10, %v3769_v19, %v2106_v59  ;;  %v2886_v2 = vand.u32 2147483648, %v6035_v33  ;;  %3780 = vrcp.f32 %v6060_v48  ;;  %vm2866_vm11 = vweird.f32 %v3775_v61 }
 0x2a1   : > { %v2115_v44 = vsel %vm6023_vm4, %v2114_v46, %v2110_v43  ;;  %v2863_v3 = vmul.f32 %v3775_v61, %v2862_v55  ;;  %v6082_v60 = vadd.f32 %v5635_v63, %v5938_v29  ;;  %v2175_v37 = vpack.c.bf16 %v6074_v4, %v6074_v4  ;;  %vm2867_vm13 = vmor %vm2865_vm6, %vm2866_vm11 }
 0x2a2   : > { %v3779_v49 = vpop.eup %3778  ;;  %v6085_v6 = vmul.f32 %v2115_v44, %v5825_v45  ;;  %3782 = vrcp.f32 %v6062_v15  ;;  %v6091_v19 = vadd.f32 %v5635_v63, %v1817_v26  ;;  %vm2880_vm12 = vweird.f32 %v6035_v33 }
 0x2a3   : > { %v2864_v5 = vadd.f32 %v3775_v61, %v2863_v3  ;;  %v2876_v46 = vmul.f32 %v3779_v49, %v6035_v33  ;;  %v2066_v29 = vand.u32 2147483647, %v6060_v48  ;;  %2192 = vst.msk [vmem:[#allocation3 + $0x30] sm:$0xf] %vm6917_vm2, %v2175_v37  ;;  %vm6101_vm14 = vcmp.eq.f32.partialorder %v2884_v32, 8.507059e+37 }
 0x2a4   : > { %v3594_v57 = vld [vmem:[#allocation3 + $0x78] sm:$0xff]  ;;  %v2176_v45 = vpack.c.bf16 %v6085_v6, %v6085_v6  ;;  %v2887_v25 = vor.u32 1.1754944e-38, %v2886_v2  ;;  %v2068_v62 = vand.u32 2147483648, %v6060_v48  ;;  %vm2881_vm15 = vweird.f32 %v3779_v49 }
 0x2a5   : > { %v2868_v53 = vsel %vm2867_vm13, %v3775_v61, %v2864_v5  ;;  %v2877_v56 = vsub.f32 1.0, %v2876_v46  ;;  %vm2062_vm0 = vweird.f32 %v6060_v48  ;;  %v3495_v26 = vmul.f32 -1.442695, %v6058_v47  ;;  %vm2882_vm5 = vmor %vm2880_vm12, %vm2881_vm15  ;;  %v7089_v5 = vld [vmem:[#allocation28_spill] sm:$0xff] }
 0x2a6   : > { %v3781_v10 = vpop.eup %3780  ;;  %v3302_v35 = vsel %vm1363_vm1, %v3594_v57, 0  ;;  %2193 = vst.msk [vmem:[#allocation3 + $0x34] sm:$0xf] %vm6917_vm2, %v2176_v45  ;;  %v2873_v13 = vsel %vm6053_vm9, %v2872_v24, %v2868_v53  ;;  %v3496_v23 = vmul.f32 -1.442695, %v6071_v17  ;;  %v2592_v12 = vmul.f32 %v5610_v0, %v7085_v52 }
 0x2a7   : > { %3318 = vmatpush.bf16.xpose.msra.mxu2 %v3302_v35  ;;  %v2878_v61 = vmul.f32 %v3779_v49, %v2877_v56  ;;  %v6116_v59 = vmul.f32 %v2873_v13, %v5871_v7  ;;  %v2058_v22 = vmul.f32 %v3781_v10, %v6060_v48  ;;  %vm6119_vm3 = vcmp.eq.f32.partialorder %v2066_v29, 8.507059e+37 }
 0x2a8   : > { %vm2077_vm4 = vweird.f32 %v6062_v15  ;;  %v2081_v20 = vand.u32 2147483647, %v6062_v15  ;;  %v3783_v24 = vpop.eup %3782  ;;  %v2083_v32 = vand.u32 2147483648, %v6062_v15  ;;  %3784 = vpow2.f32 %v3495_v26 }
 0x2a9   : > { %7086 = vst [vmem:[#allocation52_spill] sm:$0xff] %v6116_v59  ;;  %v3477_v43 = vmul.f32 -1.442695, %v6082_v60  ;;  %v3478_v2 = vmul.f32 -1.442695, %v6091_v19  ;;  %v2879_v7 = vadd.f32 %v3779_v49, %v2878_v61  ;;  %v2948_v44 = vpack.c.bf16 %v6116_v59, %v6116_v59 }
 0x2aa   : > { %v2059_v3 = vsub.f32 1.0, %v2058_v22  ;;  %v2073_v37 = vmul.f32 %v3783_v24, %v6062_v15  ;;  %vm2063_vm6 = vweird.f32 %v3781_v10  ;;  %3786 = vpow2.f32 %v3496_v23  ;;  %v7094_v15 = vld [vmem:[#allocation18_spill] sm:$0xff] }
 0x2ab   : > { %v2593_v46 = vmul.f32 %v5610_v0, %v7089_v5  ;;  %v6137_v29 = vadd.f32 %v5635_v63, %v2592_v12  ;;  %v2883_v57 = vsel %vm2882_vm5, %v3779_v49, %v2879_v7  ;;  %2965 = vst.msk [vmem:[#allocation3 + $0x70] sm:$0xf] %vm6917_vm2, %v2948_v44  ;;  %3788 = vpow2.f32 %v3477_v43  ;;  %vm2064_vm8 = vmor %vm2062_vm0, %vm2063_vm6  ;;  %v7093_v7 = vld [vmem:[#allocation27_spill] sm:$0xff] }
 0x2ac   : > { %v2060_v45 = vmul.f32 %v3781_v10, %v2059_v3  ;;  %v2074_v53 = vsub.f32 1.0, %v2073_v37  ;;  %v2888_v56 = vsel %vm6101_vm14, %v2887_v25, %v2883_v57  ;;  %3790 = vpow2.f32 %v3478_v2 }
 0x2ad   : > { %v6143_v33 = vadd.f32 %v5635_v63, %v2593_v46  ;;  %v3493_v26 = vmul.f32 -1.442695, %v6137_v29  ;;  %v3585_v35 = vld [vmem:[#allocation3 + $0x30] sm:$0xff]  ;;  %v6147_v13 = vmul.f32 %v2888_v56, %v5875_v1  ;;  %vm2078_vm7 = vweird.f32 %v3783_v24 }
 0x2ae   : > { %v2061_v23 = vadd.f32 %v3781_v10, %v2060_v45  ;;  %v2075_v49 = vmul.f32 %v3783_v24, %v2074_v53  ;;  %v3785_v52 = vpop.eup %3784  ;;  %v2069_v41 = vor.u32 1.1754944e-38, %v2068_v62  ;;  %vm6152_vm9 = vcmp.eq.f32.partialorder %v2081_v20, 8.507059e+37  ;;  %vm2079_vm10 = vmor %vm2077_vm4, %vm2078_vm7 }
 0x2af   : > { %7090 = vst [vmem:[#allocation47_spill] sm:$0xff] %v6147_v13  ;;  %3792 = vpow2.f32 %v3493_v26  ;;  %v3494_v12 = vmul.f32 -1.442695, %v6143_v33  ;;  %v3275_v61 = vsel %vm1363_vm1, %v3585_v35, 0  ;;  %v2949_v1 = vpack.c.bf16 %v6147_v13, %v6147_v13  ;;  %v6195_v26 = vld [vmem:[%s6899_s4 + $0x8] ss:$0 sm:$0xff] }
 0x2b0   : > { %v2065_v22 = vsel %vm2064_vm8, %v3781_v10, %v2061_v23  ;;  %v2076_v43 = vadd.f32 %v3783_v24, %v2075_v49  ;;  %v3787_v2 = vpop.eup %3786  ;;  %3305 = vmatpush.bf16.xpose.msrb.mxu3 %v3275_v61  ;;  %v2084_v62 = vor.u32 1.1754944e-38, %v2083_v32  ;;  %v6164_v20 = vadd.f32 1.0, %v3785_v52  ;;  %v7095_v32 = vld [vmem:[#allocation35_spill] sm:$0xff] }
 0x2b1   : > { %v2070_v48 = vsel %vm6119_vm3, %v2069_v41, %v2065_v22  ;;  %v1814_v44 = vmul.f32 %v5610_v0, %v7093_v7  ;;  %v3789_v3 = vpop.eup %3788  ;;  %2966 = vst.msk [vmem:[#allocation3 + $0x74] sm:$0xf] %vm6917_vm2, %v2949_v1  ;;  %v6172_v5 = vadd.f32 1.0, %v3787_v2  ;;  %3794 = vpow2.f32 %v3494_v12  ;;  %v7097_v1 = vld [vmem:[#allocation20_spill] sm:$0xff] }
 0x2b2   : > { %v2080_v37 = vsel %vm2079_vm10, %v3783_v24, %v2076_v43  ;;  %v6170_v10 = vmul.f32 %v2070_v48, %v5878_v9  ;;  %v3791_v55 = vpop.eup %3790  ;;  %v2457_v46 = vadd.f32 %v7094_v15, %v5983_v14  ;;  %v2459_v57 = vadd.f32 %v7095_v32, %v5986_v21  ;;  %v3013_v9 = vld [vmem:[%s6902_s7 + $0x18] sm:$0xff] }
 0x2b3   : > { %v2085_v45 = vsel %vm6152_vm9, %v2084_v62, %v2080_v37  ;;  %3796 = vrcp.f32 %v6164_v20  ;;  %3034 = vmatpush.msrb.mxu1 %v3013_v9  ;;  %v7096_v14 = vld [vmem:[#allocation29_spill] sm:$0xff]  ;;  %v6199_v35 = vmul.f32 %v6195_v26, %v5922_v11  ;;  %v2841_v23 = vand.u32 2147483648, %v6164_v20 }
 0x2b4   : > { %v6185_v24 = vmul.f32 %v2085_v45, %v5901_v58  ;;  %v2173_v53 = vpack.c.bf16 %v6170_v10, %v6170_v10  ;;  %3798 = vrcp.f32 %v6172_v5  ;;  %v1815_v21 = vmul.f32 %v5610_v0, %v7096_v14 }
 0x2b5   : > { %v3793_v56 = vpop.eup %3792  ;;  %v2839_v58 = vand.u32 2147483647, %v6164_v20  ;;  %v6204_v49 = vadd.f32 %v5635_v63, %v1814_v44  ;;  %v2856_v41 = vand.u32 2147483648, %v6172_v5  ;;  %v6210_v25 = vadd.f32 1.0, %v3789_v3 }
 0x2b6   : > { %v2174_v52 = vpack.c.bf16 %v6185_v24, %v6185_v24  ;;  %2190 = vst.msk [vmem:[#allocation3 + $0x28] sm:$0xf] %vm6917_vm2, %v2173_v53  ;;  %v6212_v12 = vadd.f32 1.0, %v3791_v55  ;;  %v6215_v11 = vadd.f32 %v5843_v42, %v2457_v46  ;;  %v6218_v61 = vadd.f32 %v5950_v16, %v2459_v57  ;;  %v7098_v42 = vld [vmem:[#allocation13_spill] sm:$0xff] }
 0x2b7   : > { %v6222_v22 = vadd.f32 %v7097_v1, %v5969_v40  ;;  %v2854_v43 = vand.u32 2147483647, %v6172_v5  ;;  %v3795_v2 = vpop.eup %3794  ;;  %3800 = vrcp.f32 %v6210_v25  ;;  %v6227_v48 = vadd.f32 1.0, %v3793_v56 }
 0x2b8   : > { %2191 = vst.msk [vmem:[#allocation3 + $0x2c] sm:$0xf] %vm6917_vm2, %v2174_v52  ;;  %v6230_v62 = vadd.f32 %v5635_v63, %v1815_v21  ;;  %v6234_v16 = vmul.f32 %v5610_v0, %v7098_v42  ;;  %v3593_v44 = vld [vmem:[#allocation3 + $0x70] sm:$0xff]  ;;  %vm2835_vm11 = vweird.f32 %v6164_v20  ;;  %vm2850_vm12 = vweird.f32 %v6172_v5 }
 0x2b9   : > { %v3797_v7 = vpop.eup %3796  ;;  %v2038_v40 = vand.u32 2147483648, %v6210_v25  ;;  %3802 = vrcp.f32 %v6212_v12  ;;  %vm6241_vm13 = vcmp.eq.f32.partialorder %v2839_v58, 8.507059e+37  ;;  %v2842_v55 = vor.u32 1.1754944e-38, %v2841_v23  ;;  %v3012_v23 = vld [vmem:[%s6902_s7 + $0x10] sm:$0xff] }
 0x2ba   : > { %v3799_v3 = vpop.eup %3798  ;;  %v2831_v37 = vmul.f32 %v3797_v7, %v6164_v20  ;;  %v2857_v0 = vor.u32 1.1754944e-38, %v2856_v41  ;;  %v3475_v15 = vmul.f32 -1.442695, %v6204_v49  ;;  %v3299_v46 = vsel %vm1363_vm1, %v3593_v44, 0  ;;  %3035 = vmatpush.msrb.mxu1 %v3012_v23 }
 0x2bb   : > { %v2846_v32 = vmul.f32 %v3799_v3, %v6172_v5  ;;  %vm6248_vm14 = vcmp.eq.f32.partialorder %v2854_v43, 8.507059e+37  ;;  %v2036_v45 = vand.u32 2147483647, %v6210_v25  ;;  %v2053_v9 = vand.u32 2147483648, %v6212_v12  ;;  %3319 = vmatpush.bf16.xpose.msra.mxu2 %v3299_v46 }
 0x2bc   : > { %v2832_v53 = vsub.f32 1.0, %v2831_v37  ;;  %v2051_v14 = vand.u32 2147483647, %v6212_v12  ;;  %v6255_v21 = vadd.f32 1.0, %v3795_v2  ;;  %3804 = vrcp.f32 %v6227_v48 }
 0x2bd   : > { %vm2836_vm15 = vweird.f32 %v3797_v7  ;;  %v2847_v56 = vsub.f32 1.0, %v2846_v32  ;;  %vm2032_vm0 = vweird.f32 %v6210_v25  ;;  %v2039_v58 = vor.u32 1.1754944e-38, %v2038_v40  ;;  %v3801_v52 = vpop.eup %3800 }
 0x2be   : > { %v2833_v41 = vmul.f32 %v3797_v7, %v2832_v53  ;;  %vm2851_vm3 = vweird.f32 %v3799_v3  ;;  %vm2047_vm4 = vweird.f32 %v6212_v12  ;;  %v2811_v1 = vand.u32 2147483648, %v6227_v48  ;;  %vm2837_vm8 = vmor %vm2835_vm11, %vm2836_vm15 }
 0x2bf   : > { %3806 = vrcp.f32 %v6255_v21  ;;  %v3803_v43 = vpop.eup %3802  ;;  %v3584_v2 = vld [vmem:[#allocation3 + $0x28] sm:$0xff]  ;;  %v2848_v42 = vmul.f32 %v3799_v3, %v2847_v56  ;;  %v2028_v44 = vmul.f32 %v3801_v52, %v6210_v25  ;;  %vm6266_vm5 = vcmp.eq.f32.partialorder %v2036_v45, 8.507059e+37  ;;  %vm2852_vm2 = vmor %vm2850_vm12, %vm2851_vm3 }
 0x2c0   : > { %v2054_v37 = vor.u32 1.1754944e-38, %v2053_v9  ;;  %v2809_v46 = vand.u32 2147483647, %v6227_v48  ;;  %v2834_v32 = vadd.f32 %v3797_v7, %v2833_v41  ;;  %vm2033_vm6 = vweird.f32 %v3801_v52 }
 0x2c1   : > { %v2043_v53 = vmul.f32 %v3803_v43, %v6212_v12  ;;  %vm6272_vm7 = vcmp.eq.f32.partialorder %v2051_v14, 8.507059e+37  ;;  %v3272_v56 = vsel %vm1363_vm1, %v3584_v2, 0  ;;  %v2849_v45 = vadd.f32 %v3799_v3, %v2848_v42 }
 0x2c2   : > { %v2029_v9 = vsub.f32 1.0, %v2028_v44  ;;  %vm2048_vm9 = vweird.f32 %v3803_v43  ;;  %vm2805_vm10 = vweird.f32 %v6227_v48  ;;  %v3805_v41 = vpop.eup %3804  ;;  %3306 = vmatpush.bf16.xpose.msrb.mxu3 %v3272_v56  ;;  %v2838_v30 = vsel %vm2837_vm8, %v3797_v7, %v2834_v32 }
 0x2c3   : > { %v2044_v14 = vsub.f32 1.0, %v2043_v53  ;;  %v2812_v23 = vor.u32 1.1754944e-38, %v2811_v1  ;;  %3808 = vpow2.f32 %v3475_v15  ;;  %v2843_v2 = vsel %vm6241_vm13, %v2842_v55, %v2838_v30 }
 0x2c4   : > { %v2853_v20 = vsel %vm2852_vm2, %v3799_v3, %v2849_v45  ;;  %v2030_v13 = vmul.f32 %v3801_v52, %v2029_v9  ;;  %v2801_v42 = vmul.f32 %v3805_v41, %v6227_v48  ;;  %vm6288_vm11 = vcmp.eq.f32.partialorder %v2809_v46, 8.507059e+37  ;;  %vm2034_vm2 = vmor %vm2032_vm0, %vm2033_vm6  ;;  %v6320_v9 = vld [vmem:[%s6900_s5] ss:$0 sm:$0xff] }
 0x2c5   : > { %vm2820_vm15 = vweird.f32 %v6255_v21  ;;  %v3807_v7 = vpop.eup %3806  ;;  %v2858_v5 = vsel %vm6248_vm14, %v2857_v0, %v2853_v20  ;;  %v6296_v1 = vmul.f32 %v2843_v2, %v6058_v47  ;;  %v2045_v15 = vmul.f32 %v3803_v43, %v2044_v14  ;;  %vm2049_vm14 = vmor %vm2047_vm4, %vm2048_vm9 }
 0x2c6   : > { %v2826_v30 = vand.u32 2147483648, %v6255_v21  ;;  %v6300_v3 = vmul.f32 %v2858_v5, %v6071_v17  ;;  %v2031_v63 = vadd.f32 %v3801_v52, %v2030_v13  ;;  %v2802_v55 = vsub.f32 1.0, %v2801_v42 }
 0x2c7   : > { %7109 = vst [vmem:[#allocation51_spill] sm:$0xff] %v6296_v1  ;;  %v2816_v46 = vmul.f32 %v3807_v7, %v6255_v21  ;;  %v2946_v32 = vpack.c.bf16 %v6296_v1, %v6296_v1  ;;  %v2046_v0 = vadd.f32 %v3803_v43, %v2045_v15  ;;  %vm2806_vm12 = vweird.f32 %v3805_v41 }
 0x2c8   : > { %7110 = vst [vmem:[#allocation34_spill] sm:$0xff] %v6300_v3  ;;  %vm2821_vm13 = vweird.f32 %v3807_v7  ;;  %v2947_v47 = vpack.c.bf16 %v6300_v3, %v6300_v3  ;;  %v2035_v57 = vsel %vm2034_vm2, %v3801_v52, %v2031_v63  ;;  %v2803_v17 = vmul.f32 %v3805_v41, %v2802_v55  ;;  %v7112_v52 = vld [vmem:[#allocation14_spill] sm:$0xff]  ;;  %vm2807_vm4 = vmor %vm2805_vm10, %vm2806_vm12  ;;  %v7114_v63 = vld [vmem:[#allocation21_spill] sm:$0xff] }
 0x2c9   : > { %v2817_v13 = vsub.f32 1.0, %v2816_v46  ;;  %v3809_v53 = vpop.eup %3808  ;;  %vm7111_vm3 = vcmask 519168   ;;  %v2040_v25 = vsel %vm6266_vm5, %v2039_v58, %v2035_v57  ;;  %v2050_v56 = vsel %vm2049_vm14, %v3803_v43, %v2046_v0  ;;  %vm2822_vm5 = vmor %vm2820_vm15, %vm2821_vm13  ;;  %v7118_v0 = vld [vmem:[#allocation7_spill] sm:$0xff] }
 0x2ca   : > { %2963 = vst.msk [vmem:[#allocation3 + $0x68] sm:$0xf] %vm7111_vm3, %v2946_v32  ;;  %v3476_v45 = vmul.f32 -1.442695, %v6230_v62  ;;  %v1813_v12 = vmul.f32 %v6320_v9, %v7112_v52  ;;  %vm7113_vm0 = vmmov %vm7111_vm3  ;;  %v2055_v14 = vsel %vm6272_vm7, %v2054_v37, %v2050_v56  ;;  %v6328_v2 = vmul.f32 %v2040_v25, %v6082_v60  ;;  %v7123_v56 = vld [vmem:[#allocation39_spill] sm:$0xff] }
 0x2cb   : > { %2964 = vst.msk [vmem:[#allocation3 + $0x6c] sm:$0xf] %vm7113_vm0, %v2947_v47  ;;  %v2804_v58 = vadd.f32 %v3805_v41, %v2803_v17  ;;  %v2818_v43 = vmul.f32 %v3807_v7, %v2817_v13  ;;  %v6331_v40 = vmul.f32 %v2055_v14, %v6091_v19  ;;  %v6336_v20 = vadd.f32 1.0, %v3809_v53  ;;  %vm7115_vm6 = vmmov %vm7113_vm0  ;;  %v7124_v14 = vld [vmem:[#allocation22_spill] sm:$0xff] }
 0x2cc   : > { %3810 = vpow2.f32 %v3476_v45  ;;  %v6345_v60 = vadd.f32 %v6341_v50, %v6234_v16  ;;  %v2171_v19 = vpack.c.bf16 %v6328_v2, %v6328_v2  ;;  %v6350_v48 = vadd.f32 %v6341_v50, %v1813_v12  ;;  %vm7117_vm8 = vmmov %vm7113_vm0 }
 0x2cd   : > { %v2808_v37 = vsel %vm2807_vm4, %v3805_v41, %v2804_v58  ;;  %v2819_v42 = vadd.f32 %v3807_v7, %v2818_v43  ;;  %v2172_v5 = vpack.c.bf16 %v6331_v40, %v6331_v40  ;;  %v2827_v16 = vor.u32 1.1754944e-38, %v2826_v30  ;;  %vm7121_vm9 = vmmov %vm7113_vm0 }
 0x2ce   : > { %v2813_v15 = vsel %vm6288_vm11, %v2812_v23, %v2808_v37  ;;  %3812 = vrcp.f32 %v6336_v20  ;;  %v2543_v41 = vadd.f32 %v7114_v63, %v6218_v61  ;;  %2188 = vst.msk [vmem:[#allocation3 + $0x20] sm:$0xf] %vm7115_vm6, %v2171_v19  ;;  %v7116_v46 = vand.u32 2147483647, %v6255_v21  ;;  %vm7125_vm10 = vmmov %vm7113_vm0 }
 0x2cf   : > { %v2823_v55 = vsel %vm2822_vm5, %v3807_v7, %v2819_v42  ;;  %v6366_v32 = vmul.f32 %v2813_v15, %v6137_v29  ;;  %2189 = vst.msk [vmem:[#allocation3 + $0x24] sm:$0xf] %vm7117_vm8, %v2172_v5  ;;  %v3473_v44 = vmul.f32 -1.442695, %v6345_v60  ;;  %v3474_v30 = vmul.f32 -1.442695, %v6350_v48  ;;  %vm7133_vm4 = vmmov %vm7115_vm6 }
 0x2d0   : > { %vm2825_vm7 = vcmp.eq.f32.partialorder %v7116_v46, 8.507059e+37  ;;  %v1810_v47 = vmul.f32 %v6320_v9, %v7118_v0  ;;  %v2540_v61 = vadd.f32 %v5960_v18, %v5856_v54  ;;  %v6377_v21 = vmul.f32 %v6195_v26, %v5924_v28  ;;  %v7120_v54 = vld [vmem:[#allocation8_spill] sm:$0xff] }
 0x2d1   : > { %v2828_v23 = vsel %vm2825_vm7, %v2827_v16, %v2823_v55  ;;  %v2944_v7 = vpack.c.bf16 %v6366_v32, %v6366_v32  ;;  %v2541_v17 = vadd.f32 %v5973_v8, %v6215_v11  ;;  %v6388_v13 = vadd.f32 %v6199_v35, %v5858_v31  ;;  %v7122_v35 = vld [vmem:[#allocation38_spill] sm:$0xff] }
 0x2d2   : > { %v6380_v29 = vmul.f32 %v2828_v23, %v6143_v33  ;;  %v3811_v57 = vpop.eup %3810  ;;  %v3592_v53 = vld [vmem:[#allocation3 + $0x68] sm:$0xff]  ;;  %3814 = vpow2.f32 %v3473_v44  ;;  %v1811_v28 = vmul.f32 %v6320_v9, %v7120_v54  ;;  %v6398_v25 = vadd.f32 %v6341_v50, %v1810_v47 }
 0x2d3   : > { %2961 = vst.msk [vmem:[#allocation3 + $0x60] sm:$0xf] %vm7121_vm9, %v2944_v7  ;;  %v6395_v33 = vadd.f32 1.0, %v3811_v57  ;;  %3816 = vpow2.f32 %v3474_v30  ;;  %v3296_v31 = vsel %vm1363_vm1, %v3592_v53, 0  ;;  %v2574_v11 = vadd.f32 %v7122_v35, %v6222_v22  ;;  %v7126_v22 = vld [vmem:[#allocation23_spill] sm:$0xff]  ;;  %v7129_v54 = vld [vmem:[#allocation5_spill] sm:$0xff] }
 0x2d4   : > { %7119 = vst [vmem:[#allocation36_spill] sm:$0xff] %v6380_v29  ;;  %v2945_v18 = vpack.c.bf16 %v6380_v29, %v6380_v29  ;;  %v3813_v8 = vpop.eup %3812  ;;  %v2575_v45 = vadd.f32 %v7123_v56, %v2543_v41  ;;  %v6405_v52 = vadd.f32 %v6341_v50, %v1811_v28  ;;  %v6409_v12 = vadd.f32 %v5847_v51, %v5915_v38 }
 0x2d5   : > { %v6412_v58 = vadd.f32 %v7124_v14, %v2540_v61  ;;  %3320 = vmatpush.bf16.xpose.msra.mxu2 %v3296_v31  ;;  %v1998_v43 = vmul.f32 %v3813_v8, %v6336_v20  ;;  %3818 = vrcp.f32 %v6395_v33  ;;  %v6418_v19 = vadd.f32 %v7126_v22, %v2541_v17  ;;  %v7130_v14 = vld [vmem:[#allocation6_spill] sm:$0xff] }
 0x2d6   : > { %2962 = vst.msk [vmem:[#allocation3 + $0x64] sm:$0xf] %vm7125_vm10, %v2945_v18  ;;  %v2006_v37 = vand.u32 2147483647, %v6336_v20  ;;  %v2590_v42 = vmul.f32 %v6320_v9, %v2574_v11  ;;  %v2591_v51 = vmul.f32 %v6320_v9, %v2575_v45  ;;  %v3583_v38 = vld [vmem:[#allocation3 + $0x20] sm:$0xff]  ;;  %vm2002_vm11 = vweird.f32 %v6336_v20 }
 0x2d7   : > { %v1999_v5 = vsub.f32 1.0, %v1998_v43  ;;  %v3471_v15 = vmul.f32 -1.442695, %v6398_v25  ;;  %v3472_v16 = vmul.f32 -1.442695, %v6405_v52  ;;  %vm2003_vm15 = vweird.f32 %v3813_v8 }
 0x2d8   : > { %v3815_v63 = vpop.eup %3814  ;;  %v2008_v41 = vand.u32 2147483648, %v6336_v20  ;;  %v6428_v55 = vadd.f32 %v6341_v50, %v2590_v42  ;;  %v6431_v46 = vadd.f32 %v6341_v50, %v2591_v51  ;;  %v3269_v44 = vsel %vm1363_vm1, %v3583_v38, 0  ;;  %vm2004_vm12 = vmor %vm2002_vm11, %vm2003_vm15 }
 0x2d9   : > { %v3817_v23 = vpop.eup %3816  ;;  %v2000_v30 = vmul.f32 %v3813_v8, %v1999_v5  ;;  %v6434_v0 = vadd.f32 1.0, %v3815_v63  ;;  %3820 = vpow2.f32 %v3471_v15  ;;  %3307 = vmatpush.bf16.xpose.msrb.mxu3 %v3269_v44  ;;  %vm6436_vm2 = vcmp.eq.f32.partialorder %v2006_v37, 8.507059e+37  ;;  %vm7138_vm11 = vmmov %vm7133_vm4 }
 0x2da   : > { %v3491_v61 = vmul.f32 -1.442695, %v6428_v55  ;;  %v3492_v7 = vmul.f32 -1.442695, %v6431_v46  ;;  %3822 = vpow2.f32 %v3472_v16  ;;  %v6442_v53 = vadd.f32 1.0, %v3817_v23 }
 0x2db   : > { %v3819_v57 = vpop.eup %3818  ;;  %v2001_v17 = vadd.f32 %v3813_v8, %v2000_v30  ;;  %3824 = vrcp.f32 %v6434_v0  ;;  %v1808_v28 = vmul.f32 %v6320_v9, %v7129_v54  ;;  %v2009_v31 = vor.u32 1.1754944e-38, %v2008_v41 }
 0x2dc   : > { %v2013_v35 = vmul.f32 %v3819_v57, %v6395_v33  ;;  %v2021_v11 = vand.u32 2147483647, %v6395_v33  ;;  %3826 = vpow2.f32 %v3491_v61  ;;  %v2023_v45 = vand.u32 2147483648, %v6395_v33 }
 0x2dd   : > { %v3591_v18 = vld [vmem:[#allocation3 + $0x60] sm:$0xff]  ;;  %v2005_v56 = vsel %vm2004_vm12, %v3813_v8, %v2001_v17  ;;  %3828 = vpow2.f32 %v3492_v7  ;;  %v6455_v43 = vmul.f32 %v6320_v9, %v7130_v14  ;;  %vm2017_vm13 = vweird.f32 %v6395_v33 }
 0x2de   : > { %v3293_v22 = vsel %vm1363_vm1, %v3591_v18, 0  ;;  %v2010_v20 = vsel %vm6436_vm2, %v2009_v31, %v2005_v56  ;;  %v2014_v37 = vsub.f32 1.0, %v2013_v35  ;;  %v1976_v8 = vand.u32 2147483647, %v6434_v0 }
 0x2df   : > { %v3821_v42 = vpop.eup %3820  ;;  %3321 = vmatpush.bf16.xpose.msra.mxu2 %v3293_v22  ;;  %v6462_v51 = vmul.f32 %v2010_v20, %v6204_v49  ;;  %3830 = vrcp.f32 %v6442_v53  ;;  %v6467_v38 = vadd.f32 %v6341_v50, %v1808_v28  ;;  %vm2018_vm14 = vweird.f32 %v3819_v57  ;;  %v3011_v22 = vld [vmem:[%s6902_s7 + $0x8] sm:$0xff] }
 0x2e0   : > { %v3823_v5 = vpop.eup %3822  ;;  %v2015_v15 = vmul.f32 %v3819_v57, %v2014_v37  ;;  %vm6469_vm3 = vcmp.eq.f32.partialorder %v2021_v11, 8.507059e+37  ;;  %v6473_v63 = vadd.f32 1.0, %v3821_v42  ;;  %v2024_v49 = vor.u32 1.1754944e-38, %v2023_v45  ;;  %vm2019_vm0 = vmor %vm2017_vm13, %vm2018_vm14  ;;  %3036 = vmatpush.msrb.mxu1 %v3011_v22 }
 0x2e1   : > { %v6475_v41 = vpop.eup %3824  ;;  %v2169_v23 = vpack.c.bf16 %v6462_v51, %v6462_v51  ;;  %v1978_v44 = vand.u32 2147483648, %v6434_v0  ;;  %v6480_v30 = vadd.f32 1.0, %v3823_v5  ;;  %v1993_v17 = vand.u32 2147483648, %v6442_v53 }
 0x2e2   : > { %v3827_v47 = vpop.eup %3826  ;;  %v2016_v61 = vadd.f32 %v3819_v57, %v2015_v15  ;;  %v1968_v7 = vmul.f32 %v6475_v41, %v6434_v0  ;;  %3832 = vrcp.f32 %v6473_v63  ;;  %vm1972_vm5 = vweird.f32 %v6434_v0 }
 0x2e3   : > { %v3829_v54 = vpop.eup %3828  ;;  %2186 = vst.msk [vmem:[#allocation3 + $0x18] sm:$0xf] %vm7133_vm4, %v2169_v23  ;;  %v6489_v28 = vadd.f32 1.0, %v3827_v47  ;;  %vm6492_vm6 = vcmp.eq.f32.partialorder %v1976_v8, 8.507059e+37  ;;  %v1991_v31 = vand.u32 2147483647, %v6442_v53  ;;  %3834 = vrcp.f32 %v6480_v30 }
 0x2e4   : > { %v2020_v35 = vsel %vm2019_vm0, %v3819_v57, %v2016_v61  ;;  %v6497_v11 = vadd.f32 1.0, %v3829_v54  ;;  %v1969_v56 = vsub.f32 1.0, %v1968_v7  ;;  %v1979_v14 = vor.u32 1.1754944e-38, %v1978_v44 }
 0x2e5   : > { %v6500_v33 = vpop.eup %3830  ;;  %v2025_v45 = vsel %vm6469_vm3, %v2024_v49, %v2020_v35  ;;  %3836 = vrcp.f32 %v6489_v28  ;;  %v6509_v20 = vmul.f32 -1.442695, %v6467_v38  ;;  %v2781_v37 = vand.u32 2147483648, %v6489_v28 }
 0x2e6   : > { %v6512_v57 = vmul.f32 %v2025_v45, %v6230_v62  ;;  %3838 = vrcp.f32 %v6497_v11  ;;  %vm1987_vm7 = vweird.f32 %v6442_v53  ;;  %v1994_v42 = vor.u32 1.1754944e-38, %v1993_v17 }
 0x2e7   : > { %v2796_v8 = vand.u32 2147483648, %v6497_v11  ;;  %v1970_v5 = vmul.f32 %v6475_v41, %v1969_v56  ;;  %vm1973_vm8 = vweird.f32 %v6475_v41  ;;  %v1946_v15 = vand.u32 2147483647, %v6473_v63 }
 0x2e8   : > { %v6521_v16 = vpop.eup %3832  ;;  %v2170_v62 = vpack.c.bf16 %v6512_v57, %v6512_v57  ;;  %v2779_v49 = vand.u32 2147483647, %v6489_v28  ;;  %v1983_v23 = vmul.f32 %v6500_v33, %v6442_v53  ;;  %vm6528_vm9 = vcmp.eq.f32.partialorder %v1991_v31, 8.507059e+37  ;;  %vm6548_vm2 = vmor %vm1972_vm5, %vm1973_vm8 }
 0x2e9   : > { %v1948_v47 = vand.u32 2147483648, %v6473_v63  ;;  %v6533_v61 = vor.u32 1.1754944e-38, %v2781_v37  ;;  %v2794_v7 = vand.u32 2147483647, %v6497_v11  ;;  %v1971_v17 = vadd.f32 %v6475_v41, %v1970_v5  ;;  %v6540_v35 = vpop.eup %3834 }
 0x2ea   : > { %v2588_v54 = vmul.f32 %v6320_v9, %v6412_v58  ;;  %vm1942_vm10 = vweird.f32 %v6473_v63  ;;  %2187 = vst.msk [vmem:[#allocation3 + $0x1c] sm:$0xf] %vm7138_vm11, %v2170_v62  ;;  %vm2775_vm15 = vweird.f32 %v6489_v28  ;;  %v1984_v56 = vsub.f32 1.0, %v1983_v23 }
 0x2eb   : > { %vm1988_vm12 = vweird.f32 %v6500_v33  ;;  %v2589_v58 = vmul.f32 %v6320_v9, %v6418_v19  ;;  %v1938_v45 = vmul.f32 %v6521_v16, %v6473_v63  ;;  %v3837_v22 = vpop.eup %3836  ;;  %vm2790_vm13 = vweird.f32 %v6497_v11 }
 0x2ec   : > { %v2797_v37 = vor.u32 1.1754944e-38, %v2796_v8  ;;  %v1975_v0 = vsel %vm6548_vm2, %v6475_v41, %v1971_v17  ;;  %v6562_v5 = vadd.f32 %v6341_v50, %v2588_v54  ;;  %vm1943_vm14 = vweird.f32 %v6521_v16  ;;  %v3839_v62 = vpop.eup %3838 }
 0x2ed   : > { %v2771_v23 = vmul.f32 %v3837_v22, %v6489_v28  ;;  %vm2776_vm3 = vweird.f32 %v3837_v22  ;;  %vm6566_vm0 = vcmp.eq.f32.partialorder %v2779_v49, 8.507059e+37  ;;  %v1980_v8 = vsel %vm6492_vm6, %v1979_v14, %v1975_v0  ;;  %vm1989_vm6 = vmor %vm1987_vm7, %vm1988_vm12 }
 0x2ee   : > { %v1985_v59 = vmul.f32 %v6500_v33, %v1984_v56  ;;  %vm6573_vm4 = vcmp.eq.f32.partialorder %v1946_v15, 8.507059e+37  ;;  %v2786_v17 = vmul.f32 %v3839_v62, %v6497_v11  ;;  %vm2791_vm5 = vweird.f32 %v3839_v62  ;;  %vm7147_vm7 = vmmov %vm7138_vm11 }
 0x2ef   : > { %vm6578_vm8 = vcmp.eq.f32.partialorder %v2794_v7, 8.507059e+37  ;;  %v6583_v49 = vmul.f32 %v1980_v8, %v6345_v60  ;;  %v6586_v31 = vadd.f32 %v6341_v50, %v2589_v58  ;;  %v2772_v18 = vsub.f32 1.0, %v2771_v23  ;;  %vm6612_vm11 = vmor %vm1942_vm10, %vm1943_vm14 }
 0x2f0   : > { %v1986_v14 = vadd.f32 %v6500_v33, %v1985_v59  ;;  %v3489_v15 = vmul.f32 -1.442695, %v6562_v5  ;;  %v1939_v56 = vsub.f32 1.0, %v1938_v45  ;;  %v2787_v0 = vsub.f32 1.0, %v2786_v17  ;;  %vm2792_vm10 = vmor %vm2790_vm13, %vm2791_vm5 }
 0x2f1   : > { %v2167_v7 = vpack.c.bf16 %v6583_v49, %v6583_v49  ;;  %v3490_v60 = vmul.f32 -1.442695, %v6586_v31  ;;  %v1953_v58 = vmul.f32 %v6540_v35, %v6480_v30  ;;  %v2773_v23 = vmul.f32 %v3837_v22, %v2772_v18  ;;  %v3582_v8 = vld [vmem:[#allocation3 + $0x18] sm:$0xff]  ;;  %vm7150_vm12 = vmmov %vm7147_vm7 }
 0x2f2   : > { %v1990_v59 = vsel %vm1989_vm6, %v6500_v33, %v1986_v14  ;;  %3840 = vpow2.f32 %v3489_v15  ;;  %v1940_v45 = vmul.f32 %v6521_v16, %v1939_v56  ;;  %v2788_v17 = vmul.f32 %v3839_v62, %v2787_v0  ;;  %vm7151_vm14 = vmmov %vm7147_vm7 }
 0x2f3   : > { %v1995_v53 = vsel %vm6528_vm9, %v1994_v42, %v1990_v59  ;;  %2184 = vst.msk [vmem:[#allocation3 + $0x10] sm:$0xf] %vm7147_vm7, %v2167_v7  ;;  %3842 = vpow2.f32 %v3490_v60  ;;  %v1954_v3 = vsub.f32 1.0, %v1953_v58  ;;  %v2774_v1 = vadd.f32 %v3837_v22, %v2773_v23  ;;  %vm2777_vm9 = vmor %vm2775_vm15, %vm2776_vm3 }
 0x2f4   : > { %v6605_v29 = vmul.f32 %v1995_v53, %v6350_v48  ;;  %v1941_v18 = vadd.f32 %v6521_v16, %v1940_v45  ;;  %v1949_v44 = vor.u32 1.1754944e-38, %v1948_v47  ;;  %v3266_v42 = vsel %vm1363_vm1, %v3582_v8, 0 }
 0x2f5   : > { %v2789_v14 = vadd.f32 %v3839_v62, %v2788_v17  ;;  %v1955_v48 = vmul.f32 %v6540_v35, %v1954_v3  ;;  %vm1957_vm2 = vweird.f32 %v6480_v30  ;;  %3308 = vmatpush.bf16.xpose.msrb.mxu3 %v3266_v42  ;;  %v2778_v15 = vsel %vm2777_vm9, %v3837_v22, %v2774_v1 }
 0x2f6   : > { %v2168_v63 = vpack.c.bf16 %v6605_v29, %v6605_v29  ;;  %v1945_v47 = vsel %vm6612_vm11, %v6521_v16, %v1941_v18  ;;  %vm1958_vm15 = vweird.f32 %v6540_v35  ;;  %v2783_v3 = vsel %vm6566_vm0, %v6533_v61, %v2778_v15  ;;  %vm7152_vm0 = vmmov %vm7147_vm7 }
 0x2f7   : > { %v2793_v28 = vsel %vm2792_vm10, %v3839_v62, %v2789_v14  ;;  %v1950_v1 = vsel %vm6573_vm4, %v1949_v44, %v1945_v47  ;;  %v1956_v11 = vadd.f32 %v6540_v35, %v1955_v48  ;;  %v6640_v0 = vmul.f32 %v2783_v3, %v6428_v55  ;;  %vm1959_vm13 = vmor %vm1957_vm2, %vm1958_vm15 }
 0x2f8   : > { %v3841_v22 = vpop.eup %3840  ;;  %v2798_v56 = vsel %vm6578_vm8, %v2797_v37, %v2793_v28  ;;  %2185 = vst.msk [vmem:[#allocation3 + $0x14] sm:$0xf] %vm7150_vm12, %v2168_v63  ;;  %v1961_v16 = vand.u32 2147483647, %v6480_v30  ;;  %v1963_v19 = vand.u32 2147483648, %v6480_v30  ;;  %v2571_v62 = vadd.f32 %v6377_v21, %v6409_v12  ;;  %vm7153_vm4 = vmmov %vm7152_vm0 }
 0x2f9   : > { %v3843_v61 = vpop.eup %3842  ;;  %v6648_v41 = vmul.f32 %v2798_v56, %v6431_v46  ;;  %v6650_v7 = vadd.f32 1.0, %v3841_v22  ;;  %v6657_v55 = vmul.f32 %v1950_v1, %v6398_v25  ;;  %v2942_v37 = vpack.c.bf16 %v6640_v0, %v6640_v0  ;;  %vm7154_vm5 = vmmov %vm7152_vm0 }
 0x2fa   : > { %v6661_v54 = vadd.f32 1.0, %v3843_v61  ;;  %v1960_v21 = vsel %vm1959_vm13, %v6540_v35, %v1956_v11  ;;  %3844 = vpow2.f32 %v6509_v20  ;;  %v1964_v46 = vor.u32 1.1754944e-38, %v1963_v19  ;;  %vm7155_vm12 = vmmov %vm7152_vm0 }
 0x2fb   : > { %v2943_v12 = vpack.c.bf16 %v6648_v41, %v6648_v41  ;;  %3846 = vrcp.f32 %v6650_v7  ;;  %v6670_v30 = vadd.f32 %v6341_v50, %v6455_v43  ;;  %2959 = vst.msk [vmem:[#allocation3 + $0x58] sm:$0xf] %vm7151_vm14, %v2942_v37  ;;  %vm1962_vm3 = vcmp.eq.f32.partialorder %v1961_v16, 8.507059e+37  ;;  %v3888_v16 = vld [vmem:[#allocation2 + $0xf2] sm:$0xff]  ;;  %vm7156_vm14 = vmmov %vm7152_vm0 }
 0x2fc   : > { %3848 = vrcp.f32 %v6661_v54  ;;  %v1965_v25 = vsel %vm1962_vm3, %v1964_v46, %v1960_v21  ;;  %v2165_v20 = vpack.c.bf16 %v6657_v55, %v6657_v55  ;;  %v2586_v43 = vmul.f32 %v6320_v9, %v6388_v13 }
 0x2fd   : > { %2960 = vst.msk [vmem:[#allocation3 + $0x5c] sm:$0xf] %vm7152_vm0, %v2943_v12  ;;  %v6678_v35 = vmul.f32 %v1965_v25, %v6405_v52  ;;  %v2587_v58 = vmul.f32 %v6320_v9, %v2571_v62  ;;  %v3470_v23 = vmul.f32 -1.442695, %v6670_v30  ;;  %v2749_v63 = vand.u32 2147483647, %v6650_v7 }
 0x2fe   : > { %2182 = vst.msk [vmem:[#allocation3 + $0x8] sm:$0xf] %vm7153_vm4, %v2165_v20  ;;  %v6689_v52 = vadd.f32 %v6341_v50, %v2586_v43  ;;  %v2751_v47 = vand.u32 2147483648, %v6650_v7  ;;  %v2764_v28 = vand.u32 2147483647, %v6661_v54  ;;  %v2766_v1 = vand.u32 2147483648, %v6661_v54 }
 0x2ff   : > { %v3581_v60 = vld [vmem:[#allocation3 + $0x10] sm:$0xff]  ;;  %v2166_v45 = vpack.c.bf16 %v6678_v35, %v6678_v35  ;;  %v6692_v53 = vadd.f32 %v6341_v50, %v2587_v58  ;;  %3850 = vpow2.f32 %v3470_v23  ;;  %v2552_v19 = vmul.f32 %v3888_v16, %v6195_v26 }
 0x300   : > { %v3845_v59 = vpop.eup %3844  ;;  %v3263_v17 = vsel %vm1363_vm1, %v3581_v60, 0  ;;  %v3487_v42 = vmul.f32 -1.442695, %v6689_v52  ;;  %v3889_v62 = vld [vmem:[#allocation2 + $0xfa] sm:$0xff]  ;;  %vm2745_vm7 = vweird.f32 %v6650_v7  ;;  %vm2750_vm9 = vcmp.eq.f32.partialorder %v2749_v63, 8.507059e+37 }
 0x301   : > { %v3847_v8 = vpop.eup %3846  ;;  %3309 = vmatpush.bf16.xpose.msrb.mxu3 %v3263_v17  ;;  %2183 = vst.msk [vmem:[#allocation3 + $0xc] sm:$0xf] %vm7154_vm5, %v2166_v45  ;;  %v6696_v33 = vadd.f32 1.0, %v3845_v59  ;;  %v3488_v14 = vmul.f32 -1.442695, %v6692_v53  ;;  %v2553_v37 = vmul.f32 %v3889_v62, %v6195_v26  ;;  %v2752_v46 = vor.u32 1.1754944e-38, %v2751_v47 }
 0x302   : > { %v3849_v18 = vpop.eup %3848  ;;  %v2741_v13 = vmul.f32 %v3847_v8, %v6650_v7  ;;  %vm2746_vm8 = vweird.f32 %v3847_v8  ;;  %vm2760_vm2 = vweird.f32 %v6661_v54  ;;  %vm2765_vm15 = vcmp.eq.f32.partialorder %v2764_v28, 8.507059e+37 }
 0x303   : > { %v2756_v44 = vmul.f32 %v3849_v18, %v6661_v54  ;;  %3852 = vrcp.f32 %v6696_v33  ;;  %vm2761_vm6 = vweird.f32 %v3849_v18  ;;  %vm2747_vm11 = vmor %vm2745_vm7, %vm2746_vm8  ;;  %v2767_v58 = vor.u32 1.1754944e-38, %v2766_v1 }
 0x304   : > { %v3590_v48 = vld [vmem:[#allocation3 + $0x58] sm:$0xff]  ;;  %v2742_v15 = vsub.f32 1.0, %v2741_v13  ;;  %3854 = vpow2.f32 %v3487_v42  ;;  %vm2762_vm10 = vmor %vm2760_vm2, %vm2761_vm6  ;;  %vm1912_vm3 = vweird.f32 %v6696_v33 }
 0x305   : > { %v2757_v3 = vsub.f32 1.0, %v2756_v44  ;;  %v3290_v11 = vsel %vm1363_vm1, %v3590_v48, 0  ;;  %3856 = vpow2.f32 %v3488_v14  ;;  %v3851_v56 = vpop.eup %3850  ;;  %v1918_v48 = vand.u32 2147483648, %v6696_v33  ;;  %vm7161_vm2 = vmmov %vm7155_vm12 }
 0x306   : > { %v2743_v22 = vmul.f32 %v3847_v8, %v2742_v15  ;;  %3322 = vmatpush.bf16.xpose.msra.mxu2 %v3290_v11  ;;  %v6710_v12 = vadd.f32 1.0, %v3851_v56  ;;  %v2568_v15 = vadd.f32 %v2552_v19, %v5757_v39 }
 0x307   : > { %v2758_v61 = vmul.f32 %v3849_v18, %v2757_v3 }
 0x308   : > { %v2744_v21 = vadd.f32 %v3847_v8, %v2743_v22  ;;  %v3580_v20 = vld [vmem:[#allocation3 + $0x8] sm:$0xff]  ;;  %3858 = vrcp.f32 %v6710_v12  ;;  %v1931_v47 = vand.u32 2147483647, %v6710_v12  ;;  %vm1927_vm4 = vweird.f32 %v6710_v12 }
 0x309   : > { %v2759_v25 = vadd.f32 %v3849_v18, %v2758_v61  ;;  %v3853_v60 = vpop.eup %3852  ;;  %v3260_v7 = vsel %vm1363_vm1, %v3580_v20, 0  ;;  %v2584_v16 = vmul.f32 %v6320_v9, %v2568_v15  ;;  %v1933_v61 = vand.u32 2147483648, %v6710_v12 }
 0x30a   : > { %v2748_v43 = vsel %vm2747_vm11, %v3847_v8, %v2744_v21  ;;  %v3855_v26 = vpop.eup %3854  ;;  %v1908_v45 = vmul.f32 %v3853_v60, %v6696_v33  ;;  %3310 = vmatpush.bf16.xpose.msrb.mxu3 %v3260_v7  ;;  %v1916_v8 = vand.u32 2147483647, %v6696_v33  ;;  %vm1913_vm13 = vweird.f32 %v3853_v60 }
 0x30b   : > { %v2753_v23 = vsel %vm2750_vm9, %v2752_v46, %v2748_v43  ;;  %v2763_v59 = vsel %vm2762_vm10, %v3849_v18, %v2759_v25  ;;  %v3857_v17 = vpop.eup %3856  ;;  %v6719_v54 = vadd.f32 1.0, %v3855_v26  ;;  %vm6749_vm5 = vcmp.eq.f32.partialorder %v1931_v47, 8.507059e+37  ;;  %vm1914_vm8 = vmor %vm1912_vm3, %vm1913_vm13 }
 0x30c   : > { %v2768_v13 = vsel %vm2765_vm15, %v2767_v58, %v2763_v59  ;;  %v6717_v44 = vmul.f32 %v2753_v23, %v6562_v5  ;;  %v6725_v14 = vadd.f32 1.0, %v3857_v17  ;;  %v1909_v18 = vsub.f32 1.0, %v1908_v45  ;;  %v3010_v5 = vld [vmem:[%s6902_s7] sm:$0xff] }
 0x30d   : > { %v6723_v42 = vmul.f32 %v2768_v13, %v6586_v31  ;;  %3860 = vrcp.f32 %v6719_v54  ;;  %v2569_v31 = vadd.f32 %v2553_v37, %v5774_v34  ;;  %3037 = vmatpush.msrb.mxu1 %v3010_v5  ;;  %vm6743_vm0 = vcmp.eq.f32.partialorder %v1916_v8, 8.507059e+37 }
 0x30e   : > { %v2940_v63 = vpack.c.bf16 %v6717_v44, %v6717_v44  ;;  %3862 = vrcp.f32 %v6725_v14  ;;  %v3859_v39 = vpop.eup %3858  ;;  %v1910_v28 = vmul.f32 %v3853_v60, %v1909_v18  ;;  %v1919_v34 = vor.u32 1.1754944e-38, %v1918_v48 }
 0x30f   : > { %v2941_v3 = vpack.c.bf16 %v6723_v42, %v6723_v42  ;;  %v1923_v11 = vmul.f32 %v3859_v39, %v6710_v12  ;;  %v2719_v19 = vand.u32 2147483647, %v6719_v54  ;;  %v2585_v62 = vmul.f32 %v6320_v9, %v2569_v31 }
 0x310   : > { %2957 = vst.msk [vmem:[#allocation3 + $0x50] sm:$0xf] %vm7155_vm12, %v2940_v63  ;;  %v1911_v22 = vadd.f32 %v3853_v60, %v1910_v28  ;;  %v2721_v21 = vand.u32 2147483648, %v6719_v54  ;;  %v2734_v46 = vand.u32 2147483647, %v6725_v14  ;;  %v6760_v20 = vadd.f32 %v6341_v50, %v2584_v16 }
 0x311   : > { %2958 = vst.msk [vmem:[#allocation3 + $0x54] sm:$0xf] %vm7156_vm14, %v2941_v3  ;;  %v1924_v33 = vsub.f32 1.0, %v1923_v11  ;;  %vm1928_vm6 = vweird.f32 %v3859_v39  ;;  %v2736_v9 = vand.u32 2147483648, %v6725_v14  ;;  %v6769_v45 = vadd.f32 %v6341_v50, %v2585_v62 }
 0x312   : > { %v1915_v25 = vsel %vm1914_vm8, %v3853_v60, %v1911_v22  ;;  %v1934_v13 = vor.u32 1.1754944e-38, %v1933_v61  ;;  %v3485_v8 = vmul.f32 -1.442695, %v6760_v20  ;;  %vm1929_vm11 = vmor %vm1927_vm4, %vm1928_vm6  ;;  %vm2715_vm10 = vweird.f32 %v6719_v54 }
 0x313   : > { %v3861_v37 = vpop.eup %3860  ;;  %v1920_v26 = vsel %vm6743_vm0, %v1919_v34, %v1915_v25  ;;  %v1925_v23 = vmul.f32 %v3859_v39, %v1924_v33  ;;  %v3486_v63 = vmul.f32 -1.442695, %v6769_v45  ;;  %vm2720_vm12 = vcmp.eq.f32.partialorder %v2719_v19, 8.507059e+37  ;;  %vm7162_vm0 = vmmov %vm7161_vm2 }
 0x314   : > { %v3863_v43 = vpop.eup %3862  ;;  %v2711_v58 = vmul.f32 %v3861_v37, %v6719_v54  ;;  %v2147_v7 = vmul.f32 %v1920_v26, %v6467_v38  ;;  %vm2716_vm7 = vweird.f32 %v3861_v37  ;;  %3864 = vpow2.f32 %v3485_v8  ;;  %vm7163_vm4 = vmmov %vm7162_vm0 }
 0x315   : > { %v2726_v59 = vmul.f32 %v3863_v43, %v6725_v14  ;;  %v1926_v17 = vadd.f32 %v3859_v39, %v1925_v23  ;;  %vm2731_vm9 = vweird.f32 %v3863_v43  ;;  %3866 = vpow2.f32 %v3486_v63  ;;  %vm2717_vm15 = vmor %vm2715_vm10, %vm2716_vm7 }
 0x316   : > { %v2712_v60 = vsub.f32 1.0, %v2711_v58  ;;  %v2163_v15 = vpack.c.bf16 %v2147_v7, %v2147_v7  ;;  %vm2730_vm13 = vweird.f32 %v6725_v14  ;;  %v2737_v34 = vor.u32 1.1754944e-38, %v2736_v9 }
 0x317   : > { %v2727_v48 = vsub.f32 1.0, %v2726_v59  ;;  %v1930_v38 = vsel %vm1929_vm11, %v3859_v39, %v1926_v17  ;;  %v2722_v39 = vor.u32 1.1754944e-38, %v2721_v21  ;;  %vm2732_vm14 = vmor %vm2730_vm13, %vm2731_vm9  ;;  %vm2735_vm3 = vcmp.eq.f32.partialorder %v2734_v46, 8.507059e+37 }
 0x318   : > { %v3589_v18 = vld [vmem:[#allocation3 + $0x50] sm:$0xff]  ;;  %v2713_v5 = vmul.f32 %v3861_v37, %v2712_v60  ;;  %v1935_v31 = vsel %vm6749_vm5, %v1934_v13, %v1930_v38  ;;  %2180 = vst.msk [vmem:[#allocation3] sm:$0xf] %vm7161_vm2, %v2163_v15  ;;  %v2196_v14 = vsel %vm1363_vm1, %v2147_v7, 0.0  ;;  %v2201_v46 = vsel %vm1363_vm1, %v6678_v35, 0.0  ;;  %vm7164_vm5 = vmmov %vm7162_vm0 }
 0x319   : > { %v3287_v50 = vsel %vm1363_vm1, %v3589_v18, 0  ;;  %v2728_v47 = vmul.f32 %v3863_v43, %v2727_v48  ;;  %v2148_v12 = vmul.f32 %v1935_v31, %v6670_v30  ;;  %v2199_v30 = vsel %vm1363_vm1, %v6657_v55, 0.0  ;;  %vm7166_vm13 = vmmov %vm7162_vm0 }
 0x31a   : > { %3323 = vmatpush.bf16.xpose.msra.mxu2 %v3287_v50  ;;  %v2714_v3 = vadd.f32 %v3861_v37, %v2713_v5  ;;  %v3865_v54 = vpop.eup %3864  ;;  %v2203_v58 = vsel %vm1363_vm1, %v6583_v49, 0.0  ;;  %v2205_v26 = vsel %vm1363_vm1, %v6605_v29, 0.0  ;;  %v2207_v35 = vsel %vm1363_vm1, %v6462_v51, 0.0 }
 0x31b   : > { %v2729_v28 = vadd.f32 %v3863_v43, %v2728_v47  ;;  %v2164_v11 = vpack.c.bf16 %v2148_v12, %v2148_v12  ;;  %v2197_v22 = vsel %vm1363_vm1, %v2148_v12, 0.0  ;;  %v3867_v61 = vpop.eup %3866  ;;  %v2664_v21 = vadd.f32 1.0, %v3865_v54 }
 0x31c   : > { %v2718_v1 = vsel %vm2717_vm15, %v3861_v37, %v2714_v3  ;;  %v2198_v37 = vadd.f32 %v2197_v22, %v2196_v14  ;;  %v2209_v49 = vsel %vm1363_vm1, %v6512_v57, 0.0 }
 0x31d   : > { %v2723_v56 = vsel %vm2720_vm12, %v2722_v39, %v2718_v1  ;;  %v2733_v16 = vsel %vm2732_vm14, %v3863_v43, %v2729_v28  ;;  %2181 = vst.msk [vmem:[#allocation3 + $0x4] sm:$0xf] %vm7162_vm0, %v2164_v11  ;;  %v2665_v43 = vadd.f32 1.0, %v3867_v61  ;;  %3868 = vrcp.f32 %v2664_v21  ;;  %vm7165_vm12 = vmmov %vm7162_vm0 }
 0x31e   : > { %v2738_v33 = vsel %vm2735_vm3, %v2737_v34, %v2733_v16  ;;  %v2922_v19 = vmul.f32 %v2723_v56, %v6689_v52  ;;  %v2200_v52 = vadd.f32 %v2199_v30, %v2198_v37  ;;  %v2689_v29 = vand.u32 2147483647, %v2664_v21 }
 0x31f   : > { %v6791_v62 = vmul.f32 %v2738_v33, %v6692_v53  ;;  %3870 = vrcp.f32 %v2665_v43  ;;  %v2691_v63 = vand.u32 2147483648, %v2664_v21  ;;  %v2706_v47 = vand.u32 2147483648, %v2665_v43 }
 0x320   : > { %v2938_v25 = vpack.c.bf16 %v2922_v19, %v2922_v19  ;;  %v2202_v53 = vadd.f32 %v2201_v46, %v2200_v52  ;;  %v2704_v3 = vand.u32 2147483647, %v2665_v43  ;;  %vm2685_vm7 = vweird.f32 %v2664_v21 }
 0x321   : > { %v2939_v55 = vpack.c.bf16 %v6791_v62, %v6791_v62  ;;  %v2692_v57 = vor.u32 1.1754944e-38, %v2691_v63  ;;  %vm2700_vm9 = vweird.f32 %v2665_v43  ;;  %vm2690_vm2 = vcmp.eq.f32.partialorder %v2689_v29, 8.507059e+37 }
 0x322   : > { %2955 = vst.msk [vmem:[#allocation3 + $0x48] sm:$0xf] %vm7163_vm4, %v2938_v25  ;;  %v2204_v59 = vadd.f32 %v2203_v58, %v2202_v53  ;;  %v2707_v1 = vor.u32 1.1754944e-38, %v2706_v47  ;;  %vm2705_vm15 = vcmp.eq.f32.partialorder %v2704_v3, 8.507059e+37  ;;  %v2972_v54 = vsel %vm1363_vm1, %v2922_v19, 0.0 }
 0x323   : > { %2956 = vst.msk [vmem:[#allocation3 + $0x4c] sm:$0xf] %vm7164_vm5, %v2939_v55  ;;  %v3869_v9 = vpop.eup %3868  ;;  %v2211_v37 = vsel %vm1363_vm1, %v6328_v2, 0.0  ;;  %v2217_v2 = vsel %vm1363_vm1, %v6185_v24, 0.0  ;;  %v2976_v52 = vsel %vm1363_vm1, %v6717_v44, 0.0  ;;  %v2980_v24 = vsel %vm1363_vm1, %v6640_v0, 0.0 }
 0x324   : > { %v3579_v23 = vld [vmem:[#allocation3] sm:$0xff]  ;;  %v2206_v60 = vadd.f32 %v2205_v26, %v2204_v59  ;;  %v2681_v13 = vmul.f32 %v3869_v9, %v2664_v21  ;;  %vm2686_vm8 = vweird.f32 %v3869_v9  ;;  %vm3064_vm5 = vcmask 31744  }
 0x325   : > { %v3257_v7 = vsel %vm1363_vm1, %v3579_v23, 0  ;;  %v3871_v17 = vpop.eup %3870  ;;  %vm2687_vm11 = vmor %vm2685_vm7, %vm2686_vm8 }
 0x326   : > { %3311 = vmatpush.bf16.xpose.msrb.mxu3 %v3257_v7  ;;  %v2696_v8 = vmul.f32 %v3871_v17, %v2665_v43  ;;  %v2208_v18 = vadd.f32 %v2207_v35, %v2206_v60  ;;  %v2682_v15 = vsub.f32 1.0, %v2681_v13  ;;  %vm2701_vm6 = vweird.f32 %v3871_v17 }
 0x327   : > { %vm2702_vm10 = vmor %vm2700_vm9, %vm2701_vm6  ;;  %v2215_v43 = vsel %vm1363_vm1, %v6170_v10, 0.0  ;;  %v2221_v10 = vsel %vm1363_vm1, %v6085_v6, 0.0  ;;  %v2984_v6 = vsel %vm1363_vm1, %v6366_v32, 0.0 }
 0x328   : > { %v2697_v5 = vsub.f32 1.0, %v2696_v8  ;;  %v2210_v38 = vadd.f32 %v2209_v49, %v2208_v18  ;;  %v2683_v50 = vmul.f32 %v3869_v9, %v2682_v15  ;;  %v7167_v49 = vld [vmem:[#allocation36_spill] sm:$0xff]  ;;  %v7168_v15 = vld [vmem:[#allocation51_spill] sm:$0xff] }
 0x329   : > { %v2986_v8 = vsel %vm1363_vm1, %v7167_v49, 0.0 }
 0x32a   : > { %v3588_v48 = vld [vmem:[#allocation3 + $0x48] sm:$0xff]  ;;  %v2698_v31 = vmul.f32 %v3871_v17, %v2697_v5  ;;  %v2684_v12 = vadd.f32 %v3869_v9, %v2683_v50  ;;  %v2212_v19 = vadd.f32 %v2211_v37, %v2210_v38  ;;  %v7171_v50 = vld [vmem:[#allocation47_spill] sm:$0xff] }
 0x32b   : > { %v3284_v51 = vsel %vm1363_vm1, %v3588_v48, 0  ;;  %v2994_v47 = vsel %vm1363_vm1, %v7171_v50, 0.0 }
 0x32c   : > { %3324 = vmatpush.bf16.xpose.msra.mxu2 %v3284_v51  ;;  %v2699_v39 = vadd.f32 %v3871_v17, %v2698_v31  ;;  %v2688_v28 = vsel %vm2687_vm11, %v3869_v9, %v2684_v12  ;;  %v7172_v12 = vld [vmem:[#allocation37_spill] sm:$0xff] }
 0x32d   : > { %v2693_v34 = vsel %vm2690_vm2, %v2692_v57, %v2688_v28  ;;  %v2996_v57 = vsel %vm1363_vm1, %v7172_v12, 0.0  ;;  %v7173_v28 = vld [vmem:[#allocation45_spill] sm:$0xff] }
 0x32e   : > { %v2703_v11 = vsel %vm2702_vm10, %v3871_v17, %v2699_v39  ;;  %v2920_v56 = vmul.f32 %v2693_v34, %v6760_v20  ;;  %v2213_v20 = vsel %vm1363_vm1, %v6331_v40, 0.0  ;;  %v2219_v40 = vsel %vm1363_vm1, %v6074_v4, 0.0 }
 0x32f   : > { %v2708_v22 = vsel %vm2705_vm15, %v2707_v1, %v2703_v11  ;;  %v2214_v46 = vadd.f32 %v2213_v20, %v2212_v19  ;;  %v2223_v4 = vsel %vm1363_vm1, %v5928_v36, 0.0  ;;  %v2225_v17 = vsel %vm1363_vm1, %v5954_v27, 0.0  ;;  %v7170_v27 = vld [vmem:[#allocation52_spill] sm:$0xff] }
 0x330   : > { %v2921_v16 = vmul.f32 %v2708_v22, %v6769_v45  ;;  %v2936_v30 = vpack.c.bf16 %v2920_v56, %v2920_v56  ;;  %v2969_v14 = vsel %vm1363_vm1, %v2920_v56, 0.0  ;;  %v2974_v45 = vsel %vm1363_vm1, %v6791_v62, 0.0 }
 0x331   : > { %v2216_v58 = vadd.f32 %v2215_v43, %v2214_v46  ;;  %v2978_v62 = vsel %vm1363_vm1, %v6723_v42, 0.0  ;;  %v2982_v42 = vsel %vm1363_vm1, %v6648_v41, 0.0  ;;  %v2988_v36 = vsel %vm1363_vm1, %v7168_v15, 0.0  ;;  %v7169_v41 = vld [vmem:[#allocation34_spill] sm:$0xff]  ;;  %v3115_v43 = vld [vmem:[%s6907_s12 + $0x8] sm:$0xff] }
 0x332   : > { %v2937_v33 = vpack.c.bf16 %v2921_v16, %v2921_v16  ;;  %v2970_v61 = vsel %vm1363_vm1, %v2921_v16, 0.0  ;;  %2953 = vst.msk [vmem:[#allocation3 + $0x40] sm:$0xf] %vm7165_vm12, %v2936_v30  ;;  %v2990_v63 = vsel %vm1363_vm1, %v7169_v41, 0.0  ;;  %v2992_v51 = vsel %vm1363_vm1, %v7170_v27, 0.0  ;;  %v3114_v46 = vld [vmem:[%s6907_s12] sm:$0xff] }
 0x333   : > { %v2971_v21 = vadd.f32 %v2970_v61, %v2969_v14  ;;  %v2218_v23 = vadd.f32 %v2217_v2, %v2216_v58  ;;  %v2998_v1 = vsel %vm1363_vm1, %v7173_v28, 0.0  ;;  %v3007_v27 = vld [vmem:[%s6906_s11] sm:$0xff] }
 0x334   : > { %2954 = vst.msk [vmem:[#allocation3 + $0x44] sm:$0xf] %vm7166_vm13, %v2937_v33 }
 0x335   : > { %v2973_v25 = vadd.f32 %v2972_v54, %v2971_v21  ;;  %v2220_v44 = vadd.f32 %v2219_v40, %v2218_v23 }
 0x337   : > { %v2975_v55 = vadd.f32 %v2974_v45, %v2973_v25  ;;  %v2222_v7 = vadd.f32 %v2221_v10, %v2220_v44  ;;  %v3018_v45 = vld [vmem:[%s6903_s8] sm:$0x1] }
 0x339   : > { %v2977_v53 = vadd.f32 %v2976_v52, %v2975_v55  ;;  %v2224_v0 = vadd.f32 %v2223_v4, %v2222_v7  ;;  %v3899_v55 = vmov 0   ;;  %v3161_v52 = vld [vmem:[%s6908_s13] sm:$0xff] }
 0x33a   : > { %3609 = vset.pattern.permute.xlu1 %v3899_v55  ;;  %3608 = vset.pattern.permute.xlu0 %v3899_v55 }
 0x33b   : > { %v3587_v26 = vld [vmem:[#allocation3 + $0x40] sm:$0xff]  ;;  %v2979_v59 = vadd.f32 %v2978_v62, %v2977_v53  ;;  %v2226_v18 = vadd.f32 %v2225_v17, %v2224_v0  ;;  %3123 = vperm.xlu1 %3609, %v3115_v43   ;;  %3118 = vperm.xlu0 %3608, %v3114_v46  }
 0x33c   : > { %v3281_v35 = vsel %vm1363_vm1, %v3587_v26, 0  ;;  %3610 = vset.pattern.permute.xlu2 %v3899_v55 }
 0x33d   : > { %v2981_v9 = vadd.f32 %v2980_v24, %v2979_v59  ;;  %3325 = vmatpush.bf16.xpose.msra.mxu2 %v3281_v35  ;;  %v2227_v5 = vrot.slane %v2226_v18, 4 }
 0x33f   : > { %v2983_v60 = vadd.f32 %v2982_v42, %v2981_v9  ;;  %v2228_v31 = vadd.f32 %v2227_v5, %v2226_v18  ;;  %v3063_v42 = vld [vmem:[%s6905_s10] sm:$0x1]  ;;  %v3008_v5 = vld [vmem:[%s6906_s11 + $0x8] sm:$0xff] }
 0x341   : > { %v2985_v13 = vadd.f32 %v2984_v6, %v2983_v60  ;;  %v2229_v34 = vrot.slane %v2228_v31, 2  ;;  %v3162_v6 = vld [vmem:[%s6908_s13 + $0x8] sm:$0xff] }
 0x342   : > { %3170 = vperm.xlu2 %3610, %v3162_v6  }
 0x343   : > { %v2987_v48 = vadd.f32 %v2986_v8, %v2985_v13  ;;  %v2230_v56 = vadd.f32 %v2229_v34, %v2228_v31  ;;  %3165 = vperm.xlu1 %3609, %v3161_v52  }
 0x345   : > { %v2989_v29 = vadd.f32 %v2988_v36, %v2987_v48  ;;  %v2231_v30 = vrot.slane %v2230_v56, 1 }
 0x347   : > { %v2991_v38 = vadd.f32 %v2990_v63, %v2989_v29  ;;  %v2232_v61 = vadd.f32 %v2231_v30, %v2230_v56 }
 0x349   : > { %v2993_v32 = vadd.f32 %v2992_v51, %v2991_v38 }
 0x34b   : > { %v2995_v3 = vadd.f32 %v2994_v47, %v2993_v32 }
 0x34d   : > { %v2997_v39 = vadd.f32 %v2996_v57, %v2995_v3 }
 0x34f   : > { %v2999_v11 = vadd.f32 %v2998_v1, %v2997_v39  ;;  %v469_v39 = vld [vmem:[%s3992_s20] sm:$0xff] }
 0x350   : > { %v3332_v1 = vunpack.c.l.bf16 %v469_v39  ;;  %v3333_v34 = vunpack.c.h.bf16 %v469_v39 }
 0x351   : > { %v3000_v22 = vrot.slane %v2999_v11, 4 }
 0x353   : > { %v3001_v16 = vadd.f32 %v3000_v22, %v2999_v11 }
 0x355   : > { %v3002_v54 = vrot.slane %v3001_v16, 2 }
 0x357   : > { %v3003_v33 = vadd.f32 %v3002_v54, %v3001_v16 }
 0x359   : > { %v3004_v14 = vrot.slane %v3003_v33, 1 }
 0x35b   : > { %v3005_v37 = vadd.f32 %v3004_v14, %v3003_v33  ;;  %v470_v33 = vld [vmem:[%s3992_s20 + $0x8] sm:$0xff] }
 0x35d   : > { %v3006_v21 = vadd.f32 %v3005_v37, %v2232_v61  ;;  %v3334_v61 = vunpack.c.l.bf16 %v470_v33  ;;  %v3335_v37 = vunpack.c.h.bf16 %v470_v33 }
 0x35f   : > { %v3009_v20 = vmul.f32 0.00390625, %v3006_v21 }
 0x361   : > { %3501 = vmatmul.msk.f32.vlgmr.msrb.gmra.mxu1 %vm1363_vm1, %v3009_v20 }
 0x39c   : > { %v3171_v14 = vpop.permute.xlu2 %3170 }
 0x3ad   : > { %v3119_v32 = vpop.permute.xlu0 %3118  ;;  %v3124_v31 = vpop.permute.xlu1 %3123 }
 0x3b5   : > { %v3166_v28 = vpop.permute.xlu1 %3165 }
 0x3de   : > { %v3039_v19 = vpop.f32.mrf.mxu1 }
 0x3df   : > { %v3040_v25 = vadd.f32 %v3039_v19, %v3018_v45 }
 0x3e1   : > { %v3502_v2 = vmul.f32 -1.442695, %v3040_v25 }
 0x3e3   : > { %3872 = vpow2.f32 %v3502_v2 }
 0x3e9   : > { %v3873_v58 = vpop.eup %3872 }
 0x3ea   : > { %v3045_v53 = vadd.f32 1.0, %v3873_v58 }
 0x3ec   : > { %3874 = vrcp.f32 %v3045_v53  ;;  %v3057_v23 = vand.u32 2147483648, %v3045_v53  ;;  %v3055_v10 = vand.u32 2147483647, %v3045_v53  ;;  %vm3051_vm3 = vweird.f32 %v3045_v53 }
 0x3ee   : > { %v3058_v35 = vor.u32 1.1754944e-38, %v3057_v23  ;;  %vm3056_vm4 = vcmp.eq.f32.partialorder %v3055_v10, 8.507059e+37 }
 0x3f2   : > { %v3875_v40 = vpop.eup %3874 }
 0x3f3   : > { %v3047_v62 = vmul.f32 %v3875_v40, %v3045_v53  ;;  %vm3052_vm14 = vweird.f32 %v3875_v40 }
 0x3f4   : > { %vm3053_vm0 = vmor %vm3051_vm3, %vm3052_vm14 }
 0x3f5   : > { %v3048_v26 = vsub.f32 1.0, %v3047_v62 }
 0x3f7   : > { %v3049_v59 = vmul.f32 %v3875_v40, %v3048_v26 }
 0x3f9   : > { %v3050_v24 = vadd.f32 %v3875_v40, %v3049_v59 }
 0x3fb   : > { %v3054_v44 = vsel %vm3053_vm0, %v3875_v40, %v3050_v24 }
 0x3fc   : > { %v3059_v9 = vsel %vm3056_vm4, %v3058_v35, %v3054_v44 }
 0x3fd   : > { %v3061_v4 = vmul.f32 %v3059_v9, %v3040_v25 }
 0x3ff   : > { %3504 = vmatmul.msk.f32.vlgmr.msrb.gmra.mxu2 %vm3064_vm5, %v3061_v4 }
 0x482   : > { %v3089_v7 = vpop.f32.mrf.mxu2 }
 0x483   : > { %v3090_v60 = vadd.f32 %v3089_v7, %v3063_v42 }
 0x485   : > { %v3505_v17 = vmul.f32 -1.442695, %v3090_v60 }
 0x487   : > { %3876 = vpow2.f32 %v3505_v17 }
 0x48d   : > { %v3877_v0 = vpop.eup %3876 }
 0x48e   : > { %v3095_v13 = vadd.f32 1.0, %v3877_v0 }
 0x490   : > { %3878 = vrcp.f32 %v3095_v13  ;;  %v3107_v48 = vand.u32 2147483648, %v3095_v13  ;;  %v3105_v36 = vand.u32 2147483647, %v3095_v13  ;;  %vm3101_vm6 = vweird.f32 %v3095_v13 }
 0x492   : > { %v3108_v41 = vor.u32 1.1754944e-38, %v3107_v48  ;;  %vm3106_vm11 = vcmp.eq.f32.partialorder %v3105_v36, 8.507059e+37 }
 0x496   : > { %v3879_v49 = vpop.eup %3878 }
 0x497   : > { %v3097_v8 = vmul.f32 %v3879_v49, %v3095_v13  ;;  %vm3102_vm8 = vweird.f32 %v3879_v49 }
 0x498   : > { %vm3103_vm7 = vmor %vm3101_vm6, %vm3102_vm8 }
 0x499   : > { %v3098_v18 = vsub.f32 1.0, %v3097_v8 }
 0x49b   : > { %v3099_v15 = vmul.f32 %v3879_v49, %v3098_v18 }
 0x49d   : > { %v3100_v29 = vadd.f32 %v3879_v49, %v3099_v15 }
 0x49f   : > { %v3104_v63 = vsel %vm3103_vm7, %v3879_v49, %v3100_v29 }
 0x4a0   : > { %v3109_v38 = vsel %vm3106_vm11, %v3108_v41, %v3104_v63 }
 0x4a1   : > { %v3111_v51 = vperm.slane %v3109_v38, 0 }
 0x4a3   : > { %v3113_v50 = vmul.f32 %v3111_v51, %v3008_v5  ;;  %v3112_v47 = vmul.f32 %v3111_v51, %v3007_v27 }
 0x4a5   : > { %v3127_v3 = vmul.f32 %v3124_v31, %v3113_v50  ;;  %v3126_v12 = vmul.f32 %v3119_v32, %v3112_v47 }
 0x4a7   : > { %v3128_v57 = vpack.c.bf16 %v3127_v3, %v3126_v12 }
 0x4a9   : > { %3570 = vmatmul.msk.bf16.vlgmr.msrb.gmra.mxu3 %vm1363_vm1, %v3128_v57  ;;  %3571 = vmatmul.msk.bf16.vlgmr.msra.gmra.mxu2 %vm1363_vm1, %v3128_v57 }
 0x52c   : > { %v3313_v11 = vpop.f32.mrf.mxu3  ;;  %v3327_v22 = vpop.f32.mrf.mxu2 }
 0x52d   : > { %v3314_v56 = vadd.f32 %v3313_v11, %v3166_v28  ;;  %v3328_v16 = vadd.f32 %v3327_v22, %v3166_v28 }
 0x52f   : > { %v3336_v54 = vadd.f32 %v3332_v1, %v3314_v56  ;;  %v3337_v30 = vadd.f32 %v3333_v34, %v3328_v16 }
 0x531   : > { %3340 = vst [vmem:[%s467_s21] sm:$0xff] %v3336_v54 }
 0x532   : > { %3341 = vst [vmem:[%s467_s21 + $0x8] sm:$0xff] %v3337_v30 }
 0x534   : > { %v3315_v21 = vpop.f32.mrf.mxu3  ;;  %v3329_v20 = vpop.f32.mrf.mxu2 }
 0x535   : > { %v3316_v45 = vadd.f32 %v3315_v21, %v3171_v14  ;;  %v3330_v19 = vadd.f32 %v3329_v20, %v3171_v14 }
 0x537   : > { %v3338_v25 = vadd.f32 %v3334_v61, %v3316_v45  ;;  %v3339_v43 = vadd.f32 %v3335_v37, %v3330_v19 }
 0x539   : > { %3342 = vst [vmem:[%s467_s21 + $0x10] sm:$0xff] %v3338_v25 }
 0x53a   : > { %3343 = vst [vmem:[%s467_s21 + $0x18] sm:$0xff] %v3339_v43 }
 0x53b PF: > { %s24_s29 = sadd.s32 1, %s3896_s29  }
 0x53c   : > { %p21_p4 = scmp.ge.s32.totalorder %s24_s29, 4  }
 0x53e   :  { %23 = sbr.rel (!%p21_p4) target bundleno = 1 (0x1), region = 111 }

</bundles_post_ra>
